<compile_context>
chip_gen: v5e
topology: v5e:2x2
jax: 0.10.0
libtpu: 0.0.40
codegen_flags: <defaults>
</compile_context>

<pallas_src>
import jax
import jax.numpy as jnp
from jax.experimental import pallas as pl
from jax.experimental.pallas import tpu as pltpu

INPUT_SIZE = 3
HIDDEN_SIZE = 100
OUTPUT_SIZE = 3
SEQ_LEN = 8

LANE = 128  # per-gate / feature / output padding target


def _lstm_kernel(x_ref, wx0_ref, b0_ref, wbig_ref, b1_ref, wl_ref, bl_ref,
                 out_ref, xproj_ref):
    """Full 2-layer LSTM recurrence + final linear in one kernel."""
    Hp = LANE
    G = 4 * Hp                      # 512 gate lanes per layer
    seq_len = x_ref.shape[0]
    cdt = wbig_ref.dtype            # MXU operand dtype (bfloat16)

    # ---- Hoisted layer-0 input projection for ALL timesteps (one MXU pass) ----
    # Parked in VMEM scratch so the per-step row read is a vld, not a sublane
    # select from a live vreg value on the serial path.
    xproj_ref[...] = (jnp.dot(x_ref[...].astype(cdt), wx0_ref[...],
                              preferred_element_type=jnp.float32)
                      + b0_ref[...])

    def gates(g, c):
        # gate layout [i, f, o, g]: one sigmoid over 3*Hp lanes, one tanh over Hp
        sg = jax.nn.sigmoid(g[:, 0:3 * Hp])
        i = sg[:, 0 * Hp:1 * Hp]
        f = sg[:, 1 * Hp:2 * Hp]
        o = sg[:, 2 * Hp:3 * Hp]
        gg = jnp.tanh(g[:, 3 * Hp:4 * Hp])
        c_n = f * c + i * gg
        h_n = o * jnp.tanh(c_n)
        return h_n, c_n

    z = jnp.zeros((1, Hp), jnp.float32)    # hidden_cell initialized to zeros
    c0, h1, c1 = z, z, z
    g0_recur = jnp.zeros((1, G), jnp.float32)   # h0(-1) @ wh0 == 0

    # ---- Fully unrolled recurrence (seq_len static and small) ----
    for t in range(seq_len):
        # layer 0, step t: precomputed x-projection + recurrent term from wave t-1
        g0 = xproj_ref[t:t + 1, :] + g0_recur
        h0, c0 = gates(g0, c0)

        # ONE fused block-diagonal matmul per wave (K=256, N=1024):
        #   cols 0..511    -> g0_recur(t+1) = h0(t) @ wh0
        #   cols 512..1023 -> g1_pre(t)     = h0(t) @ wx1 + h1(t-1) @ wh1
        lhs = jnp.concatenate([h0.astype(cdt), h1.astype(cdt)], axis=1)  # (1, 256)
        fused = jnp.dot(lhs, wbig_ref[...], preferred_element_type=jnp.float32)
        g0_recur = fused[:, 0:G]        # unused after the last wave (dead code)

        # layer 1, step t
        g1 = fused[:, G:2 * G] + b1_ref[...]
        h1, c1 = gates(g1, c1)

    # final linear on last-timestep top-layer hidden state (off the loop path)
    out_ref[...] = (jnp.dot(h1.astype(cdt), wl_ref[...],
                            preferred_element_type=jnp.float32)
                    + bl_ref[...])


# ----------------------------- parameter prep ------------------------------

_GATE_ORDER = (0, 1, 3, 2)  # PyTorch [i, f, g, o] -> kernel layout [i, f, o, g]


def _pack_gates(w_t, H, Hp):
    """(rows, 4H) PyTorch gate order -> (rows, 4Hp) layout [i,f,o,g], padded to Hp."""
    parts = [jnp.pad(w_t[:, j * H:(j + 1) * H], ((0, 0), (0, Hp - H)))
             for j in _GATE_ORDER]
    return jnp.concatenate(parts, axis=1)


def _pad_rows(w, rows_to):
    return jnp.pad(w, ((0, rows_to - w.shape[0]), (0, 0)))


def prepare_params(params, compute_dtype=jnp.bfloat16):
    """Pad / transpose / fuse biases / reorder gates / cast ONCE, outside the hot path."""
    H, Hp = HIDDEN_SIZE, LANE
    (w_ih0, w_hh0, b_ih0, b_hh0,
     w_ih1, w_hh1, b_ih1, b_hh1,
     w_lin, b_lin) = params

    # layer 0 input projection (hoisted) + fused bias
    wx0 = _pad_rows(_pack_gates(w_ih0.T, H, Hp), Hp).astype(compute_dtype)      # (128, 512)
    b0 = _pack_gates((b_ih0 + b_hh0)[None, :], H, Hp).astype(jnp.float32)       # (1, 512)

    # fused block-diagonal recurrent weight: [[wh0, wx1], [0, wh1]]
    wh0 = _pad_rows(_pack_gates(w_hh0.T, H, Hp), Hp)                            # (128, 512)
    wx1 = _pad_rows(_pack_gates(w_ih1.T, H, Hp), Hp)                            # (128, 512)
    wh1 = _pad_rows(_pack_gates(w_hh1.T, H, Hp), Hp)                            # (128, 512)
    top = jnp.concatenate([wh0, wx1], axis=1)                                   # (128, 1024)
    bot = jnp.concatenate([jnp.zeros_like(wh1), wh1], axis=1)                   # (128, 1024)
    wbig = jnp.concatenate([top, bot], axis=0).astype(compute_dtype)            # (256, 1024)

    b1 = _pack_gates((b_ih1 + b_hh1)[None, :], H, Hp).astype(jnp.float32)       # (1, 512)

    # final linear
    wl = jnp.pad(w_lin.T, ((0, Hp - H), (0, LANE - OUTPUT_SIZE))).astype(compute_dtype)  # (128, 128)
    bl = jnp.pad(b_lin[None, :], ((0, 0), (0, LANE - OUTPUT_SIZE))).astype(jnp.float32)  # (1, 128)

    return (wx0, b0, wbig, b1, wl, bl)


@jax.jit
def lstm_forward(x, prepped):
    """x: (seq_len, input_size) f32. prepped: output of prepare_params.
    Returns (output_size,) f32 — prediction for the last timestep."""
    wx0, b0, wbig, b1, wl, bl = prepped
    xp = jnp.pad(x.astype(jnp.float32), ((0, 0), (0, LANE - x.shape[1])))  # (seq, 128)

    vmem = pl.BlockSpec(memory_space=pltpu.MemorySpace.VMEM)
    out = pl.pallas_call(
        _lstm_kernel,
        out_shape=jax.ShapeDtypeStruct((1, LANE), jnp.float32),
        in_specs=[vmem] * 7,
        out_specs=vmem,
        scratch_shapes=[pltpu.VMEM((SEQ_LEN, 4 * LANE), jnp.float32)],
    )(xp, wx0, b0, wbig, b1, wl, bl)

    return out[0, :OUTPUT_SIZE]


# ------------------------------- reference ---------------------------------

def _reference_forward(x, params):
    """Pure-JAX f32 reference matching PyTorch nn.LSTM(num_layers=2) + Linear."""
    (w_ih0, w_hh0, b_ih0, b_hh0,
     w_ih1, w_hh1, b_ih1, b_hh1,
     w_lin, b_lin) = params
    H = HIDDEN_SIZE

    def cell(x_t, h, c, w_ih, w_hh, b_ih, b_hh):
        g = x_t @ w_ih.T + b_ih + h @ w_hh.T + b_hh
        i = jax.nn.sigmoid(g[0:H])
        f = jax.nn.sigmoid(g[H:2 * H])
        gg = jnp.tanh(g[2 * H:3 * H])
        o = jax.nn.sigmoid(g[3 * H:4 * H])
        c_n = f * c + i * gg
        h_n = o * jnp.tanh(c_n)
        return h_n, c_n

    h0 = c0 = h1 = c1 = jnp.zeros((H,), jnp.float32)
    for t in range(x.shape[0]):
        h0, c0 = cell(x[t], h0, c0, w_ih0, w_hh0, b_ih0, b_hh0)
        h1, c1 = cell(h0, h1, c1, w_ih1, w_hh1, b_ih1, b_hh1)
    return h1 @ w_lin.T + b_lin


def init_params(key):
    """Deterministic init mimicking PyTorch's uniform(-1/sqrt(H), 1/sqrt(H))."""
    H, I, O = HIDDEN_SIZE, INPUT_SIZE, OUTPUT_SIZE
    k = 1.0 / jnp.sqrt(jnp.float32(H))
    keys = jax.random.split(key, 10)
    u = lambda kk, shape: jax.random.uniform(kk, shape, jnp.float32, -k, k)
    return (
        u(keys[0], (4 * H, I)),   # weight_ih_l0
        u(keys[1], (4 * H, H)),   # weight_hh_l0
        u(keys[2], (4 * H,)),     # bias_ih_l0
        u(keys[3], (4 * H,)),     # bias_hh_l0
        u(keys[4], (4 * H, H)),   # weight_ih_l1
        u(keys[5], (4 * H, H)),   # weight_hh_l1
        u(keys[6], (4 * H,)),     # bias_ih_l1
        u(keys[7], (4 * H,)),     # bias_hh_l1
        u(keys[8], (O, H)),       # linear weight
        u(keys[9], (O,)),         # linear bias
    )


if __name__ == "__main__":
    key = jax.random.PRNGKey(0)
    pkey, xkey = jax.random.split(key)
    params = init_params(pkey)

    # TODO(synk): the PyTorch module carries self.hidden_cell across calls; the
    # kernel starts each call from zero (h, c), the standard single-sequence use.
    # If carried state is ever passed in, zero padded lanes (100..127) on entry.
    prepped = prepare_params(params)  # pad/transpose/reorder/cast ONCE
    prepped = jax.tree_util.tree_map(jax.block_until_ready, prepped)

    # input_seq: (seq_len, input_size), matching input_seq.view(len, 1, -1) with batch=1.
    x = jax.random.normal(xkey, (SEQ_LEN, INPUT_SIZE), jnp.float32)

    out = lstm_forward(x, prepped)
    out = jax.block_until_ready(out)

    ref = _reference_forward(x, params)
    assert out.shape == (OUTPUT_SIZE,)
    # bf16 MXU operands with f32 accumulation -> looser tolerance vs f32 reference.
    assert jnp.allclose(out, ref, rtol=2e-2, atol=2e-2), (out, ref)

    print("KERNEL_OK")
</pallas_src>

<mosaic_0001>
module attributes {stable_mosaic.version = 11 : i64} {
  func.func @_lstm_kernel(%arg0: memref<8x128xf32, #tpu.memory_space<vmem>>, %arg1: memref<128x512xbf16, #tpu.memory_space<vmem>>, %arg2: memref<1x512xf32, #tpu.memory_space<vmem>>, %arg3: memref<256x1024xbf16, #tpu.memory_space<vmem>>, %arg4: memref<1x512xf32, #tpu.memory_space<vmem>>, %arg5: memref<128x128xbf16, #tpu.memory_space<vmem>>, %arg6: memref<1x128xf32, #tpu.memory_space<vmem>>, %arg7: memref<1x128xf32, #tpu.memory_space<vmem>>, %arg8: memref<8x512xf32, #tpu.memory_space<vmem>>) attributes {dimension_semantics = [], scalar_prefetch = 0 : i64, scratch_operands = 1 : i64, tpu.core_type = #tpu.core_type<tc>} {
    %c0 = arith.constant 0 : index
    %c0_0 = arith.constant 0 : index
    %0 = vector.load %arg0[%c0, %c0_0] : memref<8x128xf32, #tpu.memory_space<vmem>>, vector<8x128xf32>
    %1 = arith.truncf %0 : vector<8x128xf32> to vector<8x128xbf16>
    %c0_1 = arith.constant 0 : index
    %c0_2 = arith.constant 0 : index
    %2 = vector.load %arg1[%c0_1, %c0_2] : memref<128x512xbf16, #tpu.memory_space<vmem>>, vector<128x512xbf16>
    %cst = arith.constant dense<0.000000e+00> : vector<8x512xf32>
    %3 = tpu.matmul %1, %2, %cst {dimension_numbers = #tpu.dot_dimension_numbers<[1], [0], [0], [1], [0, 0, 1, 1], [], []>} : vector<8x128xbf16>, vector<128x512xbf16>, vector<8x512xf32> -> vector<8x512xf32>
    %c0_3 = arith.constant 0 : index
    %c0_4 = arith.constant 0 : index
    %4 = vector.load %arg2[%c0_3, %c0_4] : memref<1x512xf32, #tpu.memory_space<vmem>>, vector<1x512xf32>
    %5 = vector.broadcast %4 : vector<1x512xf32> to vector<8x512xf32>
    %6 = arith.addf %3, %5 : vector<8x512xf32>
    %c0_5 = arith.constant 0 : index
    %c0_6 = arith.constant 0 : index
    %7 = vector.load %arg8[%c0_5, %c0_6] : memref<8x512xf32, #tpu.memory_space<vmem>>, vector<8x512xf32>
    tpu.vector_store %arg8[%c0_5, %c0_6], %6 {strides = array<i32>} : memref<8x512xf32, #tpu.memory_space<vmem>>, vector<8x512xf32>,
    %cst_7 = arith.constant 0.000000e+00 : f32
    %8 = vector.broadcast %cst_7 : f32 to vector<1x128xf32>
    %cst_8 = arith.constant 0.000000e+00 : f32
    %9 = vector.broadcast %cst_8 : f32 to vector<1x512xf32>
    %c0_9 = arith.constant 0 : index
    %c0_10 = arith.constant 0 : index
    %10 = vector.load %arg8[%c0_9, %c0_10] : memref<8x512xf32, #tpu.memory_space<vmem>>, vector<1x512xf32>
    %11 = arith.addf %10, %9 : vector<1x512xf32>
    %12 = vector.extract_strided_slice %11 {offsets = [0, 0], sizes = [1, 384], strides = [1, 1]} : vector<1x512xf32> to vector<1x384xf32>
    %13 = arith.negf %12 : vector<1x384xf32>
    %14 = math.exp %13 : vector<1x384xf32>
    %cst_11 = arith.constant 1.000000e+00 : f32
    %15 = vector.broadcast %cst_11 : f32 to vector<1x384xf32>
    %16 = arith.addf %15, %14 : vector<1x384xf32>
    %17 = arith.divf %15, %16 : vector<1x384xf32>
    %18 = vector.extract_strided_slice %17 {offsets = [0, 0], sizes = [1, 128], strides = [1, 1]} : vector<1x384xf32> to vector<1x128xf32>
    %19 = vector.extract_strided_slice %17 {offsets = [0, 128], sizes = [1, 128], strides = [1, 1]} : vector<1x384xf32> to vector<1x128xf32>
    %20 = vector.extract_strided_slice %17 {offsets = [0, 256], sizes = [1, 128], strides = [1, 1]} : vector<1x384xf32> to vector<1x128xf32>
    %21 = vector.extract_strided_slice %11 {offsets = [0, 384], sizes = [1, 128], strides = [1, 1]} : vector<1x512xf32> to vector<1x128xf32>
    %22 = math.tanh %21 : vector<1x128xf32>
    %23 = arith.mulf %19, %8 : vector<1x128xf32>
    %24 = arith.mulf %18, %22 : vector<1x128xf32>
    %25 = arith.addf %23, %24 : vector<1x128xf32>
    %26 = math.tanh %25 : vector<1x128xf32>
    %27 = arith.mulf %20, %26 : vector<1x128xf32>
    %28 = arith.truncf %27 : vector<1x128xf32> to vector<1x128xbf16>
    %29 = arith.truncf %8 : vector<1x128xf32> to vector<1x128xbf16>
    %30 = tpu.concatenate %28, %29 in 1 : vector<1x128xbf16>, vector<1x128xbf16> -> vector<1x256xbf16>
    %c0_12 = arith.constant 0 : index
    %c0_13 = arith.constant 0 : index
    %31 = vector.load %arg3[%c0_12, %c0_13] : memref<256x1024xbf16, #tpu.memory_space<vmem>>, vector<256x1024xbf16>
    %cst_14 = arith.constant dense<0.000000e+00> : vector<1x1024xf32>
    %32 = tpu.matmul %30, %31, %cst_14 {dimension_numbers = #tpu.dot_dimension_numbers<[1], [0], [0], [1], [0, 0, 1, 1], [], []>} : vector<1x256xbf16>, vector<256x1024xbf16>, vector<1x1024xf32> -> vector<1x1024xf32>
    %33 = vector.extract_strided_slice %32 {offsets = [0, 0], sizes = [1, 512], strides = [1, 1]} : vector<1x1024xf32> to vector<1x512xf32>
    %34 = vector.extract_strided_slice %32 {offsets = [0, 512], sizes = [1, 512], strides = [1, 1]} : vector<1x1024xf32> to vector<1x512xf32>
    %c0_15 = arith.constant 0 : index
    %c0_16 = arith.constant 0 : index
    %35 = vector.load %arg4[%c0_15, %c0_16] : memref<1x512xf32, #tpu.memory_space<vmem>>, vector<1x512xf32>
    %36 = arith.addf %34, %35 : vector<1x512xf32>
    %37 = vector.extract_strided_slice %36 {offsets = [0, 0], sizes = [1, 384], strides = [1, 1]} : vector<1x512xf32> to vector<1x384xf32>
    %38 = arith.negf %37 : vector<1x384xf32>
    %39 = math.exp %38 : vector<1x384xf32>
    %cst_17 = arith.constant 1.000000e+00 : f32
    %40 = vector.broadcast %cst_17 : f32 to vector<1x384xf32>
    %41 = arith.addf %40, %39 : vector<1x384xf32>
    %42 = arith.divf %40, %41 : vector<1x384xf32>
    %43 = vector.extract_strided_slice %42 {offsets = [0, 0], sizes = [1, 128], strides = [1, 1]} : vector<1x384xf32> to vector<1x128xf32>
    %44 = vector.extract_strided_slice %42 {offsets = [0, 128], sizes = [1, 128], strides = [1, 1]} : vector<1x384xf32> to vector<1x128xf32>
    %45 = vector.extract_strided_slice %42 {offsets = [0, 256], sizes = [1, 128], strides = [1, 1]} : vector<1x384xf32> to vector<1x128xf32>
    %46 = vector.extract_strided_slice %36 {offsets = [0, 384], sizes = [1, 128], strides = [1, 1]} : vector<1x512xf32> to vector<1x128xf32>
    %47 = math.tanh %46 : vector<1x128xf32>
    %48 = arith.mulf %44, %8 : vector<1x128xf32>
    %49 = arith.mulf %43, %47 : vector<1x128xf32>
    %50 = arith.addf %48, %49 : vector<1x128xf32>
    %51 = math.tanh %50 : vector<1x128xf32>
    %52 = arith.mulf %45, %51 : vector<1x128xf32>
    %c1 = arith.constant 1 : index
    %c0_18 = arith.constant 0 : index
    %53 = vector.load %arg8[%c1, %c0_18] : memref<8x512xf32, #tpu.memory_space<vmem>>, vector<1x512xf32>
    %54 = arith.addf %53, %33 : vector<1x512xf32>
    %55 = vector.extract_strided_slice %54 {offsets = [0, 0], sizes = [1, 384], strides = [1, 1]} : vector<1x512xf32> to vector<1x384xf32>
    %56 = arith.negf %55 : vector<1x384xf32>
    %57 = math.exp %56 : vector<1x384xf32>
    %cst_19 = arith.constant 1.000000e+00 : f32
    %58 = vector.broadcast %cst_19 : f32 to vector<1x384xf32>
    %59 = arith.addf %58, %57 : vector<1x384xf32>
    %60 = arith.divf %58, %59 : vector<1x384xf32>
    %61 = vector.extract_strided_slice %60 {offsets = [0, 0], sizes = [1, 128], strides = [1, 1]} : vector<1x384xf32> to vector<1x128xf32>
    %62 = vector.extract_strided_slice %60 {offsets = [0, 128], sizes = [1, 128], strides = [1, 1]} : vector<1x384xf32> to vector<1x128xf32>
    %63 = vector.extract_strided_slice %60 {offsets = [0, 256], sizes = [1, 128], strides = [1, 1]} : vector<1x384xf32> to vector<1x128xf32>
    %64 = vector.extract_strided_slice %54 {offsets = [0, 384], sizes = [1, 128], strides = [1, 1]} : vector<1x512xf32> to vector<1x128xf32>
    %65 = math.tanh %64 : vector<1x128xf32>
    %66 = arith.mulf %62, %25 : vector<1x128xf32>
    %67 = arith.mulf %61, %65 : vector<1x128xf32>
    %68 = arith.addf %66, %67 : vector<1x128xf32>
    %69 = math.tanh %68 : vector<1x128xf32>
    %70 = arith.mulf %63, %69 : vector<1x128xf32>
    %71 = arith.truncf %70 : vector<1x128xf32> to vector<1x128xbf16>
    %72 = arith.truncf %52 : vector<1x128xf32> to vector<1x128xbf16>
    %73 = tpu.concatenate %71, %72 in 1 : vector<1x128xbf16>, vector<1x128xbf16> -> vector<1x256xbf16>
    %c0_20 = arith.constant 0 : index
    %c0_21 = arith.constant 0 : index
    %74 = vector.load %arg3[%c0_20, %c0_21] : memref<256x1024xbf16, #tpu.memory_space<vmem>>, vector<256x1024xbf16>
    %cst_22 = arith.constant dense<0.000000e+00> : vector<1x1024xf32>
    %75 = tpu.matmul %73, %74, %cst_22 {dimension_numbers = #tpu.dot_dimension_numbers<[1], [0], [0], [1], [0, 0, 1, 1], [], []>} : vector<1x256xbf16>, vector<256x1024xbf16>, vector<1x1024xf32> -> vector<1x1024xf32>
    %76 = vector.extract_strided_slice %75 {offsets = [0, 0], sizes = [1, 512], strides = [1, 1]} : vector<1x1024xf32> to vector<1x512xf32>
    %77 = vector.extract_strided_slice %75 {offsets = [0, 512], sizes = [1, 512], strides = [1, 1]} : vector<1x1024xf32> to vector<1x512xf32>
    %c0_23 = arith.constant 0 : index
    %c0_24 = arith.constant 0 : index
    %78 = vector.load %arg4[%c0_23, %c0_24] : memref<1x512xf32, #tpu.memory_space<vmem>>, vector<1x512xf32>
    %79 = arith.addf %77, %78 : vector<1x512xf32>
    %80 = vector.extract_strided_slice %79 {offsets = [0, 0], sizes = [1, 384], strides = [1, 1]} : vector<1x512xf32> to vector<1x384xf32>
    %81 = arith.negf %80 : vector<1x384xf32>
    %82 = math.exp %81 : vector<1x384xf32>
    %cst_25 = arith.constant 1.000000e+00 : f32
    %83 = vector.broadcast %cst_25 : f32 to vector<1x384xf32>
    %84 = arith.addf %83, %82 : vector<1x384xf32>
    %85 = arith.divf %83, %84 : vector<1x384xf32>
    %86 = vector.extract_strided_slice %85 {offsets = [0, 0], sizes = [1, 128], strides = [1, 1]} : vector<1x384xf32> to vector<1x128xf32>
    %87 = vector.extract_strided_slice %85 {offsets = [0, 128], sizes = [1, 128], strides = [1, 1]} : vector<1x384xf32> to vector<1x128xf32>
    %88 = vector.extract_strided_slice %85 {offsets = [0, 256], sizes = [1, 128], strides = [1, 1]} : vector<1x384xf32> to vector<1x128xf32>
    %89 = vector.extract_strided_slice %79 {offsets = [0, 384], sizes = [1, 128], strides = [1, 1]} : vector<1x512xf32> to vector<1x128xf32>
    %90 = math.tanh %89 : vector<1x128xf32>
    %91 = arith.mulf %87, %50 : vector<1x128xf32>
    %92 = arith.mulf %86, %90 : vector<1x128xf32>
    %93 = arith.addf %91, %92 : vector<1x128xf32>
    %94 = math.tanh %93 : vector<1x128xf32>
    %95 = arith.mulf %88, %94 : vector<1x128xf32>
    %c2 = arith.constant 2 : index
    %c0_26 = arith.constant 0 : index
    %96 = vector.load %arg8[%c2, %c0_26] : memref<8x512xf32, #tpu.memory_space<vmem>>, vector<1x512xf32>
    %97 = arith.addf %96, %76 : vector<1x512xf32>
    %98 = vector.extract_strided_slice %97 {offsets = [0, 0], sizes = [1, 384], strides = [1, 1]} : vector<1x512xf32> to vector<1x384xf32>
    %99 = arith.negf %98 : vector<1x384xf32>
    %100 = math.exp %99 : vector<1x384xf32>
    %cst_27 = arith.constant 1.000000e+00 : f32
    %101 = vector.broadcast %cst_27 : f32 to vector<1x384xf32>
    %102 = arith.addf %101, %100 : vector<1x384xf32>
    %103 = arith.divf %101, %102 : vector<1x384xf32>
    %104 = vector.extract_strided_slice %103 {offsets = [0, 0], sizes = [1, 128], strides = [1, 1]} : vector<1x384xf32> to vector<1x128xf32>
    %105 = vector.extract_strided_slice %103 {offsets = [0, 128], sizes = [1, 128], strides = [1, 1]} : vector<1x384xf32> to vector<1x128xf32>
    %106 = vector.extract_strided_slice %103 {offsets = [0, 256], sizes = [1, 128], strides = [1, 1]} : vector<1x384xf32> to vector<1x128xf32>
    %107 = vector.extract_strided_slice %97 {offsets = [0, 384], sizes = [1, 128], strides = [1, 1]} : vector<1x512xf32> to vector<1x128xf32>
    %108 = math.tanh %107 : vector<1x128xf32>
    %109 = arith.mulf %105, %68 : vector<1x128xf32>
    %110 = arith.mulf %104, %108 : vector<1x128xf32>
    %111 = arith.addf %109, %110 : vector<1x128xf32>
    %112 = math.tanh %111 : vector<1x128xf32>
    %113 = arith.mulf %106, %112 : vector<1x128xf32>
    %114 = arith.truncf %113 : vector<1x128xf32> to vector<1x128xbf16>
    %115 = arith.truncf %95 : vector<1x128xf32> to vector<1x128xbf16>
    %116 = tpu.concatenate %114, %115 in 1 : vector<1x128xbf16>, vector<1x128xbf16> -> vector<1x256xbf16>
    %c0_28 = arith.constant 0 : index
    %c0_29 = arith.constant 0 : index
    %117 = vector.load %arg3[%c0_28, %c0_29] : memref<256x1024xbf16, #tpu.memory_space<vmem>>, vector<256x1024xbf16>
    %cst_30 = arith.constant dense<0.000000e+00> : vector<1x1024xf32>
    %118 = tpu.matmul %116, %117, %cst_30 {dimension_numbers = #tpu.dot_dimension_numbers<[1], [0], [0], [1], [0, 0, 1, 1], [], []>} : vector<1x256xbf16>, vector<256x1024xbf16>, vector<1x1024xf32> -> vector<1x1024xf32>
    %119 = vector.extract_strided_slice %118 {offsets = [0, 0], sizes = [1, 512], strides = [1, 1]} : vector<1x1024xf32> to vector<1x512xf32>
    %120 = vector.extract_strided_slice %118 {offsets = [0, 512], sizes = [1, 512], strides = [1, 1]} : vector<1x1024xf32> to vector<1x512xf32>
    %c0_31 = arith.constant 0 : index
    %c0_32 = arith.constant 0 : index
    %121 = vector.load %arg4[%c0_31, %c0_32] : memref<1x512xf32, #tpu.memory_space<vmem>>, vector<1x512xf32>
    %122 = arith.addf %120, %121 : vector<1x512xf32>
    %123 = vector.extract_strided_slice %122 {offsets = [0, 0], sizes = [1, 384], strides = [1, 1]} : vector<1x512xf32> to vector<1x384xf32>
    %124 = arith.negf %123 : vector<1x384xf32>
    %125 = math.exp %124 : vector<1x384xf32>
    %cst_33 = arith.constant 1.000000e+00 : f32
    %126 = vector.broadcast %cst_33 : f32 to vector<1x384xf32>
    %127 = arith.addf %126, %125 : vector<1x384xf32>
    %128 = arith.divf %126, %127 : vector<1x384xf32>
    %129 = vector.extract_strided_slice %128 {offsets = [0, 0], sizes = [1, 128], strides = [1, 1]} : vector<1x384xf32> to vector<1x128xf32>
    %130 = vector.extract_strided_slice %128 {offsets = [0, 128], sizes = [1, 128], strides = [1, 1]} : vector<1x384xf32> to vector<1x128xf32>
    %131 = vector.extract_strided_slice %128 {offsets = [0, 256], sizes = [1, 128], strides = [1, 1]} : vector<1x384xf32> to vector<1x128xf32>
    %132 = vector.extract_strided_slice %122 {offsets = [0, 384], sizes = [1, 128], strides = [1, 1]} : vector<1x512xf32> to vector<1x128xf32>
    %133 = math.tanh %132 : vector<1x128xf32>
    %134 = arith.mulf %130, %93 : vector<1x128xf32>
    %135 = arith.mulf %129, %133 : vector<1x128xf32>
    %136 = arith.addf %134, %135 : vector<1x128xf32>
    %137 = math.tanh %136 : vector<1x128xf32>
    %138 = arith.mulf %131, %137 : vector<1x128xf32>
    %c3 = arith.constant 3 : index
    %c0_34 = arith.constant 0 : index
    %139 = vector.load %arg8[%c3, %c0_34] : memref<8x512xf32, #tpu.memory_space<vmem>>, vector<1x512xf32>
    %140 = arith.addf %139, %119 : vector<1x512xf32>
    %141 = vector.extract_strided_slice %140 {offsets = [0, 0], sizes = [1, 384], strides = [1, 1]} : vector<1x512xf32> to vector<1x384xf32>
    %142 = arith.negf %141 : vector<1x384xf32>
    %143 = math.exp %142 : vector<1x384xf32>
    %cst_35 = arith.constant 1.000000e+00 : f32
    %144 = vector.broadcast %cst_35 : f32 to vector<1x384xf32>
    %145 = arith.addf %144, %143 : vector<1x384xf32>
    %146 = arith.divf %144, %145 : vector<1x384xf32>
    %147 = vector.extract_strided_slice %146 {offsets = [0, 0], sizes = [1, 128], strides = [1, 1]} : vector<1x384xf32> to vector<1x128xf32>
    %148 = vector.extract_strided_slice %146 {offsets = [0, 128], sizes = [1, 128], strides = [1, 1]} : vector<1x384xf32> to vector<1x128xf32>
    %149 = vector.extract_strided_slice %146 {offsets = [0, 256], sizes = [1, 128], strides = [1, 1]} : vector<1x384xf32> to vector<1x128xf32>
    %150 = vector.extract_strided_slice %140 {offsets = [0, 384], sizes = [1, 128], strides = [1, 1]} : vector<1x512xf32> to vector<1x128xf32>
    %151 = math.tanh %150 : vector<1x128xf32>
    %152 = arith.mulf %148, %111 : vector<1x128xf32>
    %153 = arith.mulf %147, %151 : vector<1x128xf32>
    %154 = arith.addf %152, %153 : vector<1x128xf32>
    %155 = math.tanh %154 : vector<1x128xf32>
    %156 = arith.mulf %149, %155 : vector<1x128xf32>
    %157 = arith.truncf %156 : vector<1x128xf32> to vector<1x128xbf16>
    %158 = arith.truncf %138 : vector<1x128xf32> to vector<1x128xbf16>
    %159 = tpu.concatenate %157, %158 in 1 : vector<1x128xbf16>, vector<1x128xbf16> -> vector<1x256xbf16>
    %c0_36 = arith.constant 0 : index
    %c0_37 = arith.constant 0 : index
    %160 = vector.load %arg3[%c0_36, %c0_37] : memref<256x1024xbf16, #tpu.memory_space<vmem>>, vector<256x1024xbf16>
    %cst_38 = arith.constant dense<0.000000e+00> : vector<1x1024xf32>
    %161 = tpu.matmul %159, %160, %cst_38 {dimension_numbers = #tpu.dot_dimension_numbers<[1], [0], [0], [1], [0, 0, 1, 1], [], []>} : vector<1x256xbf16>, vector<256x1024xbf16>, vector<1x1024xf32> -> vector<1x1024xf32>
    %162 = vector.extract_strided_slice %161 {offsets = [0, 0], sizes = [1, 512], strides = [1, 1]} : vector<1x1024xf32> to vector<1x512xf32>
    %163 = vector.extract_strided_slice %161 {offsets = [0, 512], sizes = [1, 512], strides = [1, 1]} : vector<1x1024xf32> to vector<1x512xf32>
    %c0_39 = arith.constant 0 : index
    %c0_40 = arith.constant 0 : index
    %164 = vector.load %arg4[%c0_39, %c0_40] : memref<1x512xf32, #tpu.memory_space<vmem>>, vector<1x512xf32>
    %165 = arith.addf %163, %164 : vector<1x512xf32>
    %166 = vector.extract_strided_slice %165 {offsets = [0, 0], sizes = [1, 384], strides = [1, 1]} : vector<1x512xf32> to vector<1x384xf32>
    %167 = arith.negf %166 : vector<1x384xf32>
    %168 = math.exp %167 : vector<1x384xf32>
    %cst_41 = arith.constant 1.000000e+00 : f32
    %169 = vector.broadcast %cst_41 : f32 to vector<1x384xf32>
    %170 = arith.addf %169, %168 : vector<1x384xf32>
    %171 = arith.divf %169, %170 : vector<1x384xf32>
    %172 = vector.extract_strided_slice %171 {offsets = [0, 0], sizes = [1, 128], strides = [1, 1]} : vector<1x384xf32> to vector<1x128xf32>
    %173 = vector.extract_strided_slice %171 {offsets = [0, 128], sizes = [1, 128], strides = [1, 1]} : vector<1x384xf32> to vector<1x128xf32>
    %174 = vector.extract_strided_slice %171 {offsets = [0, 256], sizes = [1, 128], strides = [1, 1]} : vector<1x384xf32> to vector<1x128xf32>
    %175 = vector.extract_strided_slice %165 {offsets = [0, 384], sizes = [1, 128], strides = [1, 1]} : vector<1x512xf32> to vector<1x128xf32>
    %176 = math.tanh %175 : vector<1x128xf32>
    %177 = arith.mulf %173, %136 : vector<1x128xf32>
    %178 = arith.mulf %172, %176 : vector<1x128xf32>
    %179 = arith.addf %177, %178 : vector<1x128xf32>
    %180 = math.tanh %179 : vector<1x128xf32>
    %181 = arith.mulf %174, %180 : vector<1x128xf32>
    %c4 = arith.constant 4 : index
    %c0_42 = arith.constant 0 : index
    %182 = vector.load %arg8[%c4, %c0_42] : memref<8x512xf32, #tpu.memory_space<vmem>>, vector<1x512xf32>
    %183 = arith.addf %182, %162 : vector<1x512xf32>
    %184 = vector.extract_strided_slice %183 {offsets = [0, 0], sizes = [1, 384], strides = [1, 1]} : vector<1x512xf32> to vector<1x384xf32>
    %185 = arith.negf %184 : vector<1x384xf32>
    %186 = math.exp %185 : vector<1x384xf32>
    %cst_43 = arith.constant 1.000000e+00 : f32
    %187 = vector.broadcast %cst_43 : f32 to vector<1x384xf32>
    %188 = arith.addf %187, %186 : vector<1x384xf32>
    %189 = arith.divf %187, %188 : vector<1x384xf32>
    %190 = vector.extract_strided_slice %189 {offsets = [0, 0], sizes = [1, 128], strides = [1, 1]} : vector<1x384xf32> to vector<1x128xf32>
    %191 = vector.extract_strided_slice %189 {offsets = [0, 128], sizes = [1, 128], strides = [1, 1]} : vector<1x384xf32> to vector<1x128xf32>
    %192 = vector.extract_strided_slice %189 {offsets = [0, 256], sizes = [1, 128], strides = [1, 1]} : vector<1x384xf32> to vector<1x128xf32>
    %193 = vector.extract_strided_slice %183 {offsets = [0, 384], sizes = [1, 128], strides = [1, 1]} : vector<1x512xf32> to vector<1x128xf32>
    %194 = math.tanh %193 : vector<1x128xf32>
    %195 = arith.mulf %191, %154 : vector<1x128xf32>
    %196 = arith.mulf %190, %194 : vector<1x128xf32>
    %197 = arith.addf %195, %196 : vector<1x128xf32>
    %198 = math.tanh %197 : vector<1x128xf32>
    %199 = arith.mulf %192, %198 : vector<1x128xf32>
    %200 = arith.truncf %199 : vector<1x128xf32> to vector<1x128xbf16>
    %201 = arith.truncf %181 : vector<1x128xf32> to vector<1x128xbf16>
    %202 = tpu.concatenate %200, %201 in 1 : vector<1x128xbf16>, vector<1x128xbf16> -> vector<1x256xbf16>
    %c0_44 = arith.constant 0 : index
    %c0_45 = arith.constant 0 : index
    %203 = vector.load %arg3[%c0_44, %c0_45] : memref<256x1024xbf16, #tpu.memory_space<vmem>>, vector<256x1024xbf16>
    %cst_46 = arith.constant dense<0.000000e+00> : vector<1x1024xf32>
    %204 = tpu.matmul %202, %203, %cst_46 {dimension_numbers = #tpu.dot_dimension_numbers<[1], [0], [0], [1], [0, 0, 1, 1], [], []>} : vector<1x256xbf16>, vector<256x1024xbf16>, vector<1x1024xf32> -> vector<1x1024xf32>
    %205 = vector.extract_strided_slice %204 {offsets = [0, 0], sizes = [1, 512], strides = [1, 1]} : vector<1x1024xf32> to vector<1x512xf32>
    %206 = vector.extract_strided_slice %204 {offsets = [0, 512], sizes = [1, 512], strides = [1, 1]} : vector<1x1024xf32> to vector<1x512xf32>
    %c0_47 = arith.constant 0 : index
    %c0_48 = arith.constant 0 : index
    %207 = vector.load %arg4[%c0_47, %c0_48] : memref<1x512xf32, #tpu.memory_space<vmem>>, vector<1x512xf32>
    %208 = arith.addf %206, %207 : vector<1x512xf32>
    %209 = vector.extract_strided_slice %208 {offsets = [0, 0], sizes = [1, 384], strides = [1, 1]} : vector<1x512xf32> to vector<1x384xf32>
    %210 = arith.negf %209 : vector<1x384xf32>
    %211 = math.exp %210 : vector<1x384xf32>
    %cst_49 = arith.constant 1.000000e+00 : f32
    %212 = vector.broadcast %cst_49 : f32 to vector<1x384xf32>
    %213 = arith.addf %212, %211 : vector<1x384xf32>
    %214 = arith.divf %212, %213 : vector<1x384xf32>
    %215 = vector.extract_strided_slice %214 {offsets = [0, 0], sizes = [1, 128], strides = [1, 1]} : vector<1x384xf32> to vector<1x128xf32>
    %216 = vector.extract_strided_slice %214 {offsets = [0, 128], sizes = [1, 128], strides = [1, 1]} : vector<1x384xf32> to vector<1x128xf32>
    %217 = vector.extract_strided_slice %214 {offsets = [0, 256], sizes = [1, 128], strides = [1, 1]} : vector<1x384xf32> to vector<1x128xf32>
    %218 = vector.extract_strided_slice %208 {offsets = [0, 384], sizes = [1, 128], strides = [1, 1]} : vector<1x512xf32> to vector<1x128xf32>
    %219 = math.tanh %218 : vector<1x128xf32>
    %220 = arith.mulf %216, %179 : vector<1x128xf32>
    %221 = arith.mulf %215, %219 : vector<1x128xf32>
    %222 = arith.addf %220, %221 : vector<1x128xf32>
    %223 = math.tanh %222 : vector<1x128xf32>
    %224 = arith.mulf %217, %223 : vector<1x128xf32>
    %c5 = arith.constant 5 : index
    %c0_50 = arith.constant 0 : index
    %225 = vector.load %arg8[%c5, %c0_50] : memref<8x512xf32, #tpu.memory_space<vmem>>, vector<1x512xf32>
    %226 = arith.addf %225, %205 : vector<1x512xf32>
    %227 = vector.extract_strided_slice %226 {offsets = [0, 0], sizes = [1, 384], strides = [1, 1]} : vector<1x512xf32> to vector<1x384xf32>
    %228 = arith.negf %227 : vector<1x384xf32>
    %229 = math.exp %228 : vector<1x384xf32>
    %cst_51 = arith.constant 1.000000e+00 : f32
    %230 = vector.broadcast %cst_51 : f32 to vector<1x384xf32>
    %231 = arith.addf %230, %229 : vector<1x384xf32>
    %232 = arith.divf %230, %231 : vector<1x384xf32>
    %233 = vector.extract_strided_slice %232 {offsets = [0, 0], sizes = [1, 128], strides = [1, 1]} : vector<1x384xf32> to vector<1x128xf32>
    %234 = vector.extract_strided_slice %232 {offsets = [0, 128], sizes = [1, 128], strides = [1, 1]} : vector<1x384xf32> to vector<1x128xf32>
    %235 = vector.extract_strided_slice %232 {offsets = [0, 256], sizes = [1, 128], strides = [1, 1]} : vector<1x384xf32> to vector<1x128xf32>
    %236 = vector.extract_strided_slice %226 {offsets = [0, 384], sizes = [1, 128], strides = [1, 1]} : vector<1x512xf32> to vector<1x128xf32>
    %237 = math.tanh %236 : vector<1x128xf32>
    %238 = arith.mulf %234, %197 : vector<1x128xf32>
    %239 = arith.mulf %233, %237 : vector<1x128xf32>
    %240 = arith.addf %238, %239 : vector<1x128xf32>
    %241 = math.tanh %240 : vector<1x128xf32>
    %242 = arith.mulf %235, %241 : vector<1x128xf32>
    %243 = arith.truncf %242 : vector<1x128xf32> to vector<1x128xbf16>
    %244 = arith.truncf %224 : vector<1x128xf32> to vector<1x128xbf16>
    %245 = tpu.concatenate %243, %244 in 1 : vector<1x128xbf16>, vector<1x128xbf16> -> vector<1x256xbf16>
    %c0_52 = arith.constant 0 : index
    %c0_53 = arith.constant 0 : index
    %246 = vector.load %arg3[%c0_52, %c0_53] : memref<256x1024xbf16, #tpu.memory_space<vmem>>, vector<256x1024xbf16>
    %cst_54 = arith.constant dense<0.000000e+00> : vector<1x1024xf32>
    %247 = tpu.matmul %245, %246, %cst_54 {dimension_numbers = #tpu.dot_dimension_numbers<[1], [0], [0], [1], [0, 0, 1, 1], [], []>} : vector<1x256xbf16>, vector<256x1024xbf16>, vector<1x1024xf32> -> vector<1x1024xf32>
    %248 = vector.extract_strided_slice %247 {offsets = [0, 0], sizes = [1, 512], strides = [1, 1]} : vector<1x1024xf32> to vector<1x512xf32>
    %249 = vector.extract_strided_slice %247 {offsets = [0, 512], sizes = [1, 512], strides = [1, 1]} : vector<1x1024xf32> to vector<1x512xf32>
    %c0_55 = arith.constant 0 : index
    %c0_56 = arith.constant 0 : index
    %250 = vector.load %arg4[%c0_55, %c0_56] : memref<1x512xf32, #tpu.memory_space<vmem>>, vector<1x512xf32>
    %251 = arith.addf %249, %250 : vector<1x512xf32>
    %252 = vector.extract_strided_slice %251 {offsets = [0, 0], sizes = [1, 384], strides = [1, 1]} : vector<1x512xf32> to vector<1x384xf32>
    %253 = arith.negf %252 : vector<1x384xf32>
    %254 = math.exp %253 : vector<1x384xf32>
    %cst_57 = arith.constant 1.000000e+00 : f32
    %255 = vector.broadcast %cst_57 : f32 to vector<1x384xf32>
    %256 = arith.addf %255, %254 : vector<1x384xf32>
    %257 = arith.divf %255, %256 : vector<1x384xf32>
    %258 = vector.extract_strided_slice %257 {offsets = [0, 0], sizes = [1, 128], strides = [1, 1]} : vector<1x384xf32> to vector<1x128xf32>
    %259 = vector.extract_strided_slice %257 {offsets = [0, 128], sizes = [1, 128], strides = [1, 1]} : vector<1x384xf32> to vector<1x128xf32>
    %260 = vector.extract_strided_slice %257 {offsets = [0, 256], sizes = [1, 128], strides = [1, 1]} : vector<1x384xf32> to vector<1x128xf32>
    %261 = vector.extract_strided_slice %251 {offsets = [0, 384], sizes = [1, 128], strides = [1, 1]} : vector<1x512xf32> to vector<1x128xf32>
    %262 = math.tanh %261 : vector<1x128xf32>
    %263 = arith.mulf %259, %222 : vector<1x128xf32>
    %264 = arith.mulf %258, %262 : vector<1x128xf32>
    %265 = arith.addf %263, %264 : vector<1x128xf32>
    %266 = math.tanh %265 : vector<1x128xf32>
    %267 = arith.mulf %260, %266 : vector<1x128xf32>
    %c6 = arith.constant 6 : index
    %c0_58 = arith.constant 0 : index
    %268 = vector.load %arg8[%c6, %c0_58] : memref<8x512xf32, #tpu.memory_space<vmem>>, vector<1x512xf32>
    %269 = arith.addf %268, %248 : vector<1x512xf32>
    %270 = vector.extract_strided_slice %269 {offsets = [0, 0], sizes = [1, 384], strides = [1, 1]} : vector<1x512xf32> to vector<1x384xf32>
    %271 = arith.negf %270 : vector<1x384xf32>
    %272 = math.exp %271 : vector<1x384xf32>
    %cst_59 = arith.constant 1.000000e+00 : f32
    %273 = vector.broadcast %cst_59 : f32 to vector<1x384xf32>
    %274 = arith.addf %273, %272 : vector<1x384xf32>
    %275 = arith.divf %273, %274 : vector<1x384xf32>
    %276 = vector.extract_strided_slice %275 {offsets = [0, 0], sizes = [1, 128], strides = [1, 1]} : vector<1x384xf32> to vector<1x128xf32>
    %277 = vector.extract_strided_slice %275 {offsets = [0, 128], sizes = [1, 128], strides = [1, 1]} : vector<1x384xf32> to vector<1x128xf32>
    %278 = vector.extract_strided_slice %275 {offsets = [0, 256], sizes = [1, 128], strides = [1, 1]} : vector<1x384xf32> to vector<1x128xf32>
    %279 = vector.extract_strided_slice %269 {offsets = [0, 384], sizes = [1, 128], strides = [1, 1]} : vector<1x512xf32> to vector<1x128xf32>
    %280 = math.tanh %279 : vector<1x128xf32>
    %281 = arith.mulf %277, %240 : vector<1x128xf32>
    %282 = arith.mulf %276, %280 : vector<1x128xf32>
    %283 = arith.addf %281, %282 : vector<1x128xf32>
    %284 = math.tanh %283 : vector<1x128xf32>
    %285 = arith.mulf %278, %284 : vector<1x128xf32>
    %286 = arith.truncf %285 : vector<1x128xf32> to vector<1x128xbf16>
    %287 = arith.truncf %267 : vector<1x128xf32> to vector<1x128xbf16>
    %288 = tpu.concatenate %286, %287 in 1 : vector<1x128xbf16>, vector<1x128xbf16> -> vector<1x256xbf16>
    %c0_60 = arith.constant 0 : index
    %c0_61 = arith.constant 0 : index
    %289 = vector.load %arg3[%c0_60, %c0_61] : memref<256x1024xbf16, #tpu.memory_space<vmem>>, vector<256x1024xbf16>
    %cst_62 = arith.constant dense<0.000000e+00> : vector<1x1024xf32>
    %290 = tpu.matmul %288, %289, %cst_62 {dimension_numbers = #tpu.dot_dimension_numbers<[1], [0], [0], [1], [0, 0, 1, 1], [], []>} : vector<1x256xbf16>, vector<256x1024xbf16>, vector<1x1024xf32> -> vector<1x1024xf32>
    %291 = vector.extract_strided_slice %290 {offsets = [0, 0], sizes = [1, 512], strides = [1, 1]} : vector<1x1024xf32> to vector<1x512xf32>
    %292 = vector.extract_strided_slice %290 {offsets = [0, 512], sizes = [1, 512], strides = [1, 1]} : vector<1x1024xf32> to vector<1x512xf32>
    %c0_63 = arith.constant 0 : index
    %c0_64 = arith.constant 0 : index
    %293 = vector.load %arg4[%c0_63, %c0_64] : memref<1x512xf32, #tpu.memory_space<vmem>>, vector<1x512xf32>
    %294 = arith.addf %292, %293 : vector<1x512xf32>
    %295 = vector.extract_strided_slice %294 {offsets = [0, 0], sizes = [1, 384], strides = [1, 1]} : vector<1x512xf32> to vector<1x384xf32>
    %296 = arith.negf %295 : vector<1x384xf32>
    %297 = math.exp %296 : vector<1x384xf32>
    %cst_65 = arith.constant 1.000000e+00 : f32
    %298 = vector.broadcast %cst_65 : f32 to vector<1x384xf32>
    %299 = arith.addf %298, %297 : vector<1x384xf32>
    %300 = arith.divf %298, %299 : vector<1x384xf32>
    %301 = vector.extract_strided_slice %300 {offsets = [0, 0], sizes = [1, 128], strides = [1, 1]} : vector<1x384xf32> to vector<1x128xf32>
    %302 = vector.extract_strided_slice %300 {offsets = [0, 128], sizes = [1, 128], strides = [1, 1]} : vector<1x384xf32> to vector<1x128xf32>
    %303 = vector.extract_strided_slice %300 {offsets = [0, 256], sizes = [1, 128], strides = [1, 1]} : vector<1x384xf32> to vector<1x128xf32>
    %304 = vector.extract_strided_slice %294 {offsets = [0, 384], sizes = [1, 128], strides = [1, 1]} : vector<1x512xf32> to vector<1x128xf32>
    %305 = math.tanh %304 : vector<1x128xf32>
    %306 = arith.mulf %302, %265 : vector<1x128xf32>
    %307 = arith.mulf %301, %305 : vector<1x128xf32>
    %308 = arith.addf %306, %307 : vector<1x128xf32>
    %309 = math.tanh %308 : vector<1x128xf32>
    %310 = arith.mulf %303, %309 : vector<1x128xf32>
    %c7 = arith.constant 7 : index
    %c0_66 = arith.constant 0 : index
    %311 = vector.load %arg8[%c7, %c0_66] : memref<8x512xf32, #tpu.memory_space<vmem>>, vector<1x512xf32>
    %312 = arith.addf %311, %291 : vector<1x512xf32>
    %313 = vector.extract_strided_slice %312 {offsets = [0, 0], sizes = [1, 384], strides = [1, 1]} : vector<1x512xf32> to vector<1x384xf32>
    %314 = arith.negf %313 : vector<1x384xf32>
    %315 = math.exp %314 : vector<1x384xf32>
    %cst_67 = arith.constant 1.000000e+00 : f32
    %316 = vector.broadcast %cst_67 : f32 to vector<1x384xf32>
    %317 = arith.addf %316, %315 : vector<1x384xf32>
    %318 = arith.divf %316, %317 : vector<1x384xf32>
    %319 = vector.extract_strided_slice %318 {offsets = [0, 0], sizes = [1, 128], strides = [1, 1]} : vector<1x384xf32> to vector<1x128xf32>
    %320 = vector.extract_strided_slice %318 {offsets = [0, 128], sizes = [1, 128], strides = [1, 1]} : vector<1x384xf32> to vector<1x128xf32>
    %321 = vector.extract_strided_slice %318 {offsets = [0, 256], sizes = [1, 128], strides = [1, 1]} : vector<1x384xf32> to vector<1x128xf32>
    %322 = vector.extract_strided_slice %312 {offsets = [0, 384], sizes = [1, 128], strides = [1, 1]} : vector<1x512xf32> to vector<1x128xf32>
    %323 = math.tanh %322 : vector<1x128xf32>
    %324 = arith.mulf %320, %283 : vector<1x128xf32>
    %325 = arith.mulf %319, %323 : vector<1x128xf32>
    %326 = arith.addf %324, %325 : vector<1x128xf32>
    %327 = math.tanh %326 : vector<1x128xf32>
    %328 = arith.mulf %321, %327 : vector<1x128xf32>
    %329 = arith.truncf %328 : vector<1x128xf32> to vector<1x128xbf16>
    %330 = arith.truncf %310 : vector<1x128xf32> to vector<1x128xbf16>
    %331 = tpu.concatenate %329, %330 in 1 : vector<1x128xbf16>, vector<1x128xbf16> -> vector<1x256xbf16>
    %c0_68 = arith.constant 0 : index
    %c0_69 = arith.constant 0 : index
    %332 = vector.load %arg3[%c0_68, %c0_69] : memref<256x1024xbf16, #tpu.memory_space<vmem>>, vector<256x1024xbf16>
    %cst_70 = arith.constant dense<0.000000e+00> : vector<1x1024xf32>
    %333 = tpu.matmul %331, %332, %cst_70 {dimension_numbers = #tpu.dot_dimension_numbers<[1], [0], [0], [1], [0, 0, 1, 1], [], []>} : vector<1x256xbf16>, vector<256x1024xbf16>, vector<1x1024xf32> -> vector<1x1024xf32>
    %334 = vector.extract_strided_slice %333 {offsets = [0, 512], sizes = [1, 512], strides = [1, 1]} : vector<1x1024xf32> to vector<1x512xf32>
    %c0_71 = arith.constant 0 : index
    %c0_72 = arith.constant 0 : index
    %335 = vector.load %arg4[%c0_71, %c0_72] : memref<1x512xf32, #tpu.memory_space<vmem>>, vector<1x512xf32>
    %336 = arith.addf %334, %335 : vector<1x512xf32>
    %337 = vector.extract_strided_slice %336 {offsets = [0, 0], sizes = [1, 384], strides = [1, 1]} : vector<1x512xf32> to vector<1x384xf32>
    %338 = arith.negf %337 : vector<1x384xf32>
    %339 = math.exp %338 : vector<1x384xf32>
    %cst_73 = arith.constant 1.000000e+00 : f32
    %340 = vector.broadcast %cst_73 : f32 to vector<1x384xf32>
    %341 = arith.addf %340, %339 : vector<1x384xf32>
    %342 = arith.divf %340, %341 : vector<1x384xf32>
    %343 = vector.extract_strided_slice %342 {offsets = [0, 0], sizes = [1, 128], strides = [1, 1]} : vector<1x384xf32> to vector<1x128xf32>
    %344 = vector.extract_strided_slice %342 {offsets = [0, 128], sizes = [1, 128], strides = [1, 1]} : vector<1x384xf32> to vector<1x128xf32>
    %345 = vector.extract_strided_slice %342 {offsets = [0, 256], sizes = [1, 128], strides = [1, 1]} : vector<1x384xf32> to vector<1x128xf32>
    %346 = vector.extract_strided_slice %336 {offsets = [0, 384], sizes = [1, 128], strides = [1, 1]} : vector<1x512xf32> to vector<1x128xf32>
    %347 = math.tanh %346 : vector<1x128xf32>
    %348 = arith.mulf %344, %308 : vector<1x128xf32>
    %349 = arith.mulf %343, %347 : vector<1x128xf32>
    %350 = arith.addf %348, %349 : vector<1x128xf32>
    %351 = math.tanh %350 : vector<1x128xf32>
    %352 = arith.mulf %345, %351 : vector<1x128xf32>
    %353 = arith.truncf %352 : vector<1x128xf32> to vector<1x128xbf16>
    %c0_74 = arith.constant 0 : index
    %c0_75 = arith.constant 0 : index
    %354 = vector.load %arg5[%c0_74, %c0_75] : memref<128x128xbf16, #tpu.memory_space<vmem>>, vector<128x128xbf16>
    %cst_76 = arith.constant dense<0.000000e+00> : vector<1x128xf32>
    %355 = tpu.matmul %353, %354, %cst_76 {dimension_numbers = #tpu.dot_dimension_numbers<[1], [0], [0], [1], [0, 0, 1, 1], [], []>} : vector<1x128xbf16>, vector<128x128xbf16>, vector<1x128xf32> -> vector<1x128xf32>
    %c0_77 = arith.constant 0 : index
    %c0_78 = arith.constant 0 : index
    %356 = vector.load %arg6[%c0_77, %c0_78] : memref<1x128xf32, #tpu.memory_space<vmem>>, vector<1x128xf32>
    %357 = arith.addf %355, %356 : vector<1x128xf32>
    %c0_79 = arith.constant 0 : index
    %c0_80 = arith.constant 0 : index
    %358 = vector.load %arg7[%c0_79, %c0_80] : memref<1x128xf32, #tpu.memory_space<vmem>>, vector<1x128xf32>
    tpu.vector_store %arg7[%c0_79, %c0_80], %357 {strides = array<i32>} : memref<1x128xf32, #tpu.memory_space<vmem>>, vector<1x128xf32>,
    return
  }
}

</mosaic_0001>

<bundles_post_ra>
// kernel: lstm_forward.1
= control target key start
LH: loop header
LB: loop body
LE: loop exit
PB: predicated region body
PF: predicated region fallthrough
CT: control target
= control target key end

     0   :  { %12 = vsyncpa [#allocation4], 0  ;;  %s6581_s0 = inlined_call_operand.vmem [shape: f32[8,128], index: 0, kind: input, shape index: {}]   ;;  %s6582_s1 = inlined_call_operand.hbm [shape: bf16[128,512], index: 1, kind: input, shape index: {}]   ;;  %s6583_s2 = inlined_call_operand.vmem [shape: f32[1,512], index: 2, kind: input, shape index: {}]   ;;  %s6584_s3 = inlined_call_operand.hbm [shape: bf16[256,1024], index: 3, kind: input, shape index: {}]   ;;  %s6585_s4 = inlined_call_operand.vmem [shape: f32[1,512], index: 4, kind: input, shape index: {}]   ;;  %s6586_s5 = inlined_call_operand.hbm [shape: bf16[128,128], index: 5, kind: input, shape index: {}]   ;;  %s6587_s6 = inlined_call_operand.vmem [shape: f32[1,128], index: 6, kind: input, shape index: {}]   ;;  %s6588_s7 = inlined_call_operand.vmem [shape: f32[1,128], index: 7, kind: output, shape index: {}]  }
   0x1   :  { %13 = vsyncpa [#allocation6], 0  ;;  %s35_s26 = sshll.u32 %s6584_s3, 4  ;;  %s4826_s27 = smov [#allocation5]   ;;  %s36_s26 = int_to_ptr.hbm [resolvable:$true] %s35_s26 }
   0x2   :  { %s37_s28 = sshll.u32 %s4826_s27, 4  ;;  %s20_s8 = sshll.u32 %s6582_s1, 4  ;;  %s38_s28 = int_to_ptr.vmem [resolvable:$true] %s37_s28  ;;  %s21_s8 = int_to_ptr.hbm [resolvable:$true] %s20_s8 }
   0x3   :  { %s4827_s9 = smov 512   ;;  %s4828_s10 = smov 32  }
   0x4   :  { %43 = dma.hbm_to_vmem [thread:$0]  %s36_s26, 16384, %s38_s28, [#allocation6], %s4827_s9, %s4827_s9, %s4828_s10  }
   0x5   :  { %s4829_s11 = smov [#allocation3]   ;;  %s4830_s13 = smov 256  }
   0x6   :  { %s22_s12 = sshll.u32 %s4829_s11, 4  ;;  %s4831_s14 = smov 16   ;;  %s23_s12 = int_to_ptr.vmem [resolvable:$true] %s22_s12 }
   0x7   :  { %28 = dma.hbm_to_vmem [thread:$0]  %s21_s8, 4096, %s23_s12, [#allocation4], %s4830_s13, %s4830_s13, %s4831_s14  }
   0x8   :  { %s50_s16 = sshll.u32 %s6586_s5, 4  ;;  %s4832_s17 = smov [#allocation7]   ;;  %s51_s16 = int_to_ptr.hbm [resolvable:$true] %s50_s16 }
   0x9   :  { %s52_s18 = sshll.u32 %s4832_s17, 4  ;;  %s4833_s19 = smov 64   ;;  %s53_s18 = int_to_ptr.vmem [resolvable:$true] %s52_s18 }
   0xa   :  { %s4834_s1 = smov 4  }
   0xb   :  { %58 = dma.hbm_to_vmem [thread:$0]  %s51_s16, 1024, %s53_s18, [#allocation6], %s4833_s19, %s4833_s19, %s4834_s1  }
   0xc   :  { %4822 = dma.done.wait [#allocation4], 4096  }
   0xd   :  { %4823 = vsyncadd [#allocation4], 4294963200 }
   0xe   :  { %4824 = dma.done.wait [#allocation6], 17408  }
   0xf   :  { %4825 = vsyncadd [#allocation6], 4294949888  ;;  %v3790_v0 = vld [vmem:[#allocation3 + $0xe0] sm:$0xf]  ;;  %v4410_v1 = vld [vmem:[#allocation3 + $0xec] sm:$0xf0] }
  0x10   :  { %v4408_v2 = vld [vmem:[#allocation3 + $0xe4] sm:$0xf]  ;;  %v3791_v3 = vor.u32 %v4410_v1, %v3790_v0  ;;  %v3792_v4 = vld [vmem:[#allocation3 + $0xf0] sm:$0xf0]  ;;  %v3798_v5 = vld [vmem:[#allocation3 + $0xe8] sm:$0xf] }
  0x11   :  { %v4411_v6 = vld [vmem:[#allocation3 + $0xf4] sm:$0xf0]  ;;  %v3795_v7 = vor.u32 %v4408_v2, %v3792_v4  ;;  %v4409_v9 = vld [vmem:[#allocation3 + $0xec] sm:$0xf]  ;;  %v3800_v10 = vld [vmem:[#allocation3 + $0xf8] sm:$0xf0] }
  0x12   :  { %v3799_v8 = vor.u32 %v4411_v6, %v3798_v5  ;;  %v3774_v11 = vld [vmem:[#allocation3 + $0xc0] sm:$0xf]  ;;  %278 = vmatpush.bf16.msra.mxu0 %v3791_v3  ;;  %v3803_v12 = vor.u32 %v4409_v9, %v3800_v10  ;;  %v4406_v13 = vld [vmem:[#allocation3 + $0xcc] sm:$0xf0]  ;;  %v4404_v14 = vld [vmem:[#allocation3 + $0xc4] sm:$0xf] }
  0x13   :  { %v3776_v15 = vld [vmem:[#allocation3 + $0xd0] sm:$0xf0]  ;;  %291 = vmatpush.bf16.msra.mxu1 %v3795_v7  ;;  %v3775_v16 = vor.u32 %v4406_v13, %v3774_v11  ;;  %v3782_v18 = vld [vmem:[#allocation3 + $0xc8] sm:$0xf]  ;;  %v4407_v19 = vld [vmem:[#allocation3 + $0xd4] sm:$0xf0] }
  0x14   :  { %304 = vmatpush.bf16.msra.mxu2 %v3799_v8  ;;  %v3779_v17 = vor.u32 %v4404_v14, %v3776_v15  ;;  %v4405_v20 = vld [vmem:[#allocation3 + $0xcc] sm:$0xf]  ;;  %317 = vmatpush.bf16.msra.mxu3 %v3803_v12  ;;  %v3783_v21 = vor.u32 %v4407_v19, %v3782_v18  ;;  %v3784_v22 = vld [vmem:[#allocation3 + $0xd8] sm:$0xf0]  ;;  %v3758_v23 = vld [vmem:[#allocation3 + $0xa0] sm:$0xf] }
  0x15   :  { %v4402_v24 = vld [vmem:[#allocation3 + $0xac] sm:$0xf0]  ;;  %v3787_v25 = vor.u32 %v4405_v20, %v3784_v22  ;;  %v4400_v26 = vld [vmem:[#allocation3 + $0xa4] sm:$0xf]  ;;  %v3760_v27 = vld [vmem:[#allocation3 + $0xb0] sm:$0xf0] }
  0x16   :  { %v3766_v28 = vld [vmem:[#allocation3 + $0xa8] sm:$0xf]  ;;  %279 = vmatpush.bf16.msra.mxu0 %v3775_v16  ;;  %v3759_v29 = vor.u32 %v4402_v24, %v3758_v23  ;;  %v4403_v30 = vld [vmem:[#allocation3 + $0xb4] sm:$0xf0]  ;;  %v4401_v31 = vld [vmem:[#allocation3 + $0xac] sm:$0xf]  ;;  %v3763_v33 = vor.u32 %v4400_v26, %v3760_v27 }
  0x17   :  { %v3768_v32 = vld [vmem:[#allocation3 + $0xb8] sm:$0xf0]  ;;  %292 = vmatpush.bf16.msra.mxu1 %v3779_v17  ;;  %v3767_v34 = vor.u32 %v4403_v30, %v3766_v28  ;;  %v3742_v35 = vld [vmem:[#allocation3 + $0x80] sm:$0xf]  ;;  %v4398_v36 = vld [vmem:[#allocation3 + $0x8c] sm:$0xf0] }
  0x18   :  { %305 = vmatpush.bf16.msra.mxu2 %v3783_v21  ;;  %v4396_v37 = vld [vmem:[#allocation3 + $0x84] sm:$0xf]  ;;  %318 = vmatpush.bf16.msra.mxu3 %v3787_v25  ;;  %v3771_v38 = vor.u32 %v4401_v31, %v3768_v32  ;;  %v3744_v39 = vld [vmem:[#allocation3 + $0x90] sm:$0xf0]  ;;  %v3750_v40 = vld [vmem:[#allocation3 + $0x88] sm:$0xf]  ;;  %v3743_v44 = vor.u32 %v4398_v36, %v3742_v35 }
  0x19   :  { %v4399_v41 = vld [vmem:[#allocation3 + $0x94] sm:$0xf0]  ;;  %v4397_v42 = vld [vmem:[#allocation3 + $0x8c] sm:$0xf]  ;;  %v3752_v43 = vld [vmem:[#allocation3 + $0x98] sm:$0xf0]  ;;  %v3747_v45 = vor.u32 %v4396_v37, %v3744_v39 }
  0x1a   :  { %280 = vmatpush.bf16.msra.mxu0 %v3759_v29  ;;  %v3751_v46 = vor.u32 %v4399_v41, %v3750_v40  ;;  %v3726_v47 = vld [vmem:[#allocation3 + $0x60] sm:$0xf]  ;;  %v4394_v48 = vld [vmem:[#allocation3 + $0x6c] sm:$0xf0]  ;;  %v4392_v49 = vld [vmem:[#allocation3 + $0x64] sm:$0xf]  ;;  %v3755_v50 = vor.u32 %v4397_v42, %v3752_v43 }
  0x1b   :  { %293 = vmatpush.bf16.msra.mxu1 %v3763_v33  ;;  %v3728_v51 = vld [vmem:[#allocation3 + $0x70] sm:$0xf0]  ;;  %v3734_v52 = vld [vmem:[#allocation3 + $0x68] sm:$0xf]  ;;  %v4395_v53 = vld [vmem:[#allocation3 + $0x74] sm:$0xf0]  ;;  %v3727_v56 = vor.u32 %v4394_v48, %v3726_v47 }
  0x1c   :  { %306 = vmatpush.bf16.msra.mxu2 %v3767_v34  ;;  %319 = vmatpush.bf16.msra.mxu3 %v3771_v38  ;;  %v4393_v54 = vld [vmem:[#allocation3 + $0x6c] sm:$0xf]  ;;  %v3736_v55 = vld [vmem:[#allocation3 + $0x78] sm:$0xf0]  ;;  %v3731_v57 = vor.u32 %v4392_v49, %v3728_v51  ;;  %v3735_v58 = vor.u32 %v4395_v53, %v3734_v52  ;;  %v3710_v59 = vld [vmem:[#allocation3 + $0x40] sm:$0xf] }
  0x1d   :  { %v4390_v60 = vld [vmem:[#allocation3 + $0x4c] sm:$0xf0]  ;;  %v4388_v61 = vld [vmem:[#allocation3 + $0x44] sm:$0xf]  ;;  %v3739_v62 = vor.u32 %v4393_v54, %v3736_v55  ;;  %v3712_v63 = vld [vmem:[#allocation3 + $0x50] sm:$0xf0] }
  0x1e   :  { %281 = vmatpush.bf16.msra.mxu0 %v3743_v44  ;;  %v3718_v0 = vld [vmem:[#allocation3 + $0x48] sm:$0xf]  ;;  %v4391_v1 = vld [vmem:[#allocation3 + $0x54] sm:$0xf0]  ;;  %v4389_v2 = vld [vmem:[#allocation3 + $0x4c] sm:$0xf]  ;;  %v3711_v4 = vor.u32 %v4390_v60, %v3710_v59  ;;  %v3715_v5 = vor.u32 %v4388_v61, %v3712_v63 }
  0x1f   :  { %294 = vmatpush.bf16.msra.mxu1 %v3747_v45  ;;  %v3720_v3 = vld [vmem:[#allocation3 + $0x58] sm:$0xf0]  ;;  %v3719_v6 = vor.u32 %v4391_v1, %v3718_v0  ;;  %v3694_v7 = vld [vmem:[#allocation3 + $0x20] sm:$0xf]  ;;  %v4386_v8 = vld [vmem:[#allocation3 + $0x2c] sm:$0xf0] }
  0x20   :  { %307 = vmatpush.bf16.msra.mxu2 %v3751_v46  ;;  %320 = vmatpush.bf16.msra.mxu3 %v3755_v50  ;;  %v4384_v9 = vld [vmem:[#allocation3 + $0x24] sm:$0xf]  ;;  %v3723_v10 = vor.u32 %v4389_v2, %v3720_v3  ;;  %v3696_v11 = vld [vmem:[#allocation3 + $0x30] sm:$0xf0]  ;;  %v3702_v12 = vld [vmem:[#allocation3 + $0x28] sm:$0xf]  ;;  %v3695_v16 = vor.u32 %v4386_v8, %v3694_v7 }
  0x21   :  { %v4387_v13 = vld [vmem:[#allocation3 + $0x34] sm:$0xf0]  ;;  %v4385_v14 = vld [vmem:[#allocation3 + $0x2c] sm:$0xf]  ;;  %v3704_v15 = vld [vmem:[#allocation3 + $0x38] sm:$0xf0]  ;;  %v3699_v18 = vor.u32 %v4384_v9, %v3696_v11 }
  0x22   :  { %282 = vmatpush.bf16.msra.mxu0 %v3727_v56  ;;  %v3678_v17 = vld [vmem:[#allocation3] sm:$0xf]  ;;  %v3703_v19 = vor.u32 %v4387_v13, %v3702_v12  ;;  %v4382_v20 = vld [vmem:[#allocation3 + $0xc] sm:$0xf0]  ;;  %v4380_v21 = vld [vmem:[#allocation3 + $0x4] sm:$0xf]  ;;  %v3707_v23 = vor.u32 %v4385_v14, %v3704_v15 }
  0x23   :  { %295 = vmatpush.bf16.msra.mxu1 %v3731_v57  ;;  %v3680_v22 = vld [vmem:[#allocation3 + $0x10] sm:$0xf0]  ;;  %v3686_v24 = vld [vmem:[#allocation3 + $0x8] sm:$0xf]  ;;  %v4383_v25 = vld [vmem:[#allocation3 + $0x14] sm:$0xf0]  ;;  %v3679_v30 = vor.u32 %v4382_v20, %v3678_v17 }
  0x24   :  { %308 = vmatpush.bf16.msra.mxu2 %v3735_v58  ;;  %321 = vmatpush.bf16.msra.mxu3 %v3739_v62  ;;  %v4381_v26 = vld [vmem:[#allocation3 + $0xc] sm:$0xf]  ;;  %v3688_v27 = vld [vmem:[#allocation3 + $0x18] sm:$0xf0]  ;;  %v4287_v28 = vld [vmem:[#allocation5 + $0x3c0] sm:$0xf]  ;;  %v3683_v32 = vor.u32 %v4380_v21, %v3680_v22  ;;  %v3687_v33 = vor.u32 %v4383_v25, %v3686_v24 }
  0x25   :  { %v4536_v29 = vld [vmem:[#allocation5 + $0x3dc] sm:$0xf0]  ;;  %v3691_v34 = vor.u32 %v4381_v26, %v3688_v27  ;;  %v4532_v39 = vld [vmem:[#allocation5 + $0x3c4] sm:$0xf]  ;;  %vm1432_vm4 = vcmask 1040384   ;;  %vm1434_vm5 = vcmask 1042434  }
  0x26   :  { %283 = vmatpush.bf16.msra.mxu0 %v3711_v4  ;;  %v74_v31 = vld [vmem:[%s6581_s0] sm:$0xff]  ;;  %v4888_v35 = vor.u32 %v4536_v29, %v4287_v28  ;;  %vm1436_vm6 = vcmask 1041408  }
  0x27   :  { %296 = vmatpush.bf16.msra.mxu1 %v3715_v5  ;;  %v75_v36 = vpack.c.bf16 %v74_v31, %v74_v31  ;;  %v4255_v37 = vld [vmem:[#allocation5 + $0x380] sm:$0xf]  ;;  %v4289_v41 = vld [vmem:[#allocation5 + $0x3e0] sm:$0xf0] }
  0x28   :  { %309 = vmatpush.bf16.msra.mxu2 %v3719_v6  ;;  %322 = vmatpush.bf16.msra.mxu3 %v3723_v10  ;;  %6833 = vst [vmem:[#allocation10_spill] sm:$0xff] %v4888_v35  ;;  %v4528_v38 = vld [vmem:[#allocation5 + $0x39c] sm:$0xf0]  ;;  %v4893_v42 = vor.u32 %v4532_v39, %v4289_v41  ;;  %v4468_v48 = vld [vmem:[#allocation5 + $0x1c4] sm:$0xf] }
  0x29   :  { %v4891_v40 = vor.u32 %v4528_v38, %v4255_v37  ;;  %v4031_v43 = vld [vmem:[#allocation5 + $0x1c0] sm:$0xf]  ;;  %v4033_v50 = vld [vmem:[#allocation5 + $0x1e0] sm:$0xf0] }
  0x2a   :  { %284 = vmatpush.bf16.msra.mxu0 %v3695_v16  ;;  %6835 = vst [vmem:[#allocation12_spill] sm:$0xff] %v4893_v42  ;;  %v4472_v44 = vld [vmem:[#allocation5 + $0x1dc] sm:$0xf0]  ;;  %v4524_v51 = vld [vmem:[#allocation5 + $0x384] sm:$0xf]  ;;  %v4902_v53 = vor.u32 %v4468_v48, %v4033_v50 }
  0x2b   :  { %297 = vmatpush.bf16.msra.mxu1 %v3699_v18  ;;  %6834 = vst [vmem:[#allocation11_spill] sm:$0xff] %v4891_v40  ;;  %v4897_v45 = vor.u32 %v4472_v44, %v4031_v43  ;;  %v4223_v46 = vld [vmem:[#allocation5 + $0x340] sm:$0xf]  ;;  %v4257_v52 = vld [vmem:[#allocation5 + $0x3a0] sm:$0xf0] }
  0x2c   :  { %310 = vmatpush.bf16.msra.mxu2 %v3703_v19  ;;  %323 = vmatpush.bf16.msra.mxu3 %v3707_v23  ;;  %v4520_v47 = vld [vmem:[#allocation5 + $0x35c] sm:$0xf0]  ;;  %6838 = vst [vmem:[#allocation15_spill] sm:$0xff] %v4902_v53  ;;  %v4904_v54 = vor.u32 %v4524_v51, %v4257_v52  ;;  %v4460_v60 = vld [vmem:[#allocation5 + $0x184] sm:$0xf] }
  0x2d   :  { %6836 = vst [vmem:[#allocation13_spill] sm:$0xff] %v4897_v45  ;;  %v4899_v49 = vor.u32 %v4520_v47, %v4223_v46  ;;  %v3999_v55 = vld [vmem:[#allocation5 + $0x180] sm:$0xf]  ;;  %v4001_v61 = vld [vmem:[#allocation5 + $0x1a0] sm:$0xf0] }
  0x2e   :  { %285 = vmatpush.bf16.msra.mxu0 %v3679_v30  ;;  %6839 = vst [vmem:[#allocation16_spill] sm:$0xff] %v4904_v54  ;;  %v4464_v56 = vld [vmem:[#allocation5 + $0x19c] sm:$0xf0]  ;;  %v4913_v63 = vor.u32 %v4460_v60, %v4001_v61  ;;  %v4516_v0 = vld [vmem:[#allocation5 + $0x344] sm:$0xf] }
  0x2f   :  { %298 = vmatpush.bf16.msra.mxu1 %v3683_v32  ;;  %6837 = vst [vmem:[#allocation14_spill] sm:$0xff] %v4899_v49  ;;  %v4191_v57 = vld [vmem:[#allocation5 + $0x300] sm:$0xf]  ;;  %v4909_v58 = vor.u32 %v4464_v56, %v3999_v55  ;;  %v4225_v1 = vld [vmem:[#allocation5 + $0x360] sm:$0xf0] }
  0x30   :  { %311 = vmatpush.bf16.msra.mxu2 %v3687_v33  ;;  %324 = vmatpush.bf16.msra.mxu3 %v3691_v34  ;;  %v4512_v59 = vld [vmem:[#allocation5 + $0x31c] sm:$0xf0]  ;;  %6842 = vst [vmem:[#allocation19_spill] sm:$0xff] %v4913_v63  ;;  %v4916_v2 = vor.u32 %v4516_v0, %v4225_v1  ;;  %v4452_v8 = vld [vmem:[#allocation5 + $0x144] sm:$0xf] }
  0x31   :  { %286 = vmatmul.bf16.vlgmr.msra.gmra.mxu0 %v75_v36  ;;  %6840 = vst [vmem:[#allocation17_spill] sm:$0xff] %v4909_v58  ;;  %v4911_v62 = vor.u32 %v4512_v59, %v4191_v57  ;;  %v3967_v3 = vld [vmem:[#allocation5 + $0x140] sm:$0xf]  ;;  %v3969_v9 = vld [vmem:[#allocation5 + $0x160] sm:$0xf0] }
  0x32   :  { %299 = vmatmul.bf16.vlgmr.msra.gmra.mxu1 %v75_v36  ;;  %1138 = vmatpush.bf16.msrb.mxu0 %v4897_v45  ;;  %6843 = vst [vmem:[#allocation20_spill] sm:$0xff] %v4916_v2  ;;  %v4456_v4 = vld [vmem:[#allocation5 + $0x15c] sm:$0xf0]  ;;  %v4925_v11 = vor.u32 %v4452_v8, %v3969_v9  ;;  %v4508_v12 = vld [vmem:[#allocation5 + $0x304] sm:$0xf] }
  0x33   :  { %1151 = vmatpush.bf16.msrb.mxu1 %v4888_v35  ;;  %312 = vmatmul.bf16.vlgmr.msra.gmra.mxu2 %v75_v36  ;;  %6841 = vst [vmem:[#allocation18_spill] sm:$0xff] %v4911_v62  ;;  %v4159_v5 = vld [vmem:[#allocation5 + $0x2c0] sm:$0xf]  ;;  %v4921_v6 = vor.u32 %v4456_v4, %v3967_v3  ;;  %v4193_v13 = vld [vmem:[#allocation5 + $0x320] sm:$0xf0] }
  0x34   :  { %325 = vmatmul.bf16.vlgmr.msra.gmra.mxu3 %v75_v36  ;;  %1164 = vmatpush.bf16.msrb.mxu2 %v4902_v53  ;;  %v4504_v7 = vld [vmem:[#allocation5 + $0x2dc] sm:$0xf0]  ;;  %6846 = vst [vmem:[#allocation23_spill] sm:$0xff] %v4925_v11  ;;  %v4928_v14 = vor.u32 %v4508_v12, %v4193_v13  ;;  %v4444_v20 = vld [vmem:[#allocation5 + $0x104] sm:$0xf] }
  0x35   :  { %1177 = vmatpush.bf16.msrb.mxu3 %v4893_v42  ;;  %6844 = vst [vmem:[#allocation21_spill] sm:$0xff] %v4921_v6  ;;  %v4923_v10 = vor.u32 %v4504_v7, %v4159_v5  ;;  %v3935_v15 = vld [vmem:[#allocation5 + $0x100] sm:$0xf]  ;;  %v3937_v21 = vld [vmem:[#allocation5 + $0x120] sm:$0xf0] }
  0x36   :  { %1139 = vmatpush.bf16.msrb.mxu0 %v4909_v58  ;;  %6847 = vst [vmem:[#allocation24_spill] sm:$0xff] %v4928_v14  ;;  %v4448_v16 = vld [vmem:[#allocation5 + $0x11c] sm:$0xf0]  ;;  %v4937_v23 = vor.u32 %v4444_v20, %v3937_v21  ;;  %v4500_v24 = vld [vmem:[#allocation5 + $0x2c4] sm:$0xf] }
  0x37   :  { %1152 = vmatpush.bf16.msrb.mxu1 %v4891_v40  ;;  %6845 = vst [vmem:[#allocation22_spill] sm:$0xff] %v4923_v10  ;;  %v4127_v17 = vld [vmem:[#allocation5 + $0x280] sm:$0xf]  ;;  %v4933_v18 = vor.u32 %v4448_v16, %v3935_v15  ;;  %v4161_v25 = vld [vmem:[#allocation5 + $0x2e0] sm:$0xf0] }
  0x38   :  { %1165 = vmatpush.bf16.msrb.mxu2 %v4913_v63  ;;  %v4496_v19 = vld [vmem:[#allocation5 + $0x29c] sm:$0xf0]  ;;  %6850 = vst [vmem:[#allocation27_spill] sm:$0xff] %v4937_v23  ;;  %v4940_v26 = vor.u32 %v4500_v24, %v4161_v25  ;;  %v4436_v32 = vld [vmem:[#allocation5 + $0xc4] sm:$0xf] }
  0x39   :  { %1178 = vmatpush.bf16.msrb.mxu3 %v4904_v54  ;;  %6848 = vst [vmem:[#allocation25_spill] sm:$0xff] %v4933_v18  ;;  %v4935_v22 = vor.u32 %v4496_v19, %v4127_v17  ;;  %v3903_v27 = vld [vmem:[#allocation5 + $0xc0] sm:$0xf]  ;;  %v3905_v33 = vld [vmem:[#allocation5 + $0xe0] sm:$0xf0] }
  0x3a   :  { %1140 = vmatpush.bf16.msrb.mxu0 %v4921_v6  ;;  %6851 = vst [vmem:[#allocation28_spill] sm:$0xff] %v4940_v26  ;;  %v4440_v28 = vld [vmem:[#allocation5 + $0xdc] sm:$0xf0]  ;;  %v4949_v36 = vor.u32 %v4436_v32, %v3905_v33  ;;  %v4492_v37 = vld [vmem:[#allocation5 + $0x284] sm:$0xf] }
  0x3b   :  { %1153 = vmatpush.bf16.msrb.mxu1 %v4899_v49  ;;  %6849 = vst [vmem:[#allocation26_spill] sm:$0xff] %v4935_v22  ;;  %v4095_v29 = vld [vmem:[#allocation5 + $0x240] sm:$0xf]  ;;  %v4945_v30 = vor.u32 %v4440_v28, %v3903_v27  ;;  %v4129_v38 = vld [vmem:[#allocation5 + $0x2a0] sm:$0xf0] }
  0x3c   :  { %1166 = vmatpush.bf16.msrb.mxu2 %v4925_v11  ;;  %v4488_v31 = vld [vmem:[#allocation5 + $0x25c] sm:$0xf0]  ;;  %6854 = vst [vmem:[#allocation31_spill] sm:$0xff] %v4949_v36  ;;  %v4957_v41 = vor.u32 %v4492_v37, %v4129_v38  ;;  %v4428_v50 = vld [vmem:[#allocation5 + $0x84] sm:$0xf] }
  0x3d   :  { %1179 = vmatpush.bf16.msrb.mxu3 %v4916_v2  ;;  %6852 = vst [vmem:[#allocation29_spill] sm:$0xff] %v4945_v30  ;;  %v4947_v34 = vor.u32 %v4488_v31, %v4095_v29  ;;  %v4954_v39 = vld [vmem:[%s6583_s2] sm:$0xf]  ;;  %v3873_v51 = vld [vmem:[#allocation5 + $0xa0] sm:$0xf0] }
  0x3e   :  { %1141 = vmatpush.bf16.msrb.mxu0 %v4933_v18  ;;  %6855 = vst [vmem:[#allocation32_spill] sm:$0xff] %v4957_v41  ;;  %v3871_v43 = vld [vmem:[#allocation5 + $0x80] sm:$0xf]  ;;  %v4966_v55 = vor.u32 %v4428_v50, %v3873_v51  ;;  %v4484_v56 = vld [vmem:[#allocation5 + $0x244] sm:$0xf]  ;;  %v110_v60 = vperm.slane %v4954_v39, 0 }
  0x3f   :  { %1154 = vmatpush.bf16.msrb.mxu1 %v4911_v62  ;;  %6853 = vst [vmem:[#allocation30_spill] sm:$0xff] %v4947_v34  ;;  %v4432_v44 = vld [vmem:[#allocation5 + $0x9c] sm:$0xf0]  ;;  %v4097_v57 = vld [vmem:[#allocation5 + $0x260] sm:$0xf0]  ;;  %v111_v61 = vperm.slane %v4954_v39, 1 }
  0x40   :  { %1167 = vmatpush.bf16.msrb.mxu2 %v4937_v23  ;;  %v4063_v46 = vld [vmem:[#allocation5 + $0x200] sm:$0xf]  ;;  %v4962_v47 = vor.u32 %v4432_v44, %v3871_v43  ;;  %6858 = vst [vmem:[#allocation35_spill] sm:$0xff] %v4966_v55  ;;  %v4295_v59 = vld [vmem:[#allocation5 + $0x3c8] sm:$0xf]  ;;  %v112_v0 = vperm.slane %v4954_v39, 2  ;;  %v4972_v1 = vor.u32 %v4484_v56, %v4097_v57 }
  0x41   :  { %1180 = vmatpush.bf16.msrb.mxu3 %v4928_v14  ;;  %v4480_v48 = vld [vmem:[#allocation5 + $0x21c] sm:$0xf0]  ;;  %v4537_v3 = vld [vmem:[#allocation5 + $0x3e4] sm:$0xf0]  ;;  %v4420_v8 = vld [vmem:[#allocation5 + $0x44] sm:$0xf] }
  0x42   :  { %1142 = vmatpush.bf16.msrb.mxu0 %v4945_v30  ;;  %6856 = vst [vmem:[#allocation33_spill] sm:$0xff] %v4962_v47  ;;  %v4964_v52 = vor.u32 %v4480_v48, %v4063_v46  ;;  %v4976_v4 = vor.u32 %v4537_v3, %v4295_v59  ;;  %v3839_v5 = vld [vmem:[#allocation5 + $0x40] sm:$0xf]  ;;  %v3841_v12 = vld [vmem:[#allocation5 + $0x60] sm:$0xf0] }
  0x43   :  { %1155 = vmatpush.bf16.msrb.mxu1 %v4923_v10  ;;  %6859 = vst [vmem:[#allocation36_spill] sm:$0xff] %v4972_v1  ;;  %v4424_v7 = vld [vmem:[#allocation5 + $0x5c] sm:$0xf0]  ;;  %v4476_v13 = vld [vmem:[#allocation5 + $0x204] sm:$0xf]  ;;  %v4982_v16 = vor.u32 %v4420_v8, %v3841_v12 }
  0x44   :  { %1168 = vmatpush.bf16.msrb.mxu2 %v4949_v36  ;;  %6857 = vst [vmem:[#allocation34_spill] sm:$0xff] %v4964_v52  ;;  %v4979_v9 = vor.u32 %v4424_v7, %v3839_v5  ;;  %v4065_v15 = vld [vmem:[#allocation5 + $0x220] sm:$0xf0]  ;;  %v4263_v19 = vld [vmem:[#allocation5 + $0x388] sm:$0xf] }
  0x45   :  { %1181 = vmatpush.bf16.msrb.mxu3 %v4940_v26  ;;  %6860 = vst [vmem:[#allocation37_spill] sm:$0xff] %v4976_v4  ;;  %v4984_v17 = vor.u32 %v4476_v13, %v4065_v15  ;;  %v4529_v20 = vld [vmem:[#allocation5 + $0x3a4] sm:$0xf0]  ;;  %v4533_v21 = vld [vmem:[#allocation5 + $0x3cc] sm:$0xf] }
  0x46   :  { %1143 = vmatpush.bf16.msrb.mxu0 %v4962_v47  ;;  %6861 = vst [vmem:[#allocation38_spill] sm:$0xff] %v4979_v9  ;;  %v4987_v24 = vor.u32 %v4529_v20, %v4263_v19  ;;  %v4297_v25 = vld [vmem:[#allocation5 + $0x3e8] sm:$0xf0]  ;;  %v3807_v27 = vld [vmem:[#allocation5] sm:$0xf] }
  0x47   :  { %1156 = vmatpush.bf16.msrb.mxu1 %v4935_v22  ;;  %6862 = vst [vmem:[#allocation39_spill] sm:$0xff] %v4982_v16  ;;  %v4416_v28 = vld [vmem:[#allocation5 + $0x1c] sm:$0xf0]  ;;  %v4990_v31 = vor.u32 %v4533_v21, %v4297_v25  ;;  %v4412_v33 = vld [vmem:[#allocation5 + $0x4] sm:$0xf] }
  0x48   :  { %1169 = vmatpush.bf16.msrb.mxu2 %v4966_v55  ;;  %6863 = vst [vmem:[#allocation40_spill] sm:$0xff] %v4984_v17  ;;  %v4992_v32 = vor.u32 %v4416_v28, %v3807_v27  ;;  %v3809_v37 = vld [vmem:[#allocation5 + $0x20] sm:$0xf0]  ;;  %v4039_v38 = vld [vmem:[#allocation5 + $0x1c8] sm:$0xf]  ;;  %v6589_v28 = vmov 0  }
  0x49   :  { %1182 = vmatpush.bf16.msrb.mxu3 %v4957_v41  ;;  %6864 = vst [vmem:[#allocation41_spill] sm:$0xff] %v4987_v24  ;;  %v4995_v46 = vor.u32 %v4412_v33, %v3809_v37  ;;  %v4473_v48 = vld [vmem:[#allocation5 + $0x1e4] sm:$0xf0]  ;;  %v4469_v3 = vld [vmem:[#allocation5 + $0x1cc] sm:$0xf] }
  0x4a   :  { %1144 = vmatpush.bf16.msrb.mxu0 %v4979_v9  ;;  %6865 = vst [vmem:[#allocation42_spill] sm:$0xff] %v4990_v31  ;;  %v4231_v50 = vld [vmem:[#allocation5 + $0x348] sm:$0xf]  ;;  %v4999_v57 = vor.u32 %v4473_v48, %v4039_v38  ;;  %v4041_v5 = vld [vmem:[#allocation5 + $0x1e8] sm:$0xf0] }
  0x4b   :  { %1157 = vmatpush.bf16.msrb.mxu1 %v4947_v34  ;;  %6866 = vst [vmem:[#allocation43_spill] sm:$0xff] %v4992_v32  ;;  %v4521_v51 = vld [vmem:[#allocation5 + $0x364] sm:$0xf0]  ;;  %v5004_v7 = vor.u32 %v4469_v3, %v4041_v5  ;;  %v4265_v8 = vld [vmem:[#allocation5 + $0x3a8] sm:$0xf0] }
  0x4c   :  { %1170 = vmatpush.bf16.msrb.mxu2 %v4982_v16  ;;  %6867 = vst [vmem:[#allocation44_spill] sm:$0xff] %v4995_v46  ;;  %v5001_v59 = vor.u32 %v4521_v51, %v4231_v50  ;;  %v4007_v12 = vld [vmem:[#allocation5 + $0x188] sm:$0xf]  ;;  %v4461_v25 = vld [vmem:[#allocation5 + $0x18c] sm:$0xf] }
  0x4d   :  { %1183 = vmatpush.bf16.msrb.mxu3 %v4972_v1  ;;  %6868 = vst [vmem:[#allocation45_spill] sm:$0xff] %v4999_v57  ;;  %v4465_v15 = vld [vmem:[#allocation5 + $0x1a4] sm:$0xf0]  ;;  %v4009_v27 = vld [vmem:[#allocation5 + $0x1a8] sm:$0xf0] }
  0x4e   :  { %6869 = vst [vmem:[#allocation46_spill] sm:$0xff] %v5001_v59  ;;  %1145 = vmatpush.bf16.msrb.mxu0 %v4992_v32  ;;  %v4199_v19 = vld [vmem:[#allocation5 + $0x308] sm:$0xf]  ;;  %v5012_v20 = vor.u32 %v4465_v15, %v4007_v12  ;;  %v5019_v33 = vor.u32 %v4461_v25, %v4009_v27  ;;  %v4517_v37 = vld [vmem:[#allocation5 + $0x34c] sm:$0xf] }
  0x4f   :  { %1158 = vmatpush.bf16.msrb.mxu1 %v4964_v52  ;;  %6870 = vst [vmem:[#allocation47_spill] sm:$0xff] %v5004_v7  ;;  %v4513_v21 = vld [vmem:[#allocation5 + $0x324] sm:$0xf0]  ;;  %v4233_v38 = vld [vmem:[#allocation5 + $0x368] sm:$0xf0] }
  0x50   :  { %1171 = vmatpush.bf16.msrb.mxu2 %v4995_v46  ;;  %6872 = vst [vmem:[#allocation49_spill] sm:$0xff] %v5012_v20  ;;  %v5021_v48 = vor.u32 %v4517_v37, %v4233_v38  ;;  %v4457_v50 = vld [vmem:[#allocation5 + $0x164] sm:$0xf0]  ;;  %v4453_v12 = vld [vmem:[#allocation5 + $0x14c] sm:$0xf] }
  0x51   :  { %1184 = vmatpush.bf16.msrb.mxu3 %v4984_v17  ;;  %6874 = vst [vmem:[#allocation51_spill] sm:$0xff] %v5019_v33  ;;  %v4167_v51 = vld [vmem:[#allocation5 + $0x2c8] sm:$0xf]  ;;  %v3977_v15 = vld [vmem:[#allocation5 + $0x168] sm:$0xf0] }
  0x52   :  { %1190 = vmatpush.bf16.msra.mxu0 %v4999_v57  ;;  %1159 = vmatmul.bf16.vlgmr.msrb.gmra.mxu1 %v6589_v28  ;;  %6875 = vst [vmem:[#allocation52_spill] sm:$0xff] %v5021_v48  ;;  %v5030_v27 = vor.u32 %v4453_v12, %v3977_v15  ;;  %v4201_v37 = vld [vmem:[#allocation5 + $0x328] sm:$0xf0]  ;;  %v3943_v38 = vld [vmem:[#allocation5 + $0x108] sm:$0xf] }
  0x53   :  { %1203 = vmatpush.bf16.msra.mxu1 %v4976_v4  ;;  %v4169_v12 = vld [vmem:[#allocation5 + $0x2e8] sm:$0xf0]  ;;  %v3911_v15 = vld [vmem:[#allocation5 + $0xc8] sm:$0xf]  ;;  %v4538_v57 = vld [vmem:[#allocation5 + $0x3ec] sm:$0xf0] }
  0x54   :  { %1216 = vmatpush.bf16.msra.mxu2 %v5004_v7  ;;  %1185 = vmatmul.bf16.vlgmr.msrb.gmra.mxu3 %v6589_v28  ;;  %6877 = vst [vmem:[#allocation54_spill] sm:$0xff] %v5030_v27  ;;  %v4449_v28 = vld [vmem:[#allocation5 + $0x124] sm:$0xf0]  ;;  %v4477_v32 = vld [vmem:[#allocation5 + $0x20c] sm:$0xf] }
  0x55   :  { %1229 = vmatpush.bf16.msra.mxu3 %v4990_v31  ;;  %v4271_v16 = vld [vmem:[#allocation5 + $0x390] sm:$0xf]  ;;  %v4305_v9 = vld [vmem:[#allocation5 + $0x3f0] sm:$0xf0] }
  0x56   :  { %1191 = vmatpush.bf16.msra.mxu0 %v5012_v20  ;;  %v4433_v20 = vld [vmem:[#allocation5 + $0xa4] sm:$0xf0] }
  0x57   :  { %1204 = vmatpush.bf16.msra.mxu1 %v4987_v24 }
  0x58   :  { %1217 = vmatpush.bf16.msra.mxu2 %v5019_v33  ;;  %v4137_v33 = vld [vmem:[#allocation5 + $0x2a8] sm:$0xf0] }
  0x5b   :  { %1205 = vmatpush.bf16.msra.mxu1 %v5001_v59 }
  0x5c   :  { %1218 = vmatpush.bf16.msra.mxu2 %v5030_v27 }
  0xae   :  { %v287_v29 = vpop.f32.mrf.mxu0 }
  0xaf   :  { %v288_v43 = vadd.f32 %v287_v29, %v110_v60  ;;  %v300_v44 = vpop.f32.mrf.mxu1  ;;  %v4525_v60 = vld [vmem:[#allocation5 + $0x38c] sm:$0xf]  ;;  %v5017_v29 = vor.u32 %v4513_v21, %v4199_v19 }
  0xb0   :  { %v301_v56 = vadd.f32 %v300_v44, %v111_v61  ;;  %v113_v61 = vperm.slane %v4954_v39, 3  ;;  %v5009_v13 = vor.u32 %v4525_v60, %v4265_v8  ;;  %v4509_v19 = vld [vmem:[#allocation5 + $0x30c] sm:$0xf] }
  0xb1   :  { %330 = vst [vmem:[#allocation2] sm:$0xff] %v288_v43  ;;  %v3975_v43 = vld [vmem:[#allocation5 + $0x148] sm:$0xf]  ;;  %1206 = vmatpush.bf16.msra.mxu1 %v5017_v29 }
  0xb2   :  { %331 = vst [vmem:[#allocation2 + $0x8] sm:$0xff] %v301_v56  ;;  %1230 = vmatpush.bf16.msra.mxu3 %v5009_v13  ;;  %v4505_v56 = vld [vmem:[#allocation5 + $0x2e4] sm:$0xf0]  ;;  %v5027_v8 = vor.u32 %v4457_v50, %v3975_v43  ;;  %v3945_v50 = vld [vmem:[#allocation5 + $0x128] sm:$0xf0] }
  0xb3   :  { %6871 = vst [vmem:[#allocation48_spill] sm:$0xff] %v5009_v13  ;;  %v5034_v39 = vor.u32 %v4505_v56, %v4167_v51  ;;  %v4135_v43 = vld [vmem:[#allocation5 + $0x288] sm:$0xf] }
  0xb4   :  { %6873 = vst [vmem:[#allocation50_spill] sm:$0xff] %v5017_v29  ;;  %1192 = vmatpush.bf16.msra.mxu0 %v5027_v8  ;;  %v4441_v51 = vld [vmem:[#allocation5 + $0xe4] sm:$0xf0] }
  0xb5   :  { %6876 = vst [vmem:[#allocation53_spill] sm:$0xff] %v5027_v8  ;;  %1207 = vmatpush.bf16.msra.mxu1 %v5034_v39  ;;  %v4493_v8 = vld [vmem:[#allocation5 + $0x28c] sm:$0xf] }
  0xb6   :  { %v313_v44 = vpop.f32.mrf.mxu2  ;;  %v289_v60 = vpop.f32.mrf.mxu0  ;;  %1231 = vmatpush.bf16.msra.mxu3 %v5021_v48  ;;  %6878 = vst [vmem:[#allocation55_spill] sm:$0xff] %v5034_v39 }
  0xb7   :  { %v314_v3 = vadd.f32 %v313_v44, %v112_v0  ;;  %v326_v5 = vpop.f32.mrf.mxu3  ;;  %v302_v25 = vpop.f32.mrf.mxu1  ;;  %v5036_v0 = vor.u32 %v4509_v19, %v4201_v37  ;;  %v4497_v44 = vld [vmem:[#allocation5 + $0x2a4] sm:$0xf0]  ;;  %v4501_v60 = vld [vmem:[#allocation5 + $0x2cc] sm:$0xf] }
  0xb8   :  { %v327_v21 = vadd.f32 %v326_v5, %v113_v61  ;;  %v4445_v61 = vld [vmem:[#allocation5 + $0x10c] sm:$0xf]  ;;  %v5039_v5 = vor.u32 %v4449_v28, %v3943_v38  ;;  %v5046_v56 = vor.u32 %v4497_v44, %v4135_v43  ;;  %v5048_v19 = vor.u32 %v4501_v60, %v4169_v12  ;;  %v4489_v38 = vld [vmem:[#allocation5 + $0x264] sm:$0xf0] }
  0xb9   :  { %332 = vst [vmem:[#allocation2 + $0x10] sm:$0xff] %v314_v3  ;;  %v5042_v3 = vor.u32 %v4445_v61, %v3945_v50  ;;  %v4437_v25 = vld [vmem:[#allocation5 + $0xcc] sm:$0xf]  ;;  %v5051_v61 = vor.u32 %v4441_v51, %v3911_v15  ;;  %v3879_v50 = vld [vmem:[#allocation5 + $0x88] sm:$0xf] }
  0xba   :  { %6879 = vst [vmem:[#allocation56_spill] sm:$0xff] %v5036_v0  ;;  %1232 = vmatpush.bf16.msra.mxu3 %v5036_v0  ;;  %v3913_v28 = vld [vmem:[#allocation5 + $0xe8] sm:$0xf0]  ;;  %1193 = vmatpush.bf16.msra.mxu0 %v5039_v5  ;;  %v4071_v44 = vld [vmem:[#allocation5 + $0x208] sm:$0xf] }
  0xbb   :  { %333 = vst [vmem:[#allocation2 + $0x18] sm:$0xff] %v327_v21  ;;  %v4103_v21 = vld [vmem:[#allocation5 + $0x248] sm:$0xf]  ;;  %1219 = vmatpush.bf16.msra.mxu2 %v5042_v3  ;;  %v5054_v43 = vor.u32 %v4437_v25, %v3913_v28  ;;  %v4429_v12 = vld [vmem:[#allocation5 + $0x8c] sm:$0xf]  ;;  %1208 = vmatpush.bf16.msra.mxu1 %v5046_v56  ;;  %v5066_v25 = vor.u32 %v4433_v20, %v3879_v50 }
  0xbc   :  { %6880 = vst [vmem:[#allocation57_spill] sm:$0xff] %v5039_v5  ;;  %v4481_v60 = vld [vmem:[#allocation5 + $0x224] sm:$0xf0]  ;;  %v3881_v15 = vld [vmem:[#allocation5 + $0xa8] sm:$0xf0] }
  0xbd   :  { %6881 = vst [vmem:[#allocation58_spill] sm:$0xff] %v5042_v3  ;;  %v4485_v5 = vld [vmem:[#allocation5 + $0x24c] sm:$0xf]  ;;  %v4303_v28 = vld [vmem:[#allocation5 + $0x3d0] sm:$0xf]  ;;  %v5069_v46 = vor.u32 %v4429_v12, %v3881_v15 }
  0xbe   :  { %6882 = vst [vmem:[#allocation59_spill] sm:$0xff] %v5046_v56  ;;  %v315_v37 = vpop.f32.mrf.mxu2  ;;  %1233 = vmatpush.bf16.msra.mxu3 %v5048_v19  ;;  %v4105_v3 = vld [vmem:[#allocation5 + $0x268] sm:$0xf0]  ;;  %1194 = vmatpush.bf16.msra.mxu0 %v5051_v61  ;;  %v5077_v50 = vor.u32 %v4538_v57, %v4303_v28  ;;  %v4530_v15 = vld [vmem:[#allocation5 + $0x3ac] sm:$0xf0] }
  0xbf   :  { %6883 = vst [vmem:[#allocation60_spill] sm:$0xff] %v5048_v19  ;;  %v328_v27 = vpop.f32.mrf.mxu3  ;;  %v5062_v37 = vor.u32 %v4493_v8, %v4137_v33  ;;  %1220 = vmatpush.bf16.msra.mxu2 %v5054_v43  ;;  %v5073_v33 = vor.u32 %v4481_v60, %v4071_v44  ;;  %v5075_v8 = vor.u32 %v4485_v5, %v4105_v3  ;;  %v3849_v20 = vld [vmem:[#allocation5 + $0x68] sm:$0xf0]  ;;  %v3815_v5 = vld [vmem:[#allocation5 + $0x8] sm:$0xf] }
  0xc0   :  { %6884 = vst [vmem:[#allocation61_spill] sm:$0xff] %v5051_v61  ;;  %v5060_v27 = vor.u32 %v4489_v38, %v4103_v21  ;;  %v3847_v21 = vld [vmem:[#allocation5 + $0x48] sm:$0xf]  ;;  %v4421_v61 = vld [vmem:[#allocation5 + $0x4c] sm:$0xf] }
  0xc1   :  { %6885 = vst [vmem:[#allocation62_spill] sm:$0xff] %v5054_v43  ;;  %v4425_v38 = vld [vmem:[#allocation5 + $0x64] sm:$0xf0]  ;;  %v4534_v43 = vld [vmem:[#allocation5 + $0x3d4] sm:$0xf]  ;;  %v5083_v44 = vor.u32 %v4421_v61, %v3849_v20 }
  0xc2   :  { %v5056_v7 = vld [vmem:[#allocation2] ss:$8 sm:$0xf]  ;;  %6886 = vst [vmem:[#allocation63_spill] sm:$0xff] %v5060_v27  ;;  %1209 = vmatpush.bf16.msra.mxu1 %v5060_v27  ;;  %1234 = vmatpush.bf16.msra.mxu3 %v5062_v37  ;;  %v5080_v12 = vor.u32 %v4425_v38, %v3847_v21  ;;  %v4413_v60 = vld [vmem:[#allocation5 + $0xc] sm:$0xf]  ;;  %v5090_v21 = vor.u32 %v4530_v15, %v4271_v16 }
  0xc3   :  { %6887 = vst [vmem:[#allocation64_spill] sm:$0xff] %v5062_v37  ;;  %v3804_v51 = vmul.f32 -1.442695, %v5056_v7  ;;  %1195 = vmatpush.bf16.msra.mxu0 %v5066_v25  ;;  %1221 = vmatpush.bf16.msra.mxu2 %v5069_v46  ;;  %v4417_v3 = vld [vmem:[#allocation5 + $0x24] sm:$0xf0]  ;;  %v5092_v38 = vor.u32 %v4534_v43, %v4305_v9 }
  0xc4   :  { %6888 = vst [vmem:[#allocation65_spill] sm:$0xff] %v5066_v25  ;;  %v3817_v28 = vld [vmem:[#allocation5 + $0x28] sm:$0xf0]  ;;  %v5095_v61 = vor.u32 %v4417_v3, %v3815_v5  ;;  %v4239_v9 = vld [vmem:[#allocation5 + $0x350] sm:$0xf] }
  0xc5   :  { %4558 = vpow2.f32 %v3804_v51  ;;  %6889 = vst [vmem:[#allocation66_spill] sm:$0xff] %v5069_v46  ;;  %v4073_v51 = vld [vmem:[#allocation5 + $0x228] sm:$0xf0]  ;;  %v5098_v20 = vor.u32 %v4413_v60, %v3817_v28  ;;  %v4522_v16 = vld [vmem:[#allocation5 + $0x36c] sm:$0xf0] }
  0xc6   :  { %6890 = vst [vmem:[#allocation67_spill] sm:$0xff] %v5073_v33  ;;  %1210 = vmatpush.bf16.msra.mxu1 %v5073_v33  ;;  %1235 = vmatpush.bf16.msra.mxu3 %v5075_v8  ;;  %v5087_v57 = vor.u32 %v4477_v32, %v4073_v51  ;;  %v6900_v32 = vmov 0   ;;  %v5105_v43 = vor.u32 %v4522_v16, %v4239_v9  ;;  %v4273_v51 = vld [vmem:[#allocation5 + $0x3b0] sm:$0xf0]  ;;  %v4207_v5 = vld [vmem:[#allocation5 + $0x310] sm:$0xf] }
  0xc7   :  { %6891 = vst [vmem:[#allocation68_spill] sm:$0xff] %v5075_v8  ;;  %1196 = vmatpush.bf16.msra.mxu0 %v5080_v12  ;;  %1222 = vmatpush.bf16.msra.mxu2 %v5083_v44  ;;  %v4514_v3 = vld [vmem:[#allocation5 + $0x32c] sm:$0xf0]  ;;  %v4518_v28 = vld [vmem:[#allocation5 + $0x354] sm:$0xf] }
  0xc8   :  { %6892 = vst [vmem:[#allocation69_spill] sm:$0xff] %v5077_v50  ;;  %v5112_v60 = vor.u32 %v4514_v3, %v4207_v5  ;;  %v4241_v9 = vld [vmem:[#allocation5 + $0x370] sm:$0xf0]  ;;  %v3951_v33 = vld [vmem:[#allocation5 + $0x110] sm:$0xf] }
  0xc9   :  { %6893 = vst [vmem:[#allocation70_spill] sm:$0xff] %v5080_v12  ;;  %1211 = vmatmul.bf16.vlgmr.msra.gmra.mxu1 %v6900_v32  ;;  %v4510_v5 = vld [vmem:[#allocation5 + $0x314] sm:$0xf] }
  0xca   :  { %6894 = vst [vmem:[#allocation71_spill] sm:$0xff] %v5083_v44  ;;  %1255 = vmatpush.bf16.msrb.mxu1 %v5077_v50  ;;  %1236 = vmatpush.bf16.msra.mxu3 %v5087_v57  ;;  %v356_v50 = vrot.slane %v5056_v7, 3  ;;  %v4209_v3 = vld [vmem:[#allocation5 + $0x330] sm:$0xf0]  ;;  %v4498_v7 = vld [vmem:[#allocation5 + $0x2ac] sm:$0xf0] }
  0xcb   :  { %6895 = vst [vmem:[#allocation72_spill] sm:$0xff] %v5087_v57  ;;  %v4559_v25 = vpop.eup %4558  ;;  %1197 = vmatpush.bf16.msra.mxu0 %v5095_v61  ;;  %1223 = vmatpush.bf16.msra.mxu2 %v5098_v20  ;;  %v5122_v12 = vor.u32 %v4510_v5, %v4209_v3  ;;  %v4017_v8 = vld [vmem:[#allocation5 + $0x1b0] sm:$0xf0] }
  0xcc   :  { %6896 = vst [vmem:[#allocation73_spill] sm:$0xff] %v5090_v21  ;;  %v339_v46 = vadd.f32 1.0, %v4559_v25  ;;  %v4526_v25 = vld [vmem:[#allocation5 + $0x394] sm:$0xf] }
  0xcd   :  { %6897 = vst [vmem:[#allocation74_spill] sm:$0xff] %v5092_v38  ;;  %1237 = vmatmul.bf16.vlgmr.msra.gmra.mxu3 %v6900_v32  ;;  %v5109_v15 = vor.u32 %v4526_v25, %v4273_v51  ;;  %v4446_v37 = vld [vmem:[#allocation5 + $0x114] sm:$0xf] }
  0xce   :  { %6898 = vst [vmem:[#allocation75_spill] sm:$0xff] %v5095_v61  ;;  %4560 = vrcp.f32 %v339_v46  ;;  %1256 = vmatpush.bf16.msrb.mxu1 %v5090_v21  ;;  %1281 = vmatpush.bf16.msrb.mxu3 %v5092_v38  ;;  %v5115_v38 = vor.u32 %v4518_v28, %v4241_v9  ;;  %v4506_v61 = vld [vmem:[#allocation5 + $0x2ec] sm:$0xf0]  ;;  %vm345_vm1 = vweird.f32 %v339_v46 }
  0xcf   :  { %6899 = vst [vmem:[#allocation76_spill] sm:$0xff] %v5098_v20  ;;  %v4175_v20 = vld [vmem:[#allocation5 + $0x2d0] sm:$0xf]  ;;  %4562 = vtanh.f32 %v356_v50 }
  0xd0   :  { %6901 = vst [vmem:[#allocation77_spill] sm:$0xff] %v5105_v43  ;;  %v5119_v51 = vor.u32 %v4506_v61, %v4175_v20  ;;  %v4143_v28 = vld [vmem:[#allocation5 + $0x290] sm:$0xf]  ;;  %v4502_v61 = vld [vmem:[#allocation5 + $0x2d4] sm:$0xf] }
  0xd1   :  { %6902 = vst [vmem:[#allocation78_spill] sm:$0xff] %v5109_v15  ;;  %v4177_v20 = vld [vmem:[#allocation5 + $0x2f0] sm:$0xf0]  ;;  %v4111_v50 = vld [vmem:[#allocation5 + $0x250] sm:$0xf] }
  0xd2   :  { %1257 = vmatpush.bf16.msrb.mxu1 %v5105_v43  ;;  %6903 = vst [vmem:[#allocation79_spill] sm:$0xff] %v5112_v60  ;;  %1282 = vmatpush.bf16.msrb.mxu3 %v5109_v15  ;;  %v351_v43 = vand.u32 2147483648, %v339_v46  ;;  %v349_v15 = vand.u32 2147483647, %v339_v46 }
  0xd3   :  { %6904 = vst [vmem:[#allocation80_spill] sm:$0xff] %v5115_v38 }
  0xd4   :  { %v4561_v21 = vpop.eup %4560  ;;  %6905 = vst [vmem:[#allocation81_spill] sm:$0xff] %v5119_v51  ;;  %vm350_vm3 = vcmp.eq.f32.partialorder %v349_v15, 8.507059e+37 }
  0xd5   :  { %v341_v16 = vmul.f32 %v4561_v21, %v339_v46  ;;  %vm346_vm0 = vweird.f32 %v4561_v21  ;;  %6906 = vst [vmem:[#allocation82_spill] sm:$0xff] %v5122_v12  ;;  %v4490_v46 = vld [vmem:[#allocation5 + $0x26c] sm:$0xf0] }
  0xd6   :  { %1258 = vmatpush.bf16.msrb.mxu1 %v5112_v60  ;;  %1283 = vmatpush.bf16.msrb.mxu3 %v5115_v38  ;;  %vm347_vm2 = vmor %vm345_vm1, %vm346_vm0  ;;  %v352_v60 = vor.u32 1.1754944e-38, %v351_v43 }
  0xd7   :  { %v342_v25 = vsub.f32 1.0, %v341_v16  ;;  %v5125_v16 = vor.u32 %v4498_v7, %v4143_v28  ;;  %v5132_v28 = vor.u32 %v4490_v46, %v4111_v50  ;;  %v4494_v7 = vld [vmem:[#allocation5 + $0x294] sm:$0xf]  ;;  %v4311_v50 = vld [vmem:[#allocation5 + $0x3d8] sm:$0xf] }
  0xd8   :  { %v4539_v46 = vld [vmem:[#allocation5 + $0x3f4] sm:$0xf0] }
  0xd9   :  { %v343_v44 = vmul.f32 %v4561_v21, %v342_v25  ;;  %6907 = vst [vmem:[#allocation83_spill] sm:$0xff] %v5125_v16  ;;  %v5128_v25 = vor.u32 %v4502_v61, %v4177_v20  ;;  %v4079_v61 = vld [vmem:[#allocation5 + $0x210] sm:$0xf] }
  0xda   :  { %1259 = vmatpush.bf16.msrb.mxu1 %v5119_v51  ;;  %1284 = vmatpush.bf16.msrb.mxu3 %v5122_v12  ;;  %6909 = vst [vmem:[#allocation85_spill] sm:$0xff] %v5132_v28  ;;  %v4145_v51 = vld [vmem:[#allocation5 + $0x2b0] sm:$0xf0] }
  0xdb   :  { %v344_v9 = vadd.f32 %v4561_v21, %v343_v44  ;;  %6908 = vst [vmem:[#allocation84_spill] sm:$0xff] %v5128_v25  ;;  %v4563_v44 = vpop.eup %4562  ;;  %v5134_v12 = vor.u32 %v4494_v7, %v4145_v51  ;;  %v5145_v51 = vor.u32 %v4539_v46, %v4311_v50  ;;  %v4531_v7 = vld [vmem:[#allocation5 + $0x3b4] sm:$0xf0] }
  0xdd   :  { %v348_v38 = vsel %vm347_vm2, %v4561_v21, %v344_v9  ;;  %6910 = vst [vmem:[#allocation86_spill] sm:$0xff] %v5134_v12  ;;  %v4482_v21 = vld [vmem:[#allocation5 + $0x22c] sm:$0xf0]  ;;  %v4113_v9 = vld [vmem:[#allocation5 + $0x270] sm:$0xf0] }
  0xde   :  { %v353_v5 = vsel %vm350_vm3, %v352_v60, %v348_v38  ;;  %1260 = vmatpush.bf16.msrb.mxu1 %v5125_v16  ;;  %1285 = vmatpush.bf16.msrb.mxu3 %v5128_v25  ;;  %v5139_v38 = vor.u32 %v4482_v21, %v4079_v61  ;;  %v4486_v60 = vld [vmem:[#allocation5 + $0x254] sm:$0xf]  ;;  %6914 = vst [vmem:[#allocation90_spill] sm:$0xff] %v5145_v51  ;;  %v4535_v21 = vld [vmem:[#allocation5 + $0x3dc] sm:$0xf] }
  0xdf   :  { %v360_v3 = vrot.slane %v353_v5, 1  ;;  %v363_v57 = vmul.f32 %v4563_v44, %v353_v5  ;;  %v5142_v20 = vor.u32 %v4486_v60, %v4113_v9  ;;  %v4279_v44 = vld [vmem:[#allocation5 + $0x398] sm:$0xf]  ;;  %v4313_v60 = vld [vmem:[#allocation5 + $0x3f8] sm:$0xf0]  ;;  %v366_v46 = vrot.slane %v353_v5, 2 }
  0xe0   :  { %6912 = vst [vmem:[#allocation88_spill] sm:$0xff] %v5139_v38  ;;  %v5152_v61 = vor.u32 %v4531_v7, %v4279_v44  ;;  %v4047_v9 = vld [vmem:[#allocation5 + $0x1d0] sm:$0xf]  ;;  %v5154_v50 = vor.u32 %v4535_v21, %v4313_v60  ;;  %v4247_v25 = vld [vmem:[#allocation5 + $0x358] sm:$0xf] }
  0xe1   :  { %v362_v43 = vmul.f32 0.0, %v360_v3  ;;  %6913 = vst [vmem:[#allocation89_spill] sm:$0xff] %v5142_v20  ;;  %v4478_v3 = vld [vmem:[#allocation5 + $0x214] sm:$0xf]  ;;  %v4015_v7 = vld [vmem:[#allocation5 + $0x190] sm:$0xf] }
  0xe2   :  { %1261 = vmatpush.bf16.msrb.mxu1 %v5132_v28  ;;  %1286 = vmatpush.bf16.msrb.mxu3 %v5134_v12  ;;  %6916 = vst [vmem:[#allocation92_spill] sm:$0xff] %v5152_v61  ;;  %v4474_v28 = vld [vmem:[#allocation5 + $0x1ec] sm:$0xf0]  ;;  %v4470_v12 = vld [vmem:[#allocation5 + $0x1d4] sm:$0xf] }
  0xe3   :  { %v5136_v15 = vadd.f32 %v363_v57, %v362_v43  ;;  %v4081_v57 = vld [vmem:[#allocation5 + $0x230] sm:$0xf0]  ;;  %6917 = vst [vmem:[#allocation93_spill] sm:$0xff] %v5154_v50  ;;  %v4527_v5 = vld [vmem:[#allocation5 + $0x39c] sm:$0xf] }
  0xe4   :  { %v5150_v43 = vor.u32 %v4478_v3, %v4081_v57  ;;  %v4523_v3 = vld [vmem:[#allocation5 + $0x374] sm:$0xf0]  ;;  %v5159_v57 = vor.u32 %v4474_v28, %v4047_v9  ;;  %v4281_v21 = vld [vmem:[#allocation5 + $0x3b8] sm:$0xf0] }
  0xe5   :  { %6911 = vst [vmem:[#allocation87_spill] sm:$0xff] %v5136_v15  ;;  %4564 = vtanh.f32 %v5136_v15  ;;  %v4462_v15 = vld [vmem:[#allocation5 + $0x194] sm:$0xf]  ;;  %v4215_v28 = vld [vmem:[#allocation5 + $0x318] sm:$0xf] }
  0xe6   :  { %1262 = vmatpush.bf16.msrb.mxu1 %v5139_v38  ;;  %1287 = vmatpush.bf16.msrb.mxu3 %v5142_v20  ;;  %6915 = vst [vmem:[#allocation91_spill] sm:$0xff] %v5150_v43  ;;  %v4049_v38 = vld [vmem:[#allocation5 + $0x1f0] sm:$0xf0]  ;;  %v4519_v9 = vld [vmem:[#allocation5 + $0x35c] sm:$0xf] }
  0xe7   :  { %6918 = vst [vmem:[#allocation94_spill] sm:$0xff] %v5159_v57  ;;  %v5161_v44 = vor.u32 %v4470_v12, %v4049_v38  ;;  %v4515_v12 = vld [vmem:[#allocation5 + $0x334] sm:$0xf0] }
  0xe9   :  { %1263 = vmatmul.bf16.vlgmr.msrb.gmra.mxu1 %v6900_v32  ;;  %6919 = vst [vmem:[#allocation95_spill] sm:$0xff] %v5161_v44 }
  0xea   :  { %1307 = vmatpush.bf16.msra.mxu1 %v5145_v51  ;;  %1288 = vmatpush.bf16.msrb.mxu3 %v5150_v43  ;;  %v4466_v51 = vld [vmem:[#allocation5 + $0x1ac] sm:$0xf0] }
  0xeb   :  { %v4565_v16 = vpop.eup %4564  ;;  %v5175_v38 = vor.u32 %v4466_v51, %v4015_v7  ;;  %v4511_v51 = vld [vmem:[#allocation5 + $0x31c] sm:$0xf] }
  0xec   :  { %v368_v20 = vmul.f32 %v4565_v16, %v366_v46  ;;  %v5166_v16 = vor.u32 %v4523_v3, %v4247_v25  ;;  %v5168_v46 = vor.u32 %v4527_v5, %v4281_v21  ;;  %v3983_v25 = vld [vmem:[#allocation5 + $0x150] sm:$0xf]  ;;  %v4249_v3 = vld [vmem:[#allocation5 + $0x378] sm:$0xf0]  ;;  %v4454_v21 = vld [vmem:[#allocation5 + $0x154] sm:$0xf] }
  0xed   :  { %1289 = vmatmul.bf16.vlgmr.msrb.gmra.mxu3 %v6900_v32  ;;  %6922 = vst [vmem:[#allocation98_spill] sm:$0xff] %v5175_v38  ;;  %v4458_v5 = vld [vmem:[#allocation5 + $0x16c] sm:$0xf0]  ;;  %v5183_v43 = vor.u32 %v4519_v9, %v4249_v3  ;;  %v4217_v7 = vld [vmem:[#allocation5 + $0x338] sm:$0xf0] }
  0xee   :  { %1308 = vmatpush.bf16.msra.mxu1 %v5152_v61  ;;  %1333 = vmatpush.bf16.msra.mxu3 %v5154_v50  ;;  %v5164_v60 = vpack.c.bf16 %v368_v20, %v368_v20  ;;  %6920 = vst [vmem:[#allocation96_spill] sm:$0xff] %v5166_v16  ;;  %v5177_v20 = vor.u32 %v4462_v15, %v4017_v8  ;;  %v3985_v61 = vld [vmem:[#allocation5 + $0x170] sm:$0xf0]  ;;  %v4151_v9 = vld [vmem:[#allocation5 + $0x298] sm:$0xf] }
  0xef   :  { %6921 = vst [vmem:[#allocation97_spill] sm:$0xff] %v5168_v46  ;;  %v5181_v50 = vor.u32 %v4515_v12, %v4215_v28  ;;  %v5187_v8 = vor.u32 %v4458_v5, %v3983_v25  ;;  %v5189_v15 = vor.u32 %v4454_v21, %v3985_v61  ;;  %v5195_v12 = vor.u32 %v4511_v51, %v4217_v7  ;;  %v4499_v3 = vld [vmem:[#allocation5 + $0x2b4] sm:$0xf0]  ;;  %v3919_v5 = vld [vmem:[#allocation5 + $0xd0] sm:$0xf] }
  0xf0   :  { %1146 = vmatmul.bf16.vlgmr.msrb.gmra.mxu0 %v5164_v60  ;;  %1172 = vmatmul.bf16.vlgmr.msrb.gmra.mxu2 %v5164_v60  ;;  %6923 = vst [vmem:[#allocation99_spill] sm:$0xff] %v5177_v20  ;;  %v4442_v21 = vld [vmem:[#allocation5 + $0xec] sm:$0xf0]  ;;  %v4119_v51 = vld [vmem:[#allocation5 + $0x258] sm:$0xf] }
  0xf1   :  { %1242 = vmatpush.bf16.msrb.mxu0 %v5159_v57  ;;  %1268 = vmatpush.bf16.msrb.mxu2 %v5161_v44  ;;  %6924 = vst [vmem:[#allocation100_spill] sm:$0xff] %v5181_v50  ;;  %v4183_v57 = vld [vmem:[#allocation5 + $0x2d8] sm:$0xf] }
  0xf2   :  { %1309 = vmatpush.bf16.msra.mxu1 %v5166_v16  ;;  %1334 = vmatpush.bf16.msra.mxu3 %v5168_v46  ;;  %6925 = vst [vmem:[#allocation101_spill] sm:$0xff] %v5183_v43  ;;  %v4507_v44 = vld [vmem:[#allocation5 + $0x2f4] sm:$0xf0]  ;;  %v4450_v16 = vld [vmem:[#allocation5 + $0x12c] sm:$0xf0] }
  0xf3   :  { %6926 = vst [vmem:[#allocation102_spill] sm:$0xff] %v5187_v8  ;;  %v3953_v46 = vld [vmem:[#allocation5 + $0x130] sm:$0xf0]  ;;  %v5193_v28 = vor.u32 %v4507_v44, %v4183_v57  ;;  %v5199_v61 = vor.u32 %v4450_v16, %v3951_v33  ;;  %v5205_v57 = vor.u32 %v4499_v3, %v4151_v9  ;;  %v4491_v7 = vld [vmem:[#allocation5 + $0x274] sm:$0xf0] }
  0xf4   :  { %6927 = vst [vmem:[#allocation103_spill] sm:$0xff] %v5189_v15  ;;  %v5201_v25 = vor.u32 %v4446_v37, %v3953_v46  ;;  %v5211_v37 = vor.u32 %v4442_v21, %v3919_v5  ;;  %v3887_v16 = vld [vmem:[#allocation5 + $0x90] sm:$0xf]  ;;  %v4087_v9 = vld [vmem:[#allocation5 + $0x218] sm:$0xf] }
  0xf5   :  { %1243 = vmatpush.bf16.msrb.mxu0 %v5175_v38  ;;  %1269 = vmatpush.bf16.msrb.mxu2 %v5177_v20  ;;  %6928 = vst [vmem:[#allocation104_spill] sm:$0xff] %v5193_v28  ;;  %v4503_v38 = vld [vmem:[#allocation5 + $0x2dc] sm:$0xf]  ;;  %v4434_v46 = vld [vmem:[#allocation5 + $0xac] sm:$0xf0] }
  0xf6   :  { %1310 = vmatpush.bf16.msra.mxu1 %v5181_v50  ;;  %1335 = vmatpush.bf16.msra.mxu3 %v5183_v43  ;;  %6929 = vst [vmem:[#allocation105_spill] sm:$0xff] %v5195_v12  ;;  %v4185_v20 = vld [vmem:[#allocation5 + $0x2f8] sm:$0xf0]  ;;  %v4438_v50 = vld [vmem:[#allocation5 + $0xd4] sm:$0xf]  ;;  %v5225_v5 = vor.u32 %v4434_v46, %v3887_v16 }
  0xf7   :  { %6930 = vst [vmem:[#allocation106_spill] sm:$0xff] %v5199_v61  ;;  %v3921_v43 = vld [vmem:[#allocation5 + $0xf0] sm:$0xf0]  ;;  %v5207_v44 = vor.u32 %v4503_v38, %v4185_v20  ;;  %v5217_v38 = vor.u32 %v4491_v7, %v4119_v51  ;;  %v4483_v3 = vld [vmem:[#allocation5 + $0x234] sm:$0xf0] }
  0xf8   :  { %6931 = vst [vmem:[#allocation107_spill] sm:$0xff] %v5201_v25  ;;  %v5213_v33 = vor.u32 %v4438_v50, %v3921_v43  ;;  %v4487_v43 = vld [vmem:[#allocation5 + $0x25c] sm:$0xf]  ;;  %v3855_v51 = vld [vmem:[#allocation5 + $0x50] sm:$0xf] }
  0xf9   :  { %1244 = vmatpush.bf16.msrb.mxu0 %v5187_v8  ;;  %1270 = vmatpush.bf16.msrb.mxu2 %v5189_v15  ;;  %6932 = vst [vmem:[#allocation108_spill] sm:$0xff] %v5205_v57  ;;  %v4495_v8 = vld [vmem:[#allocation5 + $0x29c] sm:$0xf]  ;;  %v4426_v7 = vld [vmem:[#allocation5 + $0x6c] sm:$0xf0] }
  0xfa   :  { %1311 = vmatpush.bf16.msra.mxu1 %v5193_v28  ;;  %1336 = vmatpush.bf16.msra.mxu3 %v5195_v12  ;;  %6933 = vst [vmem:[#allocation109_spill] sm:$0xff] %v5207_v44  ;;  %v4153_v15 = vld [vmem:[#allocation5 + $0x2b8] sm:$0xf0]  ;;  %v4430_v28 = vld [vmem:[#allocation5 + $0x94] sm:$0xf] }
  0xfb   :  { %6934 = vst [vmem:[#allocation110_spill] sm:$0xff] %v5211_v37  ;;  %v3889_v12 = vld [vmem:[#allocation5 + $0xb0] sm:$0xf0]  ;;  %v5219_v20 = vor.u32 %v4495_v8, %v4153_v15  ;;  %v4121_v50 = vld [vmem:[#allocation5 + $0x278] sm:$0xf0] }
  0xfc   :  { %6935 = vst [vmem:[#allocation111_spill] sm:$0xff] %v5213_v33  ;;  %v5227_v21 = vor.u32 %v4430_v28, %v3889_v12  ;;  %v4422_v8 = vld [vmem:[#allocation5 + $0x54] sm:$0xf]  ;;  %v5237_v28 = vor.u32 %v4426_v7, %v3855_v51  ;;  %v3823_v16 = vld [vmem:[#allocation5 + $0x10] sm:$0xf] }
  0xfd   :  { %1245 = vmatpush.bf16.msrb.mxu0 %v5199_v61  ;;  %1271 = vmatpush.bf16.msrb.mxu2 %v5201_v25  ;;  %6936 = vst [vmem:[#allocation112_spill] sm:$0xff] %v5217_v38  ;;  %v3857_v15 = vld [vmem:[#allocation5 + $0x70] sm:$0xf0]  ;;  %v4479_v25 = vld [vmem:[#allocation5 + $0x21c] sm:$0xf] }
  0xfe   :  { %1312 = vmatpush.bf16.msra.mxu1 %v5205_v57  ;;  %1337 = vmatpush.bf16.msra.mxu3 %v5207_v44  ;;  %6937 = vst [vmem:[#allocation113_spill] sm:$0xff] %v5219_v20  ;;  %v5231_v57 = vor.u32 %v4483_v3, %v4087_v9  ;;  %v5233_v44 = vor.u32 %v4487_v43, %v4121_v50  ;;  %v4418_v46 = vld [vmem:[#allocation5 + $0x2c] sm:$0xf0]  ;;  %v4055_v61 = vld [vmem:[#allocation5 + $0x1d8] sm:$0xf] }
  0xff   :  { %v5239_v12 = vor.u32 %v4422_v8, %v3857_v15  ;;  %v4475_v3 = vld [vmem:[#allocation5 + $0x1f4] sm:$0xf0]  ;;  %v4471_v43 = vld [vmem:[#allocation5 + $0x1dc] sm:$0xf]  ;;  %v5248_v51 = vor.u32 %v4418_v46, %v3823_v16 }
 0x100   :  { %1198 = vmatmul.bf16.vlgmr.msra.gmra.mxu0 %v5164_v60  ;;  %1224 = vmatmul.bf16.vlgmr.msra.gmra.mxu2 %v5164_v60  ;;  %6938 = vst [vmem:[#allocation114_spill] sm:$0xff] %v5231_v57  ;;  %v4057_v50 = vld [vmem:[#allocation5 + $0x1f8] sm:$0xf0]  ;;  %v5252_v8 = vor.u32 %v4475_v3, %v4055_v61  ;;  %v4459_v16 = vld [vmem:[#allocation5 + $0x174] sm:$0xf0] }
 0x101   :  { %1246 = vmatpush.bf16.msrb.mxu0 %v5211_v37  ;;  %1272 = vmatpush.bf16.msrb.mxu2 %v5213_v33  ;;  %6939 = vst [vmem:[#allocation115_spill] sm:$0xff] %v5233_v44  ;;  %v4089_v37 = vld [vmem:[#allocation5 + $0x238] sm:$0xf0]  ;;  %v4414_v33 = vld [vmem:[#allocation5 + $0x14] sm:$0xf]  ;;  %v5254_v15 = vor.u32 %v4471_v43, %v4057_v50 }
 0x102   :  { %1313 = vmatpush.bf16.msra.mxu1 %v5217_v38  ;;  %1338 = vmatpush.bf16.msra.mxu3 %v5219_v20  ;;  %v3825_v38 = vld [vmem:[#allocation5 + $0x30] sm:$0xf0]  ;;  %v5243_v9 = vor.u32 %v4479_v25, %v4089_v37  ;;  %v4467_v25 = vld [vmem:[#allocation5 + $0x1b4] sm:$0xf0]  ;;  %v4463_v37 = vld [vmem:[#allocation5 + $0x19c] sm:$0xf] }
 0x103   :  { %v5250_v7 = vor.u32 %v4414_v33, %v3825_v38  ;;  %v3991_v38 = vld [vmem:[#allocation5 + $0x158] sm:$0xf]  ;;  %v4455_v46 = vld [vmem:[#allocation5 + $0x15c] sm:$0xf] }
 0x104   :  { %6940 = vst [vmem:[#allocation116_spill] sm:$0xff] %v5243_v9  ;;  %v3993_v3 = vld [vmem:[#allocation5 + $0x178] sm:$0xf0]  ;;  %v3959_v43 = vld [vmem:[#allocation5 + $0x118] sm:$0xf] }
 0x105   :  { %1247 = vmatpush.bf16.msrb.mxu0 %v5225_v5  ;;  %1273 = vmatpush.bf16.msrb.mxu2 %v5227_v21  ;;  %v4451_v50 = vld [vmem:[#allocation5 + $0x134] sm:$0xf0] }
 0x106   :  { %1314 = vmatpush.bf16.msra.mxu1 %v5231_v57  ;;  %1339 = vmatpush.bf16.msra.mxu3 %v5233_v44  ;;  %v4023_v57 = vld [vmem:[#allocation5 + $0x198] sm:$0xf] }
 0x107   :  { %v5264_v61 = vor.u32 %v4467_v25, %v4023_v57  ;;  %v5277_v57 = vor.u32 %v4455_v46, %v3993_v3  ;;  %v4447_v25 = vld [vmem:[#allocation5 + $0x11c] sm:$0xf] }
 0x108   :  { %v4439_v46 = vld [vmem:[#allocation5 + $0xdc] sm:$0xf] }
 0x109   :  { %1248 = vmatpush.bf16.msrb.mxu0 %v5237_v28  ;;  %1274 = vmatpush.bf16.msrb.mxu2 %v5239_v12  ;;  %6941 = vst [vmem:[#allocation117_spill] sm:$0xff] %v5264_v61  ;;  %v3929_v3 = vld [vmem:[#allocation5 + $0xf8] sm:$0xf0] }
 0x10a   :  { %1488 = vmatpush.bf16.msrb.mxu1 %v4888_v35  ;;  %1340 = vmatpush.bf16.msra.mxu3 %v5243_v9  ;;  %v4025_v35 = vld [vmem:[#allocation5 + $0x1b8] sm:$0xf0] }
 0x10b   :  { %1315 = vmatmul.bf16.vlgmr.msra.gmra.mxu1 %v6900_v32  ;;  %v5266_v33 = vor.u32 %v4463_v37, %v4025_v35  ;;  %v5275_v35 = vor.u32 %v4459_v16, %v3991_v38  ;;  %v5283_v37 = vor.u32 %v4451_v50, %v3959_v43  ;;  %v3927_v38 = vld [vmem:[#allocation5 + $0xd8] sm:$0xf] }
 0x10c   :  { %v4443_v16 = vld [vmem:[#allocation5 + $0xf4] sm:$0xf0] }
 0x10d   :  { %1249 = vmatpush.bf16.msrb.mxu0 %v5248_v51  ;;  %1275 = vmatpush.bf16.msrb.mxu2 %v5250_v7  ;;  %6942 = vst [vmem:[#allocation118_spill] sm:$0xff] %v5283_v37  ;;  %v3895_v43 = vld [vmem:[#allocation5 + $0x98] sm:$0xf] }
 0x10e   :  { %1514 = vmatpush.bf16.msrb.mxu3 %v4893_v42  ;;  %1489 = vmatpush.bf16.msrb.mxu1 %v4891_v40  ;;  %v4435_v50 = vld [vmem:[#allocation5 + $0xb4] sm:$0xf0] }
 0x10f   :  { %1341 = vmatmul.bf16.vlgmr.msra.gmra.mxu3 %v6900_v32  ;;  %v3961_v32 = vld [vmem:[#allocation5 + $0x138] sm:$0xf0] }
 0x110   :  { %1250 = vmatmul.bf16.vlgmr.msrb.gmra.mxu0 %v5164_v60  ;;  %1276 = vmatmul.bf16.vlgmr.msrb.gmra.mxu2 %v5164_v60 }
 0x111   :  { %1294 = vmatpush.bf16.msra.mxu0 %v5252_v8  ;;  %1320 = vmatpush.bf16.msra.mxu2 %v5254_v15 }
 0x112   :  { %1490 = vmatpush.bf16.msrb.mxu1 %v4899_v49  ;;  %1515 = vmatpush.bf16.msrb.mxu3 %v4904_v54  ;;  %v5285_v49 = vor.u32 %v4447_v25, %v3961_v32  ;;  %v4431_v25 = vld [vmem:[#allocation5 + $0x9c] sm:$0xf]  ;;  %v1424_v54 = vld [vmem:[#allocation2 + $0x1] ss:$8 sm:$0xf] }
 0x113   :  { %v3897_v32 = vld [vmem:[#allocation5 + $0xb8] sm:$0xf0] }
 0x114   :  { %6943 = vst [vmem:[#allocation119_spill] sm:$0xff] %v5285_v49 }
 0x115   :  { %1295 = vmatpush.bf16.msra.mxu0 %v5264_v61  ;;  %1321 = vmatpush.bf16.msra.mxu2 %v5266_v33 }
 0x116   :  { %1491 = vmatpush.bf16.msrb.mxu1 %v4911_v62  ;;  %1516 = vmatpush.bf16.msrb.mxu3 %v4916_v2  ;;  %v5291_v62 = vor.u32 %v4443_v16, %v3927_v38  ;;  %v5293_v2 = vor.u32 %v4439_v46, %v3929_v3  ;;  %v3863_v38 = vld [vmem:[#allocation5 + $0x58] sm:$0xf]  ;;  %v4423_v46 = vld [vmem:[#allocation5 + $0x5c] sm:$0xf] }
 0x117   :  { %v4427_v16 = vld [vmem:[#allocation5 + $0x74] sm:$0xf0]  ;;  %v3865_v3 = vld [vmem:[#allocation5 + $0x78] sm:$0xf0] }
 0x118   :  { %6944 = vst [vmem:[#allocation120_spill] sm:$0xff] %v5291_v62 }
 0x119   :  { %1296 = vmatpush.bf16.msra.mxu0 %v5275_v35  ;;  %1322 = vmatpush.bf16.msra.mxu2 %v5277_v57  ;;  %6945 = vst [vmem:[#allocation121_spill] sm:$0xff] %v5293_v2 }
 0x11a   :  { %1492 = vmatpush.bf16.msrb.mxu1 %v4923_v10  ;;  %1517 = vmatpush.bf16.msrb.mxu3 %v4928_v14  ;;  %v5299_v10 = vor.u32 %v4435_v50, %v3895_v43  ;;  %v5301_v14 = vor.u32 %v4431_v25, %v3897_v32  ;;  %v3831_v43 = vld [vmem:[#allocation5 + $0x18] sm:$0xf]  ;;  %v4415_v25 = vld [vmem:[#allocation5 + $0x1c] sm:$0xf] }
 0x11b   :  { %v4419_v50 = vld [vmem:[#allocation5 + $0x34] sm:$0xf0]  ;;  %v3833_v32 = vld [vmem:[#allocation5 + $0x38] sm:$0xf0] }
 0x11c   :  { %6946 = vst [vmem:[#allocation122_spill] sm:$0xff] %v5299_v10 }
 0x11d   :  { %1297 = vmatpush.bf16.msra.mxu0 %v5283_v37  ;;  %1323 = vmatpush.bf16.msra.mxu2 %v5285_v49  ;;  %6947 = vst [vmem:[#allocation123_spill] sm:$0xff] %v5301_v14 }
 0x11e   :  { %1493 = vmatpush.bf16.msrb.mxu1 %v4935_v22  ;;  %1518 = vmatpush.bf16.msrb.mxu3 %v4940_v26  ;;  %v5307_v22 = vor.u32 %v4427_v16, %v3863_v38  ;;  %v5309_v26 = vor.u32 %v4423_v46, %v3865_v3  ;;  %v5318_v38 = vor.u32 %v4415_v25, %v3833_v32  ;;  %v5334_v16 = vpop.f32.mrf.mxu1  ;;  %v6952_v46 = vld [vmem:[#allocation64_spill] sm:$0xff]  ;;  %v6953_v3 = vld [vmem:[#allocation67_spill] sm:$0xff] }
 0x11f   :  { %v6956_v25 = vld [vmem:[#allocation68_spill] sm:$0xff]  ;;  %v6957_v32 = vld [vmem:[#allocation43_spill] sm:$0xff] }
 0x120   :  { %6948 = vst [vmem:[#allocation124_spill] sm:$0xff] %v5307_v22 }
 0x121   :  { %1298 = vmatpush.bf16.msra.mxu0 %v5291_v62  ;;  %1324 = vmatpush.bf16.msra.mxu2 %v5293_v2  ;;  %6949 = vst [vmem:[#allocation125_spill] sm:$0xff] %v5309_v26 }
 0x122   :  { %1494 = vmatpush.bf16.msrb.mxu1 %v4947_v34  ;;  %1519 = vmatpush.bf16.msrb.mxu3 %v4957_v41  ;;  %v5316_v34 = vor.u32 %v4419_v50, %v3831_v43  ;;  %6951 = vst [vmem:[#allocation127_spill] sm:$0xff] %v5318_v38  ;;  %v6954_v43 = vld [vmem:[#allocation38_spill] sm:$0xff]  ;;  %v6955_v50 = vld [vmem:[#allocation39_spill] sm:$0xff] }
 0x123   :  { %v6974_v41 = vld [vmem:[#allocation75_spill] sm:$0xff] }
 0x124   :  { %6950 = vst [vmem:[#allocation126_spill] sm:$0xff] %v5316_v34 }
 0x125   :  { %1299 = vmatpush.bf16.msra.mxu0 %v5299_v10  ;;  %1325 = vmatpush.bf16.msra.mxu2 %v5301_v14 }
 0x126   :  { %1495 = vmatpush.bf16.msrb.mxu1 %v4964_v52  ;;  %1520 = vmatpush.bf16.msrb.mxu3 %v4972_v1  ;;  %v6973_v52 = vld [vmem:[#allocation71_spill] sm:$0xff] }
 0x129   :  { %1300 = vmatpush.bf16.msra.mxu0 %v5307_v22  ;;  %1326 = vmatpush.bf16.msra.mxu2 %v5309_v26 }
 0x12a   :  { %1540 = vmatpush.bf16.msra.mxu1 %v4976_v4  ;;  %1521 = vmatpush.bf16.msrb.mxu3 %v4984_v17  ;;  %v6972_v17 = vld [vmem:[#allocation70_spill] sm:$0xff] }
 0x12d   :  { %1301 = vmatpush.bf16.msra.mxu0 %v5316_v34  ;;  %1327 = vmatpush.bf16.msra.mxu2 %v5318_v38 }
 0x12e   :  { %1541 = vmatpush.bf16.msra.mxu1 %v4987_v24  ;;  %1566 = vmatpush.bf16.msra.mxu3 %v4990_v31  ;;  %v6969_v24 = vld [vmem:[#allocation62_spill] sm:$0xff]  ;;  %v6970_v31 = vld [vmem:[#allocation65_spill] sm:$0xff] }
 0x130   :  { %1302 = vmatmul.bf16.vlgmr.msra.gmra.mxu0 %v5164_v60  ;;  %1328 = vmatmul.bf16.vlgmr.msra.gmra.mxu2 %v5164_v60  ;;  %v1162_v60 = vpop.f32.mrf.mxu1 }
 0x131   :  { %1475 = vmatpush.bf16.msrb.mxu0 %v4897_v45  ;;  %1501 = vmatpush.bf16.msrb.mxu2 %v4902_v53  ;;  %v6958_v60 = vld [vmem:[#allocation44_spill] sm:$0xff] }
 0x132   :  { %1542 = vmatpush.bf16.msra.mxu1 %v5001_v59  ;;  %1567 = vmatpush.bf16.msra.mxu3 %v5009_v13  ;;  %v6968_v13 = vld [vmem:[#allocation61_spill] sm:$0xff] }
 0x135   :  { %1476 = vmatpush.bf16.msrb.mxu0 %v4909_v58  ;;  %1502 = vmatpush.bf16.msrb.mxu2 %v4913_v63 }
 0x136   :  { %1543 = vmatpush.bf16.msra.mxu1 %v5017_v29  ;;  %1568 = vmatpush.bf16.msra.mxu3 %v5021_v48  ;;  %v6965_v29 = vld [vmem:[#allocation54_spill] sm:$0xff] }
 0x137   :  { %v6967_v48 = vld [vmem:[#allocation58_spill] sm:$0xff] }
 0x139   :  { %1477 = vmatpush.bf16.msrb.mxu0 %v4921_v6  ;;  %1503 = vmatpush.bf16.msrb.mxu2 %v4925_v11 }
 0x13a   :  { %1544 = vmatpush.bf16.msra.mxu1 %v5034_v39  ;;  %1569 = vmatpush.bf16.msra.mxu3 %v5036_v0  ;;  %v6962_v39 = vld [vmem:[#allocation49_spill] sm:$0xff] }
 0x13b   :  { %v6964_v0 = vld [vmem:[#allocation53_spill] sm:$0xff] }
 0x13d   :  { %1478 = vmatpush.bf16.msrb.mxu0 %v4933_v18  ;;  %1504 = vmatpush.bf16.msrb.mxu2 %v4937_v23 }
 0x13e   :  { %1545 = vmatpush.bf16.msra.mxu1 %v5046_v56  ;;  %1570 = vmatpush.bf16.msra.mxu3 %v5048_v19  ;;  %v6959_v56 = vld [vmem:[#allocation45_spill] sm:$0xff]  ;;  %v6961_v19 = vld [vmem:[#allocation72_spill] sm:$0xff] }
 0x141   :  { %1479 = vmatpush.bf16.msrb.mxu0 %v4945_v30  ;;  %1505 = vmatpush.bf16.msrb.mxu2 %v4949_v36 }
 0x142   :  { %1546 = vmatpush.bf16.msra.mxu1 %v5060_v27  ;;  %1571 = vmatpush.bf16.msra.mxu3 %v6952_v46  ;;  %v6960_v27 = vld [vmem:[#allocation47_spill] sm:$0xff] }
 0x143   :  { %v6963_v46 = vld [vmem:[#allocation51_spill] sm:$0xff] }
 0x145   :  { %1480 = vmatpush.bf16.msrb.mxu0 %v4962_v47  ;;  %1506 = vmatpush.bf16.msrb.mxu2 %v4966_v55 }
 0x146   :  { %1547 = vmatpush.bf16.msra.mxu1 %v6953_v3  ;;  %1572 = vmatpush.bf16.msra.mxu3 %v6956_v25  ;;  %v1186_v3 = vpop.f32.mrf.mxu3  ;;  %v6966_v25 = vld [vmem:[#allocation57_spill] sm:$0xff]  ;;  %v1212_v4 = vpop.f32.mrf.mxu1 }
 0x149   :  { %1481 = vmatpush.bf16.msrb.mxu0 %v6954_v43  ;;  %1507 = vmatpush.bf16.msrb.mxu2 %v6955_v50 }
 0x14a   :  { %1573 = vmatpush.bf16.msra.mxu3 %v6961_v19  ;;  %v6971_v19 = vld [vmem:[#allocation66_spill] sm:$0xff] }
 0x14d   :  { %1482 = vmatpush.bf16.msrb.mxu0 %v6957_v32  ;;  %1508 = vmatpush.bf16.msrb.mxu2 %v6958_v60 }
 0x14e   :  { %v1188_v59 = vpop.f32.mrf.mxu3 }
 0x151   :  { %1527 = vmatpush.bf16.msra.mxu0 %v6959_v56  ;;  %1553 = vmatpush.bf16.msra.mxu2 %v6960_v27 }
 0x155   :  { %1528 = vmatpush.bf16.msra.mxu0 %v6962_v39  ;;  %1554 = vmatpush.bf16.msra.mxu2 %v6963_v46 }
 0x156   :  { %v1238_v1 = vpop.f32.mrf.mxu3 }
 0x159   :  { %1529 = vmatpush.bf16.msra.mxu0 %v6964_v0  ;;  %1555 = vmatpush.bf16.msra.mxu2 %v6965_v29 }
 0x15d   :  { %1530 = vmatpush.bf16.msra.mxu0 %v6966_v25  ;;  %1556 = vmatpush.bf16.msra.mxu2 %v6967_v48  ;;  %v6975_v25 = vld [vmem:[#allocation76_spill] sm:$0xff]  ;;  %v1214_v48 = vpop.f32.mrf.mxu1 }
 0x15e   :  { %v1240_v59 = vpop.f32.mrf.mxu3 }
 0x161   :  { %1531 = vmatpush.bf16.msra.mxu0 %v6968_v13  ;;  %1557 = vmatpush.bf16.msra.mxu2 %v6969_v24 }
 0x165   :  { %1532 = vmatpush.bf16.msra.mxu0 %v6970_v31  ;;  %1558 = vmatpush.bf16.msra.mxu2 %v6971_v19 }
 0x166   :  { %v1264_v0 = vpop.f32.mrf.mxu1 }
 0x169   :  { %1533 = vmatpush.bf16.msra.mxu0 %v6972_v17  ;;  %1559 = vmatpush.bf16.msra.mxu2 %v6973_v52 }
 0x16d   :  { %1534 = vmatpush.bf16.msra.mxu0 %v6974_v41  ;;  %1560 = vmatpush.bf16.msra.mxu2 %v6975_v25  ;;  %v1147_v29 = vpop.f32.mrf.mxu0 }
 0x16e   :  { %v1266_v39 = vpop.f32.mrf.mxu1  ;;  %v1161_v48 = vadd.f32 %v5334_v16, %v1147_v29 }
 0x170   :  { %v1290_v46 = vpop.f32.mrf.mxu3 }
 0x173   :  { %v1173_v13 = vpop.f32.mrf.mxu2 }
 0x174   :  { %v1187_v27 = vadd.f32 %v1186_v3, %v1173_v13 }
 0x175   :  { %v1149_v24 = vpop.f32.mrf.mxu0 }
 0x176   :  { %v1429_v52 = vrot.slane %v1187_v27, 7 }
 0x178   :  { %v1292_v17 = vpop.f32.mrf.mxu3  ;;  %v1433_v24 = vsel %vm1432_vm4, %v1161_v48, %v1429_v52 }
 0x17b   :  { %v1175_v31 = vpop.f32.mrf.mxu2 }
 0x17d   :  { %v1199_v19 = vpop.f32.mrf.mxu0 }
 0x17e   :  { %v1213_v56 = vadd.f32 %v1212_v4, %v1199_v19 }
 0x180   :  { %v1430_v59 = vrot.slane %v1213_v56, 6 }
 0x183   :  { %v1225_v60 = vpop.f32.mrf.mxu2 }
 0x184   :  { %v1239_v32 = vadd.f32 %v1238_v1, %v1225_v60  ;;  %v5381_v1 = vld [vmem:[%s6585_s4] sm:$0xf] }
 0x185   :  { %v1201_v41 = vpop.f32.mrf.mxu0  ;;  %v5384_v29 = vperm.slane %v5381_v1, 0  ;;  %v5388_v3 = vperm.slane %v5381_v1, 1 }
 0x186   :  { %v1431_v25 = vrot.slane %v1239_v32, 5 }
 0x187   :  { %6976 = vst [vmem:[#allocation128_spill] sm:$0xff] %v5384_v29 }
 0x188   :  { %v1435_v31 = vsel %vm1434_vm5, %v1430_v59, %v1431_v25  ;;  %v1316_v39 = vpop.f32.mrf.mxu1  ;;  %6977 = vst [vmem:[#allocation129_spill] sm:$0xff] %v5388_v3 }
 0x189   :  { %v1437_v4 = vsel %vm1436_vm6, %v1433_v24, %v1435_v31 }
 0x18a   :  { %v1439_v17 = vadd.f32 %v1437_v4, %v1424_v54 }
 0x18b   :  { %v1227_v41 = vpop.f32.mrf.mxu2 }
 0x18c   :  { %v4320_v13 = vmul.f32 -1.442695, %v1439_v17 }
 0x18d   :  { %v1251_v56 = vpop.f32.mrf.mxu0 }
 0x18e   :  { %4566 = vpow2.f32 %v4320_v13  ;;  %v1265_v52 = vadd.f32 %v1264_v0, %v1251_v56 }
 0x190   :  { %v1356_v19 = vadd.f32 %v5384_v29, %v1265_v52  ;;  %v1318_v27 = vpop.f32.mrf.mxu1 }
 0x192   :  { %v4317_v16 = vmul.f32 -1.442695, %v1356_v19  ;;  %v1342_v25 = vpop.f32.mrf.mxu3  ;;  %v1460_v19 = vrot.slane %v1439_v17, 3 }
 0x193   :  { %v1277_v32 = vpop.f32.mrf.mxu2 }
 0x194   :  { %v4567_v60 = vpop.eup %4566  ;;  %4568 = vpow2.f32 %v4317_v16  ;;  %v1291_v54 = vadd.f32 %v1290_v46, %v1277_v32 }
 0x195   :  { %v1443_v48 = vadd.f32 1.0, %v4567_v60  ;;  %v1253_v59 = vpop.f32.mrf.mxu0 }
 0x196   :  { %v1357_v24 = vadd.f32 %v5388_v3, %v1291_v54 }
 0x197   :  { %4570 = vrcp.f32 %v1443_v48  ;;  %v1455_v46 = vand.u32 2147483648, %v1443_v48  ;;  %v1453_v54 = vand.u32 2147483647, %v1443_v48  ;;  %vm1449_vm8 = vweird.f32 %v1443_v48 }
 0x198   :  { %v4318_v31 = vmul.f32 -1.442695, %v1357_v24 }
 0x199   :  { %vm1454_vm10 = vcmp.eq.f32.partialorder %v1453_v54, 8.507059e+37 }
 0x19a   :  { %v4569_v4 = vpop.eup %4568  ;;  %4572 = vpow2.f32 %v4318_v31  ;;  %v1344_v0 = vpop.f32.mrf.mxu3  ;;  %v1456_v31 = vor.u32 1.1754944e-38, %v1455_v46 }
 0x19b   :  { %v5391_v41 = vadd.f32 1.0, %v4569_v4  ;;  %v1279_v13 = vpop.f32.mrf.mxu2 }
 0x19d   :  { %v4571_v56 = vpop.eup %4570  ;;  %4574 = vrcp.f32 %v5391_v41  ;;  %vm1377_vm12 = vweird.f32 %v5391_v41 }
 0x19e   :  { %v1445_v52 = vmul.f32 %v4571_v56, %v1443_v48  ;;  %vm1450_vm7 = vweird.f32 %v4571_v56  ;;  %4576 = vtanh.f32 %v1460_v19  ;;  %v6978_v19 = vld [vmem:[#allocation87_spill] sm:$0xff] }
 0x19f   :  { %vm1451_vm9 = vmor %vm1449_vm8, %vm1450_vm7 }
 0x1a0   :  { %v4573_v27 = vpop.eup %4572  ;;  %v1446_v16 = vsub.f32 1.0, %v1445_v52 }
 0x1a1   :  { %v5394_v32 = vadd.f32 1.0, %v4573_v27 }
 0x1a2   :  { %v1447_v60 = vmul.f32 %v4571_v56, %v1446_v16  ;;  %v5402_v16 = vperm.slane %v5381_v1, 2 }
 0x1a3   :  { %4578 = vrcp.f32 %v5394_v32  ;;  %v5397_v24 = vpop.eup %4574  ;;  %vm1392_vm14 = vweird.f32 %v5394_v32 }
 0x1a4   :  { %v1448_v59 = vadd.f32 %v4571_v56, %v1447_v60  ;;  %v4577_v0 = vpop.eup %4576  ;;  %v1373_v52 = vmul.f32 %v5397_v24, %v5391_v41  ;;  %vm1378_vm11 = vweird.f32 %v5397_v24 }
 0x1a5   :  { %vm5421_vm15 = vmor %vm1377_vm12, %vm1378_vm11 }
 0x1a6   :  { %v1452_v17 = vsel %vm1451_vm9, %v4571_v56, %v1448_v59  ;;  %v1374_v56 = vsub.f32 1.0, %v1373_v52 }
 0x1a7   :  { %v1457_v4 = vsel %vm1454_vm10, %v1456_v31, %v1452_v17  ;;  %v5411_v17 = vperm.slane %v5381_v1, 3 }
 0x1a8   :  { %v1464_v13 = vrot.slane %v1457_v4, 1  ;;  %v1467_v60 = vmul.f32 %v4577_v0, %v1457_v4  ;;  %v1375_v0 = vmul.f32 %v5397_v24, %v1374_v56 }
 0x1a9   :  { %v4579_v27 = vpop.eup %4578 }
 0x1aa   :  { %v1466_v3 = vmul.f32 %v1464_v13, %v6978_v19  ;;  %v1388_v48 = vmul.f32 %v4579_v27, %v5394_v32  ;;  %vm1393_vm13 = vweird.f32 %v4579_v27 }
 0x1ab   :  { %vm5429_vm0 = vmor %vm1392_vm14, %vm1393_vm13 }
 0x1ac   :  { %v5406_v46 = vadd.f32 %v1467_v60, %v1466_v3  ;;  %v1389_v54 = vsub.f32 1.0, %v1388_v48  ;;  %v1398_v60 = vand.u32 2147483648, %v5394_v32  ;;  %v1383_v48 = vand.u32 2147483648, %v5391_v41 }
 0x1ad   :  { %v1303_v29 = vpop.f32.mrf.mxu0 }
 0x1ae   :  { %v1317_v40 = vadd.f32 %v1316_v39, %v1303_v29  ;;  %4580 = vtanh.f32 %v5406_v46  ;;  %v1390_v50 = vmul.f32 %v4579_v27, %v1389_v54  ;;  %v1470_v39 = vrot.slane %v1457_v4, 2 }
 0x1af   :  { %v1396_v4 = vand.u32 2147483647, %v5394_v32  ;;  %v6983_v32 = vld [vmem:[#allocation94_spill] sm:$0xff] }
 0x1b0   :  { %v1358_v59 = vadd.f32 %v5402_v16, %v1317_v40  ;;  %v1376_v40 = vadd.f32 %v5397_v24, %v1375_v0  ;;  %v1391_v52 = vadd.f32 %v4579_v27, %v1390_v50 }
 0x1b1   :  { %vm1397_vm2 = vcmp.eq.f32.partialorder %v1396_v4, 8.507059e+37 }
 0x1b2   :  { %v4319_v31 = vmul.f32 -1.442695, %v1358_v59  ;;  %v1395_v0 = vsel %vm5429_vm0, %v4579_v27, %v1391_v52  ;;  %v6985_v27 = vld [vmem:[#allocation98_spill] sm:$0xff]  ;;  %v6986_v52 = vld [vmem:[#allocation99_spill] sm:$0xff] }
 0x1b3   :  { %v1329_v43 = vpop.f32.mrf.mxu2 }
 0x1b4   :  { %4582 = vpow2.f32 %v4319_v31  ;;  %v1343_v13 = vadd.f32 %v1342_v25, %v1329_v43  ;;  %v4581_v3 = vpop.eup %4580  ;;  %v1381_v25 = vand.u32 2147483647, %v5391_v41  ;;  %v1380_v31 = vsel %vm5421_vm15, %v5397_v24, %v1376_v40 }
 0x1b5   :  { %v1305_v19 = vpop.f32.mrf.mxu0  ;;  %v1472_v1 = vmul.f32 %v4581_v3, %v1470_v39  ;;  %v1384_v41 = vor.u32 1.1754944e-38, %v1383_v48  ;;  %v6984_v39 = vld [vmem:[#allocation95_spill] sm:$0xff] }
 0x1b6   :  { %v1359_v29 = vadd.f32 %v5411_v17, %v1343_v13  ;;  %v1399_v19 = vor.u32 1.1754944e-38, %v1398_v60  ;;  %vm1382_vm1 = vcmp.eq.f32.partialorder %v1381_v25, 8.507059e+37  ;;  %v6988_v25 = vld [vmem:[#allocation103_spill] sm:$0xff] }
 0x1b7   :  { %v5427_v54 = vpack.c.bf16 %v1472_v1, %v1472_v1  ;;  %v1385_v3 = vsel %vm1382_vm1, %v1384_v41, %v1380_v31 }
 0x1b8   :  { %4584 = vtanh.f32 %v1359_v29  ;;  %v1400_v24 = vsel %vm1397_vm2, %v1399_v19, %v1395_v0  ;;  %v6990_v19 = vld [vmem:[#allocation107_spill] sm:$0xff] }
 0x1b9   :  { %1483 = vmatmul.bf16.vlgmr.msrb.gmra.mxu0 %v5427_v54  ;;  %1509 = vmatmul.bf16.vlgmr.msrb.gmra.mxu2 %v5427_v54  ;;  %v1418_v1 = vmul.f32 0.0, %v1400_v24 }
 0x1ba   :  { %v4583_v56 = vpop.eup %4582  ;;  %1579 = vmatpush.bf16.msrb.mxu0 %v6983_v32  ;;  %1605 = vmatpush.bf16.msrb.mxu2 %v6984_v39 }
 0x1bb   :  { %v1371_v59 = vadd.f32 1.0, %v4583_v56  ;;  %v1331_v13 = vpop.f32.mrf.mxu2  ;;  %v6987_v56 = vld [vmem:[#allocation102_spill] sm:$0xff] }
 0x1bc   :  { %v6989_v13 = vld [vmem:[#allocation106_spill] sm:$0xff] }
 0x1bd   :  { %4586 = vrcp.f32 %v1371_v59  ;;  %v1413_v50 = vand.u32 2147483648, %v1371_v59  ;;  %v1411_v0 = vand.u32 2147483647, %v1371_v59  ;;  %vm1407_vm7 = vweird.f32 %v1371_v59 }
 0x1be   :  { %v4585_v29 = vpop.eup %4584  ;;  %1580 = vmatpush.bf16.msrb.mxu0 %v6985_v27  ;;  %1606 = vmatpush.bf16.msrb.mxu2 %v6986_v52 }
 0x1bf   :  { %v1419_v40 = vmul.f32 %v4585_v29, %v1385_v3  ;;  %v1414_v29 = vor.u32 1.1754944e-38, %v1413_v50  ;;  %vm1412_vm9 = vcmp.eq.f32.partialorder %v1411_v0, 8.507059e+37  ;;  %v6995_v50 = vld [vmem:[#allocation73_spill] sm:$0xff] }
 0x1c0   :  { %v6997_v0 = vld [vmem:[#allocation77_spill] sm:$0xff] }
 0x1c1   :  { %v5444_v48 = vadd.f32 %v1419_v40, %v1418_v1  ;;  %v6991_v1 = vld [vmem:[#allocation110_spill] sm:$0xff] }
 0x1c2   :  { %1581 = vmatpush.bf16.msrb.mxu0 %v6987_v56  ;;  %1607 = vmatpush.bf16.msrb.mxu2 %v6988_v25 }
 0x1c3   :  { %v4587_v60 = vpop.eup %4586  ;;  %4588 = vtanh.f32 %v5444_v48 }
 0x1c4   :  { %v1403_v43 = vmul.f32 %v4587_v60, %v1371_v59  ;;  %vm1408_vm3 = vweird.f32 %v4587_v60  ;;  %v6993_v59 = vld [vmem:[#allocation69_spill] sm:$0xff] }
 0x1c5   :  { %vm1409_vm8 = vmor %vm1407_vm7, %vm1408_vm3 }
 0x1c6   :  { %v1404_v4 = vsub.f32 1.0, %v1403_v43  ;;  %1582 = vmatpush.bf16.msrb.mxu0 %v6989_v13  ;;  %1608 = vmatpush.bf16.msrb.mxu2 %v6990_v19  ;;  %v6992_v43 = vld [vmem:[#allocation111_spill] sm:$0xff] }
 0x1c8   :  { %v1405_v31 = vmul.f32 %v4587_v60, %v1404_v4 }
 0x1c9   :  { %1535 = vmatmul.bf16.vlgmr.msra.gmra.mxu0 %v5427_v54  ;;  %1561 = vmatmul.bf16.vlgmr.msra.gmra.mxu2 %v5427_v54  ;;  %v4589_v24 = vpop.eup %4588 }
 0x1ca   :  { %v1406_v41 = vadd.f32 %v4587_v60, %v1405_v31  ;;  %1583 = vmatpush.bf16.msrb.mxu0 %v6991_v1  ;;  %1609 = vmatpush.bf16.msrb.mxu2 %v6992_v43  ;;  %v6996_v31 = vld [vmem:[#allocation78_spill] sm:$0xff] }
 0x1cc   :  { %v1410_v3 = vsel %vm1409_vm8, %v4587_v60, %v1406_v41  ;;  %v6994_v60 = vld [vmem:[#allocation74_spill] sm:$0xff]  ;;  %v6998_v41 = vld [vmem:[#allocation80_spill] sm:$0xff] }
 0x1cd   :  { %v1415_v40 = vsel %vm1412_vm9, %v1414_v29, %v1410_v3  ;;  %v6999_v29 = vld [vmem:[#allocation79_spill] sm:$0xff]  ;;  %v7000_v3 = vld [vmem:[#allocation82_spill] sm:$0xff] }
 0x1ce   :  { %v1422_v4 = vmul.f32 %v4589_v24, %v1415_v40  ;;  %1584 = vmatpush.bf16.msrb.mxu0 %v5225_v5  ;;  %1610 = vmatpush.bf16.msrb.mxu2 %v5227_v21  ;;  %v7001_v24 = vld [vmem:[#allocation81_spill] sm:$0xff]  ;;  %v7002_v40 = vld [vmem:[#allocation84_spill] sm:$0xff] }
 0x1d0   :  { %v5455_v13 = vpack.c.bf16 %v1422_v4, %v1422_v4  ;;  %v7003_v4 = vld [vmem:[#allocation83_spill] sm:$0xff] }
 0x1d2   :  { %1496 = vmatmul.bf16.vlgmr.msrb.gmra.mxu1 %v5455_v13  ;;  %1522 = vmatmul.bf16.vlgmr.msrb.gmra.mxu3 %v5455_v13 }
 0x1d3   :  { %1592 = vmatpush.bf16.msrb.mxu1 %v6993_v59  ;;  %1618 = vmatpush.bf16.msrb.mxu3 %v6994_v60 }
 0x1d4   :  { %1585 = vmatpush.bf16.msrb.mxu0 %v5237_v28  ;;  %1611 = vmatpush.bf16.msrb.mxu2 %v5239_v12 }
 0x1d7   :  { %1593 = vmatpush.bf16.msrb.mxu1 %v6995_v50  ;;  %1619 = vmatpush.bf16.msrb.mxu3 %v6996_v31 }
 0x1d8   :  { %1586 = vmatpush.bf16.msrb.mxu0 %v5248_v51  ;;  %1612 = vmatpush.bf16.msrb.mxu2 %v5250_v7 }
 0x1db   :  { %1594 = vmatpush.bf16.msrb.mxu1 %v6997_v0  ;;  %1620 = vmatpush.bf16.msrb.mxu3 %v6998_v41 }
 0x1dc   :  { %1631 = vmatpush.bf16.msra.mxu0 %v5252_v8  ;;  %1657 = vmatpush.bf16.msra.mxu2 %v5254_v15 }
 0x1dd   :  { %1587 = vmatmul.bf16.vlgmr.msrb.gmra.mxu0 %v5427_v54  ;;  %1613 = vmatmul.bf16.vlgmr.msrb.gmra.mxu2 %v5427_v54 }
 0x1df   :  { %1595 = vmatpush.bf16.msrb.mxu1 %v6999_v29  ;;  %1621 = vmatpush.bf16.msrb.mxu3 %v7000_v3  ;;  %v7005_v3 = vld [vmem:[#allocation85_spill] sm:$0xff] }
 0x1e0   :  { %1632 = vmatpush.bf16.msra.mxu0 %v5264_v61  ;;  %1658 = vmatpush.bf16.msra.mxu2 %v5266_v33  ;;  %v7004_v61 = vld [vmem:[#allocation86_spill] sm:$0xff]  ;;  %v7006_v29 = vld [vmem:[#allocation89_spill] sm:$0xff] }
 0x1e2   :  { %1548 = vmatmul.bf16.vlgmr.msra.gmra.mxu1 %v5455_v13  ;;  %1574 = vmatmul.bf16.vlgmr.msra.gmra.mxu3 %v5455_v13 }
 0x1e3   :  { %1596 = vmatpush.bf16.msrb.mxu1 %v7001_v24  ;;  %1622 = vmatpush.bf16.msrb.mxu3 %v7002_v40  ;;  %v7007_v40 = vld [vmem:[#allocation88_spill] sm:$0xff]  ;;  %v7008_v24 = vld [vmem:[#allocation91_spill] sm:$0xff] }
 0x1e4   :  { %1633 = vmatpush.bf16.msra.mxu0 %v5275_v35  ;;  %1659 = vmatpush.bf16.msra.mxu2 %v5277_v57 }
 0x1e7   :  { %1597 = vmatpush.bf16.msrb.mxu1 %v7003_v4  ;;  %1623 = vmatpush.bf16.msrb.mxu3 %v7004_v61  ;;  %v7009_v61 = vld [vmem:[#allocation90_spill] sm:$0xff]  ;;  %v7010_v4 = vld [vmem:[#allocation93_spill] sm:$0xff] }
 0x1e8   :  { %1634 = vmatpush.bf16.msra.mxu0 %v5283_v37  ;;  %1660 = vmatpush.bf16.msra.mxu2 %v5285_v49 }
 0x1eb   :  { %1598 = vmatpush.bf16.msrb.mxu1 %v7005_v3  ;;  %1624 = vmatpush.bf16.msrb.mxu3 %v7006_v29  ;;  %v7011_v29 = vld [vmem:[#allocation92_spill] sm:$0xff] }
 0x1ec   :  { %1635 = vmatpush.bf16.msra.mxu0 %v5291_v62  ;;  %1661 = vmatpush.bf16.msra.mxu2 %v5293_v2 }
 0x1ef   :  { %1599 = vmatpush.bf16.msrb.mxu1 %v7007_v40  ;;  %1625 = vmatpush.bf16.msrb.mxu3 %v7008_v24  ;;  %v7012_v40 = vld [vmem:[#allocation97_spill] sm:$0xff]  ;;  %v7013_v24 = vld [vmem:[#allocation96_spill] sm:$0xff] }
 0x1f0   :  { %1636 = vmatpush.bf16.msra.mxu0 %v5299_v10  ;;  %1662 = vmatpush.bf16.msra.mxu2 %v5301_v14 }
 0x1f2   :  { %1600 = vmatmul.bf16.vlgmr.msrb.gmra.mxu1 %v5455_v13  ;;  %1626 = vmatmul.bf16.vlgmr.msrb.gmra.mxu3 %v5455_v13 }
 0x1f3   :  { %1644 = vmatpush.bf16.msra.mxu1 %v7009_v61  ;;  %1670 = vmatpush.bf16.msra.mxu3 %v7010_v4  ;;  %v7014_v61 = vld [vmem:[#allocation101_spill] sm:$0xff] }
 0x1f4   :  { %1637 = vmatpush.bf16.msra.mxu0 %v5307_v22  ;;  %1663 = vmatpush.bf16.msra.mxu2 %v5309_v26  ;;  %v7015_v26 = vld [vmem:[#allocation100_spill] sm:$0xff] }
 0x1f7   :  { %1645 = vmatpush.bf16.msra.mxu1 %v7011_v29  ;;  %1671 = vmatpush.bf16.msra.mxu3 %v7012_v40  ;;  %v7016_v29 = vld [vmem:[#allocation105_spill] sm:$0xff] }
 0x1f8   :  { %1638 = vmatpush.bf16.msra.mxu0 %v5316_v34  ;;  %1664 = vmatpush.bf16.msra.mxu2 %v5318_v38  ;;  %v7017_v38 = vld [vmem:[#allocation104_spill] sm:$0xff] }
 0x1fb   :  { %1646 = vmatpush.bf16.msra.mxu1 %v7013_v24  ;;  %1672 = vmatpush.bf16.msra.mxu3 %v7014_v61  ;;  %v7018_v24 = vld [vmem:[#allocation109_spill] sm:$0xff]  ;;  %v7019_v61 = vld [vmem:[#allocation108_spill] sm:$0xff] }
 0x1fc   :  { %1799 = vmatpush.bf16.msrb.mxu0 %v4897_v45  ;;  %1825 = vmatpush.bf16.msrb.mxu2 %v4902_v53 }
 0x1fd   :  { %1639 = vmatmul.bf16.vlgmr.msra.gmra.mxu0 %v5427_v54  ;;  %1665 = vmatmul.bf16.vlgmr.msra.gmra.mxu2 %v5427_v54  ;;  %v7020_v54 = vld [vmem:[#allocation112_spill] sm:$0xff] }
 0x1ff   :  { %1647 = vmatpush.bf16.msra.mxu1 %v7015_v26  ;;  %1673 = vmatpush.bf16.msra.mxu3 %v7016_v29 }
 0x200   :  { %1800 = vmatpush.bf16.msrb.mxu0 %v4909_v58  ;;  %1826 = vmatpush.bf16.msrb.mxu2 %v4913_v63 }
 0x203   :  { %1648 = vmatpush.bf16.msra.mxu1 %v7017_v38  ;;  %1674 = vmatpush.bf16.msra.mxu3 %v7018_v24  ;;  %v7021_v24 = vld [vmem:[#allocation114_spill] sm:$0xff] }
 0x204   :  { %1801 = vmatpush.bf16.msrb.mxu0 %v4921_v6  ;;  %1827 = vmatpush.bf16.msrb.mxu2 %v4925_v11 }
 0x207   :  { %1649 = vmatpush.bf16.msra.mxu1 %v7019_v61  ;;  %1675 = vmatpush.bf16.msra.mxu3 %v5219_v20  ;;  %v7022_v20 = vld [vmem:[#allocation10_spill] sm:$0xff] }
 0x208   :  { %1802 = vmatpush.bf16.msrb.mxu0 %v4933_v18  ;;  %1828 = vmatpush.bf16.msrb.mxu2 %v4937_v23  ;;  %v7071_v18 = vld [vmem:[#allocation67_spill] sm:$0xff] }
 0x20b   :  { %1650 = vmatpush.bf16.msra.mxu1 %v7020_v54  ;;  %1676 = vmatpush.bf16.msra.mxu3 %v5233_v44  ;;  %v7023_v44 = vld [vmem:[#allocation38_spill] sm:$0xff]  ;;  %v7024_v54 = vld [vmem:[#allocation39_spill] sm:$0xff] }
 0x20c   :  { %1803 = vmatpush.bf16.msrb.mxu0 %v4945_v30  ;;  %1829 = vmatpush.bf16.msrb.mxu2 %v4949_v36  ;;  %v7025_v36 = vld [vmem:[#allocation11_spill] sm:$0xff] }
 0x20d   :  { %v7032_v30 = vld [vmem:[#allocation47_spill] sm:$0xff] }
 0x20f   :  { %1651 = vmatpush.bf16.msra.mxu1 %v7021_v24  ;;  %1677 = vmatpush.bf16.msra.mxu3 %v5243_v9  ;;  %v7026_v24 = vld [vmem:[#allocation16_spill] sm:$0xff]  ;;  %v7027_v9 = vld [vmem:[#allocation43_spill] sm:$0xff] }
 0x210   :  { %1804 = vmatpush.bf16.msrb.mxu0 %v4962_v47  ;;  %1830 = vmatpush.bf16.msrb.mxu2 %v4966_v55  ;;  %v7028_v47 = vld [vmem:[#allocation44_spill] sm:$0xff]  ;;  %v7029_v55 = vld [vmem:[#allocation14_spill] sm:$0xff] }
 0x212   :  { %1652 = vmatmul.bf16.vlgmr.msra.gmra.mxu1 %v5455_v13  ;;  %1678 = vmatmul.bf16.vlgmr.msra.gmra.mxu3 %v5455_v13  ;;  %v7033_v13 = vld [vmem:[#allocation18_spill] sm:$0xff] }
 0x213   :  { %1812 = vmatpush.bf16.msrb.mxu1 %v7022_v20  ;;  %1838 = vmatpush.bf16.msrb.mxu3 %v4893_v42  ;;  %v7030_v20 = vld [vmem:[#allocation20_spill] sm:$0xff]  ;;  %v7031_v42 = vld [vmem:[#allocation45_spill] sm:$0xff] }
 0x214   :  { %1805 = vmatpush.bf16.msrb.mxu0 %v7023_v44  ;;  %1831 = vmatpush.bf16.msrb.mxu2 %v7024_v54  ;;  %v7034_v44 = vld [vmem:[#allocation24_spill] sm:$0xff]  ;;  %v7035_v54 = vld [vmem:[#allocation49_spill] sm:$0xff] }
 0x217   :  { %1813 = vmatpush.bf16.msrb.mxu1 %v7025_v36  ;;  %1839 = vmatpush.bf16.msrb.mxu3 %v7026_v24  ;;  %v7036_v36 = vld [vmem:[#allocation51_spill] sm:$0xff]  ;;  %v7037_v24 = vld [vmem:[#allocation22_spill] sm:$0xff] }
 0x218   :  { %1806 = vmatpush.bf16.msrb.mxu0 %v7027_v9  ;;  %1832 = vmatpush.bf16.msrb.mxu2 %v7028_v47  ;;  %v7038_v9 = vld [vmem:[#allocation28_spill] sm:$0xff]  ;;  %v7039_v47 = vld [vmem:[#allocation53_spill] sm:$0xff] }
 0x21b   :  { %1814 = vmatpush.bf16.msrb.mxu1 %v7029_v55  ;;  %1840 = vmatpush.bf16.msrb.mxu3 %v7030_v20  ;;  %v7040_v55 = vld [vmem:[#allocation54_spill] sm:$0xff] }
 0x21c   :  { %1851 = vmatpush.bf16.msra.mxu0 %v7031_v42  ;;  %1877 = vmatpush.bf16.msra.mxu2 %v7032_v30  ;;  %v7041_v20 = vld [vmem:[#allocation26_spill] sm:$0xff]  ;;  %v7042_v42 = vld [vmem:[#allocation32_spill] sm:$0xff]  ;;  %v7043_v30 = vld [vmem:[#allocation57_spill] sm:$0xff] }
 0x21f   :  { %1815 = vmatpush.bf16.msrb.mxu1 %v7033_v13  ;;  %1841 = vmatpush.bf16.msrb.mxu3 %v7034_v44  ;;  %v7044_v13 = vld [vmem:[#allocation58_spill] sm:$0xff] }
 0x220   :  { %1852 = vmatpush.bf16.msra.mxu0 %v7035_v54  ;;  %1878 = vmatpush.bf16.msra.mxu2 %v7036_v36  ;;  %v7045_v44 = vld [vmem:[#allocation30_spill] sm:$0xff]  ;;  %v7046_v54 = vld [vmem:[#allocation36_spill] sm:$0xff]  ;;  %v7047_v36 = vld [vmem:[#allocation61_spill] sm:$0xff] }
 0x223   :  { %1816 = vmatpush.bf16.msrb.mxu1 %v7037_v24  ;;  %1842 = vmatpush.bf16.msrb.mxu3 %v7038_v9  ;;  %v7048_v24 = vld [vmem:[#allocation62_spill] sm:$0xff] }
 0x224   :  { %1853 = vmatpush.bf16.msra.mxu0 %v7039_v47  ;;  %1879 = vmatpush.bf16.msra.mxu2 %v7040_v55  ;;  %v7049_v9 = vld [vmem:[#allocation34_spill] sm:$0xff]  ;;  %v7050_v47 = vld [vmem:[#allocation40_spill] sm:$0xff]  ;;  %v7051_v55 = vld [vmem:[#allocation65_spill] sm:$0xff] }
 0x227   :  { %1817 = vmatpush.bf16.msrb.mxu1 %v7041_v20  ;;  %1843 = vmatpush.bf16.msrb.mxu3 %v7042_v42  ;;  %v7052_v20 = vld [vmem:[#allocation66_spill] sm:$0xff]  ;;  %v7053_v42 = vld [vmem:[#allocation37_spill] sm:$0xff] }
 0x228   :  { %1854 = vmatpush.bf16.msra.mxu0 %v7043_v30  ;;  %1880 = vmatpush.bf16.msra.mxu2 %v7044_v13  ;;  %v7054_v30 = vld [vmem:[#allocation42_spill] sm:$0xff] }
 0x229   :  { %v7055_v13 = vld [vmem:[#allocation70_spill] sm:$0xff] }
 0x22b   :  { %1818 = vmatpush.bf16.msrb.mxu1 %v7045_v44  ;;  %1844 = vmatpush.bf16.msrb.mxu3 %v7046_v54  ;;  %v7056_v44 = vld [vmem:[#allocation71_spill] sm:$0xff]  ;;  %v7057_v54 = vld [vmem:[#allocation41_spill] sm:$0xff] }
 0x22c   :  { %1855 = vmatpush.bf16.msra.mxu0 %v7047_v36  ;;  %1881 = vmatpush.bf16.msra.mxu2 %v7048_v24  ;;  %v7058_v36 = vld [vmem:[#allocation48_spill] sm:$0xff]  ;;  %v7059_v24 = vld [vmem:[#allocation75_spill] sm:$0xff] }
 0x22f   :  { %1819 = vmatpush.bf16.msrb.mxu1 %v7049_v9  ;;  %1845 = vmatpush.bf16.msrb.mxu3 %v7050_v47  ;;  %v7060_v9 = vld [vmem:[#allocation76_spill] sm:$0xff]  ;;  %v7061_v47 = vld [vmem:[#allocation46_spill] sm:$0xff] }
 0x230   :  { %1856 = vmatpush.bf16.msra.mxu0 %v7051_v55  ;;  %1882 = vmatpush.bf16.msra.mxu2 %v7052_v20  ;;  %v7062_v55 = vld [vmem:[#allocation52_spill] sm:$0xff] }
 0x233   :  { %1864 = vmatpush.bf16.msra.mxu1 %v7053_v42  ;;  %1890 = vmatpush.bf16.msra.mxu3 %v7054_v30  ;;  %v7063_v42 = vld [vmem:[#allocation50_spill] sm:$0xff]  ;;  %v7064_v30 = vld [vmem:[#allocation56_spill] sm:$0xff] }
 0x234   :  { %1857 = vmatpush.bf16.msra.mxu0 %v7055_v13  ;;  %1883 = vmatpush.bf16.msra.mxu2 %v7056_v44  ;;  %v7065_v13 = vld [vmem:[#allocation55_spill] sm:$0xff]  ;;  %v7066_v44 = vld [vmem:[#allocation60_spill] sm:$0xff] }
 0x236   :  { %v1484_v20 = vpop.f32.mrf.mxu0 }
 0x237   :  { %1865 = vmatpush.bf16.msra.mxu1 %v7057_v54  ;;  %1891 = vmatpush.bf16.msra.mxu3 %v7058_v36  ;;  %v7067_v36 = vld [vmem:[#allocation59_spill] sm:$0xff] }
 0x238   :  { %1858 = vmatpush.bf16.msra.mxu0 %v7059_v24  ;;  %1884 = vmatpush.bf16.msra.mxu2 %v7060_v9  ;;  %v7068_v24 = vld [vmem:[#allocation64_spill] sm:$0xff]  ;;  %v7069_v9 = vld [vmem:[#allocation63_spill] sm:$0xff] }
 0x23b   :  { %1866 = vmatpush.bf16.msra.mxu1 %v7061_v47  ;;  %1892 = vmatpush.bf16.msra.mxu3 %v7062_v55  ;;  %v7070_v47 = vld [vmem:[#allocation68_spill] sm:$0xff] }
 0x23c   :  { %v1510_v54 = vpop.f32.mrf.mxu2 }
 0x23e   :  { %v1486_v61 = vpop.f32.mrf.mxu0 }
 0x23f   :  { %1867 = vmatpush.bf16.msra.mxu1 %v7063_v42  ;;  %1893 = vmatpush.bf16.msra.mxu3 %v7064_v30  ;;  %v7072_v42 = vld [vmem:[#allocation72_spill] sm:$0xff] }
 0x243   :  { %1868 = vmatpush.bf16.msra.mxu1 %v7065_v13  ;;  %1894 = vmatpush.bf16.msra.mxu3 %v7066_v44 }
 0x244   :  { %v1512_v55 = vpop.f32.mrf.mxu2 }
 0x246   :  { %v1536_v23 = vpop.f32.mrf.mxu0 }
 0x247   :  { %1869 = vmatpush.bf16.msra.mxu1 %v7067_v36  ;;  %1895 = vmatpush.bf16.msra.mxu3 %v7068_v24 }
 0x24b   :  { %1870 = vmatpush.bf16.msra.mxu1 %v7069_v9  ;;  %1896 = vmatpush.bf16.msra.mxu3 %v7070_v47 }
 0x24c   :  { %v1562_v13 = vpop.f32.mrf.mxu2 }
 0x24e   :  { %v1538_v38 = vpop.f32.mrf.mxu0 }
 0x24f   :  { %1871 = vmatpush.bf16.msra.mxu1 %v7071_v18  ;;  %1897 = vmatpush.bf16.msra.mxu3 %v7072_v42  ;;  %v1497_v30 = vpop.f32.mrf.mxu1 }
 0x250   :  { %v1498_v45 = vadd.f32 %v1497_v30, %v1484_v20  ;;  %v7074_v20 = vld [vmem:[#allocation129_spill] sm:$0xff] }
 0x254   :  { %v1564_v61 = vpop.f32.mrf.mxu2 }
 0x255   :  { %v1523_v44 = vpop.f32.mrf.mxu3  ;;  %v1751_v61 = vld [vmem:[#allocation2 + $0x2] ss:$8 sm:$0xf] }
 0x256   :  { %v1524_v9 = vadd.f32 %v1523_v44, %v1510_v54 }
 0x257   :  { %v1499_v11 = vpop.f32.mrf.mxu1 }
 0x258   :  { %v1756_v55 = vrot.slane %v1524_v9, 7  ;;  %v7073_v9 = vld [vmem:[#allocation128_spill] sm:$0xff] }
 0x25a   :  { %v1588_v6 = vpop.f32.mrf.mxu0  ;;  %v1759_v38 = vsel %vm1432_vm4, %v1498_v45, %v1756_v55 }
 0x25d   :  { %v1525_v36 = vpop.f32.mrf.mxu3 }
 0x25f   :  { %v1549_v29 = vpop.f32.mrf.mxu1 }
 0x260   :  { %v1614_v24 = vpop.f32.mrf.mxu2  ;;  %v1550_v63 = vadd.f32 %v1549_v29, %v1536_v23 }
 0x262   :  { %v1590_v26 = vpop.f32.mrf.mxu0  ;;  %v1757_v42 = vrot.slane %v1550_v63, 6 }
 0x265   :  { %v1575_v47 = vpop.f32.mrf.mxu3 }
 0x266   :  { %v1576_v58 = vadd.f32 %v1575_v47, %v1562_v13 }
 0x267   :  { %v1551_v53 = vpop.f32.mrf.mxu1 }
 0x268   :  { %v1616_v18 = vpop.f32.mrf.mxu2  ;;  %v1758_v34 = vrot.slane %v1576_v58, 5 }
 0x26a   :  { %v1760_v11 = vsel %vm1434_vm5, %v1757_v42, %v1758_v34 }
 0x26b   :  { %v1761_v36 = vsel %vm1436_vm6, %v1759_v38, %v1760_v11 }
 0x26c   :  { %v1763_v40 = vadd.f32 %v1761_v36, %v1751_v61 }
 0x26d   :  { %v1577_v22 = vpop.f32.mrf.mxu3 }
 0x26e   :  { %v4324_v26 = vmul.f32 -1.442695, %v1763_v40  ;;  %v1784_v11 = vrot.slane %v1763_v40, 3 }
 0x26f   :  { %v1601_v44 = vpop.f32.mrf.mxu1 }
 0x270   :  { %4590 = vpow2.f32 %v4324_v26  ;;  %v1602_v23 = vadd.f32 %v1601_v44, %v1588_v6 }
 0x272   :  { %v1683_v47 = vadd.f32 %v1602_v23, %v7073_v9 }
 0x274   :  { %v4321_v53 = vmul.f32 -1.442695, %v1683_v47 }
 0x275   :  { %v1627_v18 = vpop.f32.mrf.mxu3 }
 0x276   :  { %v4591_v30 = vpop.eup %4590  ;;  %4592 = vpow2.f32 %v4321_v53  ;;  %v1628_v58 = vadd.f32 %v1627_v18, %v1614_v24 }
 0x277   :  { %v1767_v63 = vadd.f32 1.0, %v4591_v30  ;;  %v1603_v45 = vpop.f32.mrf.mxu1 }
 0x278   :  { %v1684_v42 = vadd.f32 %v1628_v58, %v7074_v20 }
 0x279   :  { %4594 = vrcp.f32 %v1767_v63  ;;  %v1779_v24 = vand.u32 2147483648, %v1767_v63  ;;  %v1777_v47 = vand.u32 2147483647, %v1767_v63  ;;  %vm1773_vm11 = vweird.f32 %v1767_v63 }
 0x27a   :  { %v1640_v34 = vpop.f32.mrf.mxu0  ;;  %v4322_v29 = vmul.f32 -1.442695, %v1684_v42 }
 0x27b   :  { %v1780_v30 = vor.u32 1.1754944e-38, %v1779_v24  ;;  %vm1778_vm13 = vcmp.eq.f32.partialorder %v1777_v47, 8.507059e+37 }
 0x27c   :  { %v4593_v54 = vpop.eup %4592  ;;  %4596 = vpow2.f32 %v4322_v29 }
 0x27d   :  { %v1629_v22 = vpop.f32.mrf.mxu3  ;;  %v5592_v13 = vadd.f32 1.0, %v4593_v54 }
 0x27f   :  { %v4595_v55 = vpop.eup %4594  ;;  %4598 = vrcp.f32 %v5592_v13  ;;  %vm1704_vm0 = vweird.f32 %v5592_v13 }
 0x280   :  { %v1666_v6 = vpop.f32.mrf.mxu2  ;;  %v1769_v38 = vmul.f32 %v4595_v55, %v1767_v63  ;;  %vm1774_vm10 = vweird.f32 %v4595_v55  ;;  %4600 = vtanh.f32 %v1784_v11 }
 0x281   :  { %vm1775_vm12 = vmor %vm1773_vm11, %vm1774_vm10 }
 0x282   :  { %v1642_v61 = vpop.f32.mrf.mxu0  ;;  %v4597_v36 = vpop.eup %4596  ;;  %v1770_v26 = vsub.f32 1.0, %v1769_v38 }
 0x283   :  { %v5595_v44 = vadd.f32 1.0, %v4597_v36 }
 0x284   :  { %v1771_v23 = vmul.f32 %v4595_v55, %v1770_v26 }
 0x285   :  { %4602 = vrcp.f32 %v5595_v44  ;;  %v4599_v40 = vpop.eup %4598  ;;  %vm1719_vm1 = vweird.f32 %v5595_v44 }
 0x286   :  { %v1772_v53 = vadd.f32 %v4595_v55, %v1771_v23  ;;  %v4601_v42 = vpop.eup %4600  ;;  %v1700_v22 = vmul.f32 %v4599_v40, %v5592_v13  ;;  %vm1705_vm14 = vweird.f32 %v4599_v40 }
 0x287   :  { %vm5612_vm2 = vmor %vm1704_vm0, %vm1705_vm14 }
 0x288   :  { %v1668_v18 = vpop.f32.mrf.mxu2  ;;  %v1776_v58 = vsel %vm1775_vm12, %v4595_v55, %v1772_v53  ;;  %v1701_v23 = vsub.f32 1.0, %v1700_v22 }
 0x289   :  { %v1781_v45 = vsel %vm1778_vm13, %v1780_v30, %v1776_v58 }
 0x28a   :  { %v1788_v29 = vrot.slane %v1781_v45, 1  ;;  %v1791_v61 = vmul.f32 %v4601_v42, %v1781_v45  ;;  %v1702_v30 = vmul.f32 %v4599_v40, %v1701_v23 }
 0x28b   :  { %v4603_v54 = vpop.eup %4602 }
 0x28c   :  { %v1790_v38 = vmul.f32 %v1788_v29, %v5406_v46  ;;  %v1715_v11 = vmul.f32 %v4603_v54, %v5595_v44  ;;  %v1794_v46 = vrot.slane %v1781_v45, 2  ;;  %vm1720_vm15 = vweird.f32 %v4603_v54 }
 0x28d   :  { %v1708_v45 = vand.u32 2147483647, %v5592_v13  ;;  %vm5618_vm3 = vmor %vm1719_vm1, %vm1720_vm15 }
 0x28e   :  { %v5601_v26 = vadd.f32 %v1791_v61, %v1790_v38  ;;  %v1716_v24 = vsub.f32 1.0, %v1715_v11  ;;  %v1725_v61 = vand.u32 2147483648, %v5595_v44  ;;  %v1710_v11 = vand.u32 2147483648, %v5592_v13 }
 0x28f   :  { %v1653_v36 = vpop.f32.mrf.mxu1  ;;  %vm1709_vm7 = vcmp.eq.f32.partialorder %v1708_v45, 8.507059e+37 }
 0x290   :  { %v1654_v63 = vadd.f32 %v1653_v36, %v1640_v34  ;;  %4604 = vtanh.f32 %v5601_v26  ;;  %v1717_v53 = vmul.f32 %v4603_v54, %v1716_v24  ;;  %v1703_v34 = vadd.f32 %v4599_v40, %v1702_v30 }
 0x291   :  { %v1726_v13 = vor.u32 1.1754944e-38, %v1725_v61 }
 0x292   :  { %v1685_v55 = vadd.f32 %v1654_v63, %v5402_v16  ;;  %v1718_v22 = vadd.f32 %v4603_v54, %v1717_v53  ;;  %v1723_v63 = vand.u32 2147483647, %v5595_v44 }
 0x294   :  { %v4323_v47 = vmul.f32 -1.442695, %v1685_v55  ;;  %vm1724_vm8 = vcmp.eq.f32.partialorder %v1723_v63, 8.507059e+37 }
 0x295   :  { %v1679_v18 = vpop.f32.mrf.mxu3 }
 0x296   :  { %4606 = vpow2.f32 %v4323_v47  ;;  %v1680_v58 = vadd.f32 %v1679_v18, %v1666_v6  ;;  %v4605_v29 = vpop.eup %4604  ;;  %v1722_v47 = vsel %vm5618_vm3, %v4603_v54, %v1718_v22  ;;  %v1711_v18 = vor.u32 1.1754944e-38, %v1710_v11  ;;  %v7079_v11 = vld [vmem:[#allocation106_spill] sm:$0xff] }
 0x297   :  { %v1655_v42 = vpop.f32.mrf.mxu1  ;;  %v1796_v38 = vmul.f32 %v4605_v29, %v1794_v46 }
 0x298   :  { %v1686_v20 = vadd.f32 %v1680_v58, %v5411_v17 }
 0x299   :  { %v5609_v36 = vpack.c.bf16 %v1796_v38, %v1796_v38 }
 0x29a   :  { %4608 = vtanh.f32 %v1686_v20  ;;  %v1707_v20 = vsel %vm5612_vm2, %v4599_v40, %v1703_v34  ;;  %v1727_v40 = vsel %vm1724_vm8, %v1726_v13, %v1722_v47  ;;  %v7081_v47 = vld [vmem:[#allocation79_spill] sm:$0xff]  ;;  %v7083_v13 = vld [vmem:[#allocation81_spill] sm:$0xff] }
 0x29b   :  { %1807 = vmatmul.bf16.vlgmr.msrb.gmra.mxu0 %v5609_v36  ;;  %1833 = vmatmul.bf16.vlgmr.msrb.gmra.mxu2 %v5609_v36  ;;  %v1712_v30 = vsel %vm1709_vm7, %v1711_v18, %v1707_v20  ;;  %v1745_v54 = vmul.f32 %v1727_v40, %v5444_v48  ;;  %v7084_v18 = vld [vmem:[#allocation84_spill] sm:$0xff]  ;;  %v7087_v40 = vld [vmem:[#allocation89_spill] sm:$0xff] }
 0x29c   :  { %v4607_v23 = vpop.eup %4606  ;;  %1903 = vmatpush.bf16.msrb.mxu0 %v6983_v32  ;;  %1929 = vmatpush.bf16.msrb.mxu2 %v6984_v39 }
 0x29d   :  { %v1698_v55 = vadd.f32 1.0, %v4607_v23  ;;  %v1681_v53 = vpop.f32.mrf.mxu3 }
 0x29e   :  { %v7082_v53 = vld [vmem:[#allocation82_spill] sm:$0xff] }
 0x29f   :  { %4610 = vrcp.f32 %v1698_v55  ;;  %v1740_v34 = vand.u32 2147483648, %v1698_v55  ;;  %v1738_v61 = vand.u32 2147483647, %v1698_v55  ;;  %vm1734_vm10 = vweird.f32 %v1698_v55 }
 0x2a0   :  { %v4609_v44 = vpop.eup %4608  ;;  %1904 = vmatpush.bf16.msrb.mxu0 %v6985_v27  ;;  %1930 = vmatpush.bf16.msrb.mxu2 %v6986_v52 }
 0x2a1   :  { %v1746_v58 = vmul.f32 %v4609_v44, %v1712_v30  ;;  %v1741_v6 = vor.u32 1.1754944e-38, %v1740_v34  ;;  %vm1739_vm12 = vcmp.eq.f32.partialorder %v1738_v61, 8.507059e+37  ;;  %v7085_v44 = vld [vmem:[#allocation83_spill] sm:$0xff]  ;;  %v7086_v30 = vld [vmem:[#allocation86_spill] sm:$0xff]  ;;  %v7093_v34 = vld [vmem:[#allocation92_spill] sm:$0xff] }
 0x2a2   :  { %v7095_v61 = vld [vmem:[#allocation126_spill] sm:$0xff] }
 0x2a3   :  { %v5633_v42 = vadd.f32 %v1746_v58, %v1745_v54  ;;  %v7088_v58 = vld [vmem:[#allocation88_spill] sm:$0xff]  ;;  %v7089_v54 = vld [vmem:[#allocation91_spill] sm:$0xff] }
 0x2a4   :  { %1905 = vmatpush.bf16.msrb.mxu0 %v6987_v56  ;;  %1931 = vmatpush.bf16.msrb.mxu2 %v6988_v25 }
 0x2a5   :  { %v4611_v46 = vpop.eup %4610  ;;  %4612 = vtanh.f32 %v5633_v42 }
 0x2a6   :  { %v1730_v29 = vmul.f32 %v4611_v46, %v1698_v55  ;;  %vm1735_vm9 = vweird.f32 %v4611_v46  ;;  %v7080_v55 = vld [vmem:[#allocation117_spill] sm:$0xff] }
 0x2a7   :  { %vm1736_vm11 = vmor %vm1734_vm10, %vm1735_vm9 }
 0x2a8   :  { %v1731_v38 = vsub.f32 1.0, %v1730_v29  ;;  %1906 = vmatpush.bf16.msrb.mxu0 %v7079_v11  ;;  %1932 = vmatpush.bf16.msrb.mxu2 %v6990_v19  ;;  %v7091_v29 = vld [vmem:[#allocation124_spill] sm:$0xff] }
 0x2aa   :  { %v1732_v22 = vmul.f32 %v4611_v46, %v1731_v38  ;;  %v7092_v38 = vld [vmem:[#allocation125_spill] sm:$0xff] }
 0x2ab   :  { %1859 = vmatmul.bf16.vlgmr.msra.gmra.mxu0 %v5609_v36  ;;  %1885 = vmatmul.bf16.vlgmr.msra.gmra.mxu2 %v5609_v36  ;;  %v4613_v63 = vpop.eup %4612 }
 0x2ac   :  { %v1733_v48 = vadd.f32 %v4611_v46, %v1732_v22  ;;  %1907 = vmatpush.bf16.msrb.mxu0 %v6991_v1  ;;  %1933 = vmatpush.bf16.msrb.mxu2 %v6992_v43  ;;  %v7094_v22 = vld [vmem:[#allocation97_spill] sm:$0xff] }
 0x2ae   :  { %v1737_v45 = vsel %vm1736_vm11, %v4611_v46, %v1733_v48  ;;  %v7090_v46 = vld [vmem:[#allocation90_spill] sm:$0xff]  ;;  %v7096_v48 = vld [vmem:[#allocation127_spill] sm:$0xff] }
 0x2af   :  { %v1742_v23 = vsel %vm1739_vm12, %v1741_v6, %v1737_v45  ;;  %v7097_v6 = vld [vmem:[#allocation13_spill] sm:$0xff]  ;;  %v7098_v45 = vld [vmem:[#allocation15_spill] sm:$0xff] }
 0x2b0   :  { %v1749_v24 = vmul.f32 %v4613_v63, %v1742_v23  ;;  %1908 = vmatpush.bf16.msrb.mxu0 %v5225_v5  ;;  %1934 = vmatpush.bf16.msrb.mxu2 %v5227_v21  ;;  %v7099_v63 = vld [vmem:[#allocation96_spill] sm:$0xff]  ;;  %v7100_v23 = vld [vmem:[#allocation101_spill] sm:$0xff] }
 0x2b2   :  { %v5644_v20 = vpack.c.bf16 %v1749_v24, %v1749_v24  ;;  %v7101_v24 = vld [vmem:[#allocation17_spill] sm:$0xff] }
 0x2b4   :  { %1820 = vmatmul.bf16.vlgmr.msrb.gmra.mxu1 %v5644_v20  ;;  %1846 = vmatmul.bf16.vlgmr.msrb.gmra.mxu3 %v5644_v20 }
 0x2b5   :  { %1916 = vmatpush.bf16.msrb.mxu1 %v6993_v59  ;;  %1942 = vmatpush.bf16.msrb.mxu3 %v6994_v60 }
 0x2b6   :  { %1909 = vmatpush.bf16.msrb.mxu0 %v5237_v28  ;;  %1935 = vmatpush.bf16.msrb.mxu2 %v5239_v12 }
 0x2b9   :  { %1917 = vmatpush.bf16.msrb.mxu1 %v6995_v50  ;;  %1943 = vmatpush.bf16.msrb.mxu3 %v6996_v31 }
 0x2ba   :  { %1910 = vmatpush.bf16.msrb.mxu0 %v5248_v51  ;;  %1936 = vmatpush.bf16.msrb.mxu2 %v5250_v7 }
 0x2bd   :  { %1918 = vmatpush.bf16.msrb.mxu1 %v6997_v0  ;;  %1944 = vmatpush.bf16.msrb.mxu3 %v6998_v41 }
 0x2be   :  { %1955 = vmatpush.bf16.msra.mxu0 %v5252_v8  ;;  %1981 = vmatpush.bf16.msra.mxu2 %v5254_v15 }
 0x2bf   :  { %1911 = vmatmul.bf16.vlgmr.msrb.gmra.mxu0 %v5609_v36  ;;  %1937 = vmatmul.bf16.vlgmr.msrb.gmra.mxu2 %v5609_v36 }
 0x2c1   :  { %1919 = vmatpush.bf16.msrb.mxu1 %v7081_v47  ;;  %1945 = vmatpush.bf16.msrb.mxu3 %v7082_v53 }
 0x2c2   :  { %1956 = vmatpush.bf16.msra.mxu0 %v7080_v55  ;;  %1982 = vmatpush.bf16.msra.mxu2 %v5266_v33 }
 0x2c4   :  { %1872 = vmatmul.bf16.vlgmr.msra.gmra.mxu1 %v5644_v20  ;;  %1898 = vmatmul.bf16.vlgmr.msra.gmra.mxu3 %v5644_v20 }
 0x2c5   :  { %1920 = vmatpush.bf16.msrb.mxu1 %v7083_v13  ;;  %1946 = vmatpush.bf16.msrb.mxu3 %v7084_v18 }
 0x2c6   :  { %1957 = vmatpush.bf16.msra.mxu0 %v5275_v35  ;;  %1983 = vmatpush.bf16.msra.mxu2 %v5277_v57 }
 0x2c9   :  { %1921 = vmatpush.bf16.msrb.mxu1 %v7085_v44  ;;  %1947 = vmatpush.bf16.msrb.mxu3 %v7086_v30 }
 0x2ca   :  { %1958 = vmatpush.bf16.msra.mxu0 %v5283_v37  ;;  %1984 = vmatpush.bf16.msra.mxu2 %v5285_v49 }
 0x2cd   :  { %1922 = vmatpush.bf16.msrb.mxu1 %v7005_v3  ;;  %1948 = vmatpush.bf16.msrb.mxu3 %v7087_v40 }
 0x2ce   :  { %1959 = vmatpush.bf16.msra.mxu0 %v5291_v62  ;;  %1985 = vmatpush.bf16.msra.mxu2 %v5293_v2 }
 0x2d1   :  { %1923 = vmatpush.bf16.msrb.mxu1 %v7088_v58  ;;  %1949 = vmatpush.bf16.msrb.mxu3 %v7089_v54 }
 0x2d2   :  { %1960 = vmatpush.bf16.msra.mxu0 %v5299_v10  ;;  %1986 = vmatpush.bf16.msra.mxu2 %v5301_v14 }
 0x2d4   :  { %1924 = vmatmul.bf16.vlgmr.msrb.gmra.mxu1 %v5644_v20  ;;  %1950 = vmatmul.bf16.vlgmr.msrb.gmra.mxu3 %v5644_v20 }
 0x2d5   :  { %1968 = vmatpush.bf16.msra.mxu1 %v7090_v46  ;;  %1994 = vmatpush.bf16.msra.mxu3 %v7010_v4 }
 0x2d6   :  { %1961 = vmatpush.bf16.msra.mxu0 %v7091_v29  ;;  %1987 = vmatpush.bf16.msra.mxu2 %v7092_v38  ;;  %v7110_v38 = vld [vmem:[#allocation27_spill] sm:$0xff] }
 0x2d7   :  { %v7171_v29 = vld [vmem:[#allocation67_spill] sm:$0xff] }
 0x2d9   :  { %1969 = vmatpush.bf16.msra.mxu1 %v7093_v34  ;;  %1995 = vmatpush.bf16.msra.mxu3 %v7094_v22  ;;  %v7102_v34 = vld [vmem:[#allocation19_spill] sm:$0xff]  ;;  %v7103_v22 = vld [vmem:[#allocation100_spill] sm:$0xff] }
 0x2da   :  { %1962 = vmatpush.bf16.msra.mxu0 %v7095_v61  ;;  %1988 = vmatpush.bf16.msra.mxu2 %v7096_v48  ;;  %v7104_v61 = vld [vmem:[#allocation105_spill] sm:$0xff] }
 0x2db   :  { %v7105_v48 = vld [vmem:[#allocation21_spill] sm:$0xff] }
 0x2dd   :  { %1970 = vmatpush.bf16.msra.mxu1 %v7099_v63  ;;  %1996 = vmatpush.bf16.msra.mxu3 %v7100_v23  ;;  %v7108_v63 = vld [vmem:[#allocation109_spill] sm:$0xff] }
 0x2de   :  { %2123 = vmatpush.bf16.msrb.mxu0 %v7097_v6  ;;  %2149 = vmatpush.bf16.msrb.mxu2 %v7098_v45  ;;  %v7106_v6 = vld [vmem:[#allocation23_spill] sm:$0xff]  ;;  %v7107_v45 = vld [vmem:[#allocation104_spill] sm:$0xff]  ;;  %v7109_v23 = vld [vmem:[#allocation25_spill] sm:$0xff] }
 0x2df   :  { %1963 = vmatmul.bf16.vlgmr.msra.gmra.mxu0 %v5609_v36  ;;  %1989 = vmatmul.bf16.vlgmr.msra.gmra.mxu2 %v5609_v36  ;;  %v7111_v36 = vld [vmem:[#allocation108_spill] sm:$0xff] }
 0x2e1   :  { %1971 = vmatpush.bf16.msra.mxu1 %v7103_v22  ;;  %1997 = vmatpush.bf16.msra.mxu3 %v7104_v61  ;;  %v7114_v22 = vld [vmem:[#allocation31_spill] sm:$0xff]  ;;  %v7115_v61 = vld [vmem:[#allocation112_spill] sm:$0xff] }
 0x2e2   :  { %2124 = vmatpush.bf16.msrb.mxu0 %v7101_v24  ;;  %2150 = vmatpush.bf16.msrb.mxu2 %v7102_v34  ;;  %v7112_v24 = vld [vmem:[#allocation113_spill] sm:$0xff] }
 0x2e3   :  { %v7113_v34 = vld [vmem:[#allocation29_spill] sm:$0xff] }
 0x2e5   :  { %1972 = vmatpush.bf16.msra.mxu1 %v7107_v45  ;;  %1998 = vmatpush.bf16.msra.mxu3 %v7108_v63  ;;  %v7118_v45 = vld [vmem:[#allocation35_spill] sm:$0xff]  ;;  %v7119_v63 = vld [vmem:[#allocation114_spill] sm:$0xff] }
 0x2e6   :  { %2125 = vmatpush.bf16.msrb.mxu0 %v7105_v48  ;;  %2151 = vmatpush.bf16.msrb.mxu2 %v7106_v6  ;;  %v7116_v48 = vld [vmem:[#allocation115_spill] sm:$0xff]  ;;  %v7117_v6 = vld [vmem:[#allocation33_spill] sm:$0xff] }
 0x2e9   :  { %1973 = vmatpush.bf16.msra.mxu1 %v7111_v36  ;;  %1999 = vmatpush.bf16.msra.mxu3 %v7112_v24  ;;  %v7122_v36 = vld [vmem:[#allocation12_spill] sm:$0xff]  ;;  %v7123_v24 = vld [vmem:[#allocation38_spill] sm:$0xff] }
 0x2ea   :  { %2126 = vmatpush.bf16.msrb.mxu0 %v7109_v23  ;;  %2152 = vmatpush.bf16.msrb.mxu2 %v7110_v38  ;;  %v7120_v23 = vld [vmem:[#allocation116_spill] sm:$0xff]  ;;  %v7121_v38 = vld [vmem:[#allocation10_spill] sm:$0xff] }
 0x2ed   :  { %1974 = vmatpush.bf16.msra.mxu1 %v7115_v61  ;;  %2000 = vmatpush.bf16.msra.mxu3 %v7116_v48  ;;  %v7134_v48 = vld [vmem:[#allocation51_spill] sm:$0xff] }
 0x2ee   :  { %2127 = vmatpush.bf16.msrb.mxu0 %v7113_v34  ;;  %2153 = vmatpush.bf16.msrb.mxu2 %v7114_v22  ;;  %v7124_v34 = vld [vmem:[#allocation39_spill] sm:$0xff] }
 0x2ef   :  { %v7125_v22 = vld [vmem:[#allocation11_spill] sm:$0xff] }
 0x2f0   :  { %v7167_v61 = vld [vmem:[#allocation59_spill] sm:$0xff] }
 0x2f1   :  { %1975 = vmatpush.bf16.msra.mxu1 %v7119_v63  ;;  %2001 = vmatpush.bf16.msra.mxu3 %v7120_v23  ;;  %v7128_v63 = vld [vmem:[#allocation44_spill] sm:$0xff]  ;;  %v7129_v23 = vld [vmem:[#allocation45_spill] sm:$0xff] }
 0x2f2   :  { %2128 = vmatpush.bf16.msrb.mxu0 %v7117_v6  ;;  %2154 = vmatpush.bf16.msrb.mxu2 %v7118_v45  ;;  %v7126_v6 = vld [vmem:[#allocation16_spill] sm:$0xff]  ;;  %v7127_v45 = vld [vmem:[#allocation43_spill] sm:$0xff] }
 0x2f4   :  { %1976 = vmatmul.bf16.vlgmr.msra.gmra.mxu1 %v5644_v20  ;;  %2002 = vmatmul.bf16.vlgmr.msra.gmra.mxu3 %v5644_v20  ;;  %v7135_v20 = vld [vmem:[#allocation18_spill] sm:$0xff] }
 0x2f5   :  { %2136 = vmatpush.bf16.msrb.mxu1 %v7121_v38  ;;  %2162 = vmatpush.bf16.msrb.mxu3 %v7122_v36  ;;  %v7130_v38 = vld [vmem:[#allocation47_spill] sm:$0xff]  ;;  %v7131_v36 = vld [vmem:[#allocation14_spill] sm:$0xff] }
 0x2f6   :  { %2129 = vmatpush.bf16.msrb.mxu0 %v7123_v24  ;;  %2155 = vmatpush.bf16.msrb.mxu2 %v7124_v34  ;;  %v7132_v24 = vld [vmem:[#allocation20_spill] sm:$0xff]  ;;  %v7133_v34 = vld [vmem:[#allocation49_spill] sm:$0xff] }
 0x2f9   :  { %2137 = vmatpush.bf16.msrb.mxu1 %v7125_v22  ;;  %2163 = vmatpush.bf16.msrb.mxu3 %v7126_v6  ;;  %v7136_v22 = vld [vmem:[#allocation24_spill] sm:$0xff]  ;;  %v7137_v6 = vld [vmem:[#allocation53_spill] sm:$0xff] }
 0x2fa   :  { %2130 = vmatpush.bf16.msrb.mxu0 %v7127_v45  ;;  %2156 = vmatpush.bf16.msrb.mxu2 %v7128_v63  ;;  %v7138_v45 = vld [vmem:[#allocation54_spill] sm:$0xff] }
 0x2fb   :  { %v7139_v63 = vld [vmem:[#allocation22_spill] sm:$0xff] }
 0x2fd   :  { %2138 = vmatpush.bf16.msrb.mxu1 %v7131_v36  ;;  %2164 = vmatpush.bf16.msrb.mxu3 %v7132_v24  ;;  %v7142_v36 = vld [vmem:[#allocation58_spill] sm:$0xff] }
 0x2fe   :  { %2175 = vmatpush.bf16.msra.mxu0 %v7129_v23  ;;  %2201 = vmatpush.bf16.msra.mxu2 %v7130_v38  ;;  %v7140_v23 = vld [vmem:[#allocation28_spill] sm:$0xff]  ;;  %v7141_v38 = vld [vmem:[#allocation57_spill] sm:$0xff]  ;;  %v7143_v24 = vld [vmem:[#allocation26_spill] sm:$0xff] }
 0x301   :  { %2139 = vmatpush.bf16.msrb.mxu1 %v7135_v20  ;;  %2165 = vmatpush.bf16.msrb.mxu3 %v7136_v22  ;;  %v7146_v20 = vld [vmem:[#allocation62_spill] sm:$0xff] }
 0x302   :  { %2176 = vmatpush.bf16.msra.mxu0 %v7133_v34  ;;  %2202 = vmatpush.bf16.msra.mxu2 %v7134_v48  ;;  %v7144_v34 = vld [vmem:[#allocation32_spill] sm:$0xff]  ;;  %v7145_v48 = vld [vmem:[#allocation61_spill] sm:$0xff]  ;;  %v7147_v22 = vld [vmem:[#allocation30_spill] sm:$0xff] }
 0x305   :  { %2140 = vmatpush.bf16.msrb.mxu1 %v7139_v63  ;;  %2166 = vmatpush.bf16.msrb.mxu3 %v7140_v23  ;;  %v7150_v63 = vld [vmem:[#allocation66_spill] sm:$0xff] }
 0x306   :  { %2177 = vmatpush.bf16.msra.mxu0 %v7137_v6  ;;  %2203 = vmatpush.bf16.msra.mxu2 %v7138_v45  ;;  %v7148_v6 = vld [vmem:[#allocation36_spill] sm:$0xff]  ;;  %v7149_v45 = vld [vmem:[#allocation65_spill] sm:$0xff]  ;;  %v7151_v23 = vld [vmem:[#allocation34_spill] sm:$0xff] }
 0x309   :  { %2141 = vmatpush.bf16.msrb.mxu1 %v7143_v24  ;;  %2167 = vmatpush.bf16.msrb.mxu3 %v7144_v34  ;;  %v7154_v24 = vld [vmem:[#allocation42_spill] sm:$0xff] }
 0x30a   :  { %2178 = vmatpush.bf16.msra.mxu0 %v7141_v38  ;;  %2204 = vmatpush.bf16.msra.mxu2 %v7142_v36  ;;  %v7152_v38 = vld [vmem:[#allocation40_spill] sm:$0xff]  ;;  %v7153_v36 = vld [vmem:[#allocation37_spill] sm:$0xff]  ;;  %v7155_v34 = vld [vmem:[#allocation70_spill] sm:$0xff] }
 0x30d   :  { %2142 = vmatpush.bf16.msrb.mxu1 %v7147_v22  ;;  %2168 = vmatpush.bf16.msrb.mxu3 %v7148_v6  ;;  %v7158_v22 = vld [vmem:[#allocation48_spill] sm:$0xff]  ;;  %v7159_v6 = vld [vmem:[#allocation75_spill] sm:$0xff] }
 0x30e   :  { %2179 = vmatpush.bf16.msra.mxu0 %v7145_v48  ;;  %2205 = vmatpush.bf16.msra.mxu2 %v7146_v20  ;;  %v7156_v48 = vld [vmem:[#allocation71_spill] sm:$0xff]  ;;  %v7157_v20 = vld [vmem:[#allocation41_spill] sm:$0xff] }
 0x311   :  { %2143 = vmatpush.bf16.msrb.mxu1 %v7151_v23  ;;  %2169 = vmatpush.bf16.msrb.mxu3 %v7152_v38  ;;  %v7162_v23 = vld [vmem:[#allocation52_spill] sm:$0xff]  ;;  %v7163_v38 = vld [vmem:[#allocation50_spill] sm:$0xff] }
 0x312   :  { %2180 = vmatpush.bf16.msra.mxu0 %v7149_v45  ;;  %2206 = vmatpush.bf16.msra.mxu2 %v7150_v63  ;;  %v7160_v45 = vld [vmem:[#allocation76_spill] sm:$0xff]  ;;  %v7161_v63 = vld [vmem:[#allocation46_spill] sm:$0xff] }
 0x315   :  { %2188 = vmatpush.bf16.msra.mxu1 %v7153_v36  ;;  %2214 = vmatpush.bf16.msra.mxu3 %v7154_v24  ;;  %v7164_v36 = vld [vmem:[#allocation56_spill] sm:$0xff] }
 0x316   :  { %2181 = vmatpush.bf16.msra.mxu0 %v7155_v34  ;;  %2207 = vmatpush.bf16.msra.mxu2 %v7156_v48  ;;  %v7165_v34 = vld [vmem:[#allocation55_spill] sm:$0xff]  ;;  %v7166_v48 = vld [vmem:[#allocation60_spill] sm:$0xff] }
 0x318   :  { %v1808_v24 = vpop.f32.mrf.mxu0 }
 0x319   :  { %2189 = vmatpush.bf16.msra.mxu1 %v7157_v20  ;;  %2215 = vmatpush.bf16.msra.mxu3 %v7158_v22  ;;  %v7168_v22 = vld [vmem:[#allocation64_spill] sm:$0xff] }
 0x31a   :  { %2182 = vmatpush.bf16.msra.mxu0 %v7159_v6  ;;  %2208 = vmatpush.bf16.msra.mxu2 %v7160_v45  ;;  %v7169_v45 = vld [vmem:[#allocation63_spill] sm:$0xff] }
 0x31d   :  { %2190 = vmatpush.bf16.msra.mxu1 %v7161_v63  ;;  %2216 = vmatpush.bf16.msra.mxu3 %v7162_v23  ;;  %v7170_v63 = vld [vmem:[#allocation68_spill] sm:$0xff] }
 0x31e   :  { %v1834_v20 = vpop.f32.mrf.mxu2 }
 0x320   :  { %v1810_v6 = vpop.f32.mrf.mxu0 }
 0x321   :  { %2191 = vmatpush.bf16.msra.mxu1 %v7163_v38  ;;  %2217 = vmatpush.bf16.msra.mxu3 %v7164_v36  ;;  %v7172_v38 = vld [vmem:[#allocation72_spill] sm:$0xff] }
 0x325   :  { %2192 = vmatpush.bf16.msra.mxu1 %v7165_v34  ;;  %2218 = vmatpush.bf16.msra.mxu3 %v7166_v48 }
 0x326   :  { %v1836_v23 = vpop.f32.mrf.mxu2 }
 0x328   :  { %v1860_v36 = vpop.f32.mrf.mxu0 }
 0x329   :  { %2193 = vmatpush.bf16.msra.mxu1 %v7167_v61  ;;  %2219 = vmatpush.bf16.msra.mxu3 %v7168_v22 }
 0x32d   :  { %2194 = vmatpush.bf16.msra.mxu1 %v7169_v45  ;;  %2220 = vmatpush.bf16.msra.mxu3 %v7170_v63 }
 0x32e   :  { %v1886_v4 = vpop.f32.mrf.mxu2 }
 0x330   :  { %v1862_v46 = vpop.f32.mrf.mxu0 }
 0x331   :  { %2195 = vmatpush.bf16.msra.mxu1 %v7171_v29  ;;  %2221 = vmatpush.bf16.msra.mxu3 %v7172_v38  ;;  %v1821_v34 = vpop.f32.mrf.mxu1 }
 0x332   :  { %v1822_v38 = vadd.f32 %v1821_v34, %v1808_v24 }
 0x336   :  { %v1888_v14 = vpop.f32.mrf.mxu2 }
 0x337   :  { %v1847_v48 = vpop.f32.mrf.mxu3 }
 0x338   :  { %v1848_v45 = vadd.f32 %v1847_v48, %v1834_v20 }
 0x339   :  { %v1823_v10 = vpop.f32.mrf.mxu1 }
 0x33a   :  { %v2080_v23 = vrot.slane %v1848_v45, 7  ;;  %v2075_v10 = vld [vmem:[#allocation2 + $0x3] ss:$8 sm:$0xf] }
 0x33c   :  { %v1912_v61 = vpop.f32.mrf.mxu0  ;;  %v2083_v46 = vsel %vm1432_vm4, %v1822_v38, %v2080_v23 }
 0x33f   :  { %v1849_v54 = vpop.f32.mrf.mxu3 }
 0x341   :  { %v1873_v22 = vpop.f32.mrf.mxu1 }
 0x342   :  { %v1938_v6 = vpop.f32.mrf.mxu2  ;;  %v1874_v2 = vadd.f32 %v1873_v22, %v1860_v36 }
 0x344   :  { %v1914_v58 = vpop.f32.mrf.mxu0  ;;  %v2081_v3 = vrot.slane %v1874_v2, 6 }
 0x347   :  { %v1899_v63 = vpop.f32.mrf.mxu3 }
 0x348   :  { %v1900_v62 = vadd.f32 %v1899_v63, %v1886_v4 }
 0x349   :  { %v1875_v29 = vpop.f32.mrf.mxu1 }
 0x34a   :  { %v1940_v40 = vpop.f32.mrf.mxu2  ;;  %v2082_v49 = vrot.slane %v1900_v62, 5 }
 0x34c   :  { %v2084_v14 = vsel %vm1434_vm5, %v2081_v3, %v2082_v49  ;;  %v7173_v49 = vld [vmem:[#allocation129_spill] sm:$0xff] }
 0x34d   :  { %v2085_v54 = vsel %vm1436_vm6, %v2083_v46, %v2084_v14 }
 0x34e   :  { %v2087_v37 = vadd.f32 %v2085_v54, %v2075_v10 }
 0x34f   :  { %v1901_v30 = vpop.f32.mrf.mxu3 }
 0x350   :  { %v4328_v58 = vmul.f32 -1.442695, %v2087_v37  ;;  %v2108_v14 = vrot.slane %v2087_v37, 3 }
 0x351   :  { %v1925_v48 = vpop.f32.mrf.mxu1 }
 0x352   :  { %4614 = vpow2.f32 %v4328_v58  ;;  %v1926_v22 = vadd.f32 %v1925_v48, %v1912_v61 }
 0x354   :  { %v2007_v4 = vadd.f32 %v1926_v22, %v7073_v9 }
 0x356   :  { %v4325_v29 = vmul.f32 -1.442695, %v2007_v4 }
 0x357   :  { %v1951_v40 = vpop.f32.mrf.mxu3 }
 0x358   :  { %v4615_v34 = vpop.eup %4614  ;;  %4616 = vpow2.f32 %v4325_v29  ;;  %v1952_v62 = vadd.f32 %v1951_v40, %v1938_v6 }
 0x359   :  { %v2091_v38 = vadd.f32 1.0, %v4615_v34  ;;  %v1927_v45 = vpop.f32.mrf.mxu1 }
 0x35a   :  { %v2008_v3 = vadd.f32 %v1952_v62, %v7173_v49 }
 0x35b   :  { %4618 = vrcp.f32 %v2091_v38  ;;  %v2103_v54 = vand.u32 2147483648, %v2091_v38  ;;  %v2101_v22 = vand.u32 2147483647, %v2091_v38  ;;  %vm2097_vm14 = vweird.f32 %v2091_v38 }
 0x35c   :  { %v1964_v2 = vpop.f32.mrf.mxu0  ;;  %v4326_v63 = vmul.f32 -1.442695, %v2008_v3 }
 0x35d   :  { %v2104_v34 = vor.u32 1.1754944e-38, %v2103_v54  ;;  %vm2102_vm0 = vcmp.eq.f32.partialorder %v2101_v22, 8.507059e+37 }
 0x35e   :  { %v4617_v24 = vpop.eup %4616  ;;  %4620 = vpow2.f32 %v4326_v63 }
 0x35f   :  { %v5781_v36 = vadd.f32 1.0, %v4617_v24  ;;  %v1953_v61 = vpop.f32.mrf.mxu3 }
 0x361   :  { %v4619_v23 = vpop.eup %4618  ;;  %4622 = vrcp.f32 %v5781_v36  ;;  %vm2028_vm3 = vweird.f32 %v5781_v36 }
 0x362   :  { %v1990_v30 = vpop.f32.mrf.mxu2  ;;  %v2093_v46 = vmul.f32 %v4619_v23, %v2091_v38  ;;  %vm2098_vm13 = vweird.f32 %v4619_v23  ;;  %4624 = vtanh.f32 %v2108_v14 }
 0x363   :  { %vm2099_vm15 = vmor %vm2097_vm14, %vm2098_vm13 }
 0x364   :  { %v1966_v20 = vpop.f32.mrf.mxu0  ;;  %v4621_v6 = vpop.eup %4620  ;;  %v2094_v10 = vsub.f32 1.0, %v2093_v46 }
 0x365   :  { %v5784_v58 = vadd.f32 1.0, %v4621_v6 }
 0x366   :  { %v2095_v48 = vmul.f32 %v4619_v23, %v2094_v10 }
 0x367   :  { %4626 = vrcp.f32 %v5784_v58  ;;  %v4623_v40 = vpop.eup %4622  ;;  %vm2043_vm7 = vweird.f32 %v5784_v58 }
 0x368   :  { %v2096_v29 = vadd.f32 %v4619_v23, %v2095_v48  ;;  %v4625_v45 = vpop.eup %4624  ;;  %v2024_v63 = vmul.f32 %v4623_v40, %v5781_v36  ;;  %vm2029_vm1 = vweird.f32 %v4623_v40 }
 0x369   :  { %vm5799_vm8 = vmor %vm2028_vm3, %vm2029_vm1 }
 0x36a   :  { %v1992_v4 = vpop.f32.mrf.mxu2  ;;  %v2100_v37 = vsel %vm2099_vm15, %v4619_v23, %v2096_v29  ;;  %v2025_v38 = vsub.f32 1.0, %v2024_v63 }
 0x36b   :  { %v2105_v62 = vsel %vm2102_vm0, %v2104_v34, %v2100_v37 }
 0x36c   :  { %v2112_v3 = vrot.slane %v2105_v62, 1  ;;  %v2115_v20 = vmul.f32 %v4625_v45, %v2105_v62  ;;  %v2026_v29 = vmul.f32 %v4623_v40, %v2025_v38  ;;  %v2118_v37 = vrot.slane %v2105_v62, 2 }
 0x36d   :  { %v4627_v24 = vpop.eup %4626  ;;  %v2032_v62 = vand.u32 2147483647, %v5781_v36 }
 0x36e   :  { %v2114_v61 = vmul.f32 %v2112_v3, %v5601_v26  ;;  %v2039_v46 = vmul.f32 %v4627_v24, %v5784_v58  ;;  %vm2044_vm2 = vweird.f32 %v4627_v24  ;;  %v2027_v3 = vadd.f32 %v4623_v40, %v2026_v29 }
 0x36f   :  { %vm5807_vm9 = vmor %vm2043_vm7, %vm2044_vm2  ;;  %vm2033_vm10 = vcmp.eq.f32.partialorder %v2032_v62, 8.507059e+37 }
 0x370   :  { %v5790_v10 = vadd.f32 %v2115_v20, %v2114_v61  ;;  %v2040_v48 = vsub.f32 1.0, %v2039_v46  ;;  %v2049_v20 = vand.u32 2147483648, %v5784_v58  ;;  %v2034_v46 = vand.u32 2147483648, %v5781_v36 }
 0x371   :  { %v1977_v14 = vpop.f32.mrf.mxu1 }
 0x372   :  { %v1978_v6 = vadd.f32 %v1977_v14, %v1964_v2  ;;  %4628 = vtanh.f32 %v5790_v10  ;;  %v2041_v22 = vmul.f32 %v4627_v24, %v2040_v48  ;;  %v2047_v14 = vand.u32 2147483647, %v5784_v58 }
 0x373   :  { %v2050_v29 = vor.u32 1.1754944e-38, %v2049_v20 }
 0x374   :  { %v2009_v23 = vadd.f32 %v1978_v6, %v5402_v16  ;;  %v2042_v63 = vadd.f32 %v4627_v24, %v2041_v22  ;;  %vm2048_vm11 = vcmp.eq.f32.partialorder %v2047_v14, 8.507059e+37 }
 0x376   :  { %v4327_v54 = vmul.f32 -1.442695, %v2009_v23  ;;  %v2046_v22 = vsel %vm5807_vm9, %v4627_v24, %v2042_v63 }
 0x377   :  { %v2003_v4 = vpop.f32.mrf.mxu3 }
 0x378   :  { %4630 = vpow2.f32 %v4327_v54  ;;  %v2004_v34 = vadd.f32 %v2003_v4, %v1990_v30  ;;  %v4629_v2 = vpop.eup %4628  ;;  %v2031_v54 = vsel %vm5799_vm8, %v4623_v40, %v2027_v3  ;;  %v2051_v40 = vsel %vm2048_vm11, %v2050_v29, %v2046_v22  ;;  %v7180_v22 = vld [vmem:[#allocation119_spill] sm:$0xff]  ;;  %v7182_v29 = vld [vmem:[#allocation89_spill] sm:$0xff] }
 0x379   :  { %v1979_v26 = vpop.f32.mrf.mxu1  ;;  %v2120_v61 = vmul.f32 %v4629_v2, %v2118_v37  ;;  %v2069_v24 = vmul.f32 %v2051_v40, %v5633_v42  ;;  %v7186_v40 = vld [vmem:[#allocation91_spill] sm:$0xff] }
 0x37a   :  { %v2010_v45 = vadd.f32 %v2004_v34, %v5411_v17  ;;  %v2035_v34 = vor.u32 1.1754944e-38, %v2034_v46 }
 0x37b   :  { %v5805_v38 = vpack.c.bf16 %v2120_v61, %v2120_v61 }
 0x37c   :  { %4632 = vtanh.f32 %v2010_v45  ;;  %v2036_v58 = vsel %vm2033_vm10, %v2035_v34, %v2031_v54  ;;  %v7179_v54 = vld [vmem:[#allocation118_spill] sm:$0xff]  ;;  %v7183_v34 = vld [vmem:[#allocation120_spill] sm:$0xff] }
 0x37d   :  { %2131 = vmatmul.bf16.vlgmr.msrb.gmra.mxu0 %v5805_v38  ;;  %2157 = vmatmul.bf16.vlgmr.msrb.gmra.mxu2 %v5805_v38 }
 0x37e   :  { %v4631_v6 = vpop.eup %4630  ;;  %2227 = vmatpush.bf16.msrb.mxu0 %v6983_v32  ;;  %2253 = vmatpush.bf16.msrb.mxu2 %v6984_v39 }
 0x37f   :  { %v2022_v23 = vadd.f32 1.0, %v4631_v6  ;;  %v2005_v4 = vpop.f32.mrf.mxu3 }
 0x380   :  { %v7181_v4 = vld [vmem:[#allocation85_spill] sm:$0xff] }
 0x381   :  { %4634 = vrcp.f32 %v2022_v23  ;;  %v2064_v63 = vand.u32 2147483648, %v2022_v23  ;;  %v2062_v20 = vand.u32 2147483647, %v2022_v23  ;;  %vm2058_vm13 = vweird.f32 %v2022_v23 }
 0x382   :  { %v4633_v36 = vpop.eup %4632  ;;  %2228 = vmatpush.bf16.msrb.mxu0 %v6985_v27  ;;  %2254 = vmatpush.bf16.msrb.mxu2 %v6986_v52 }
 0x383   :  { %v2070_v26 = vmul.f32 %v4633_v36, %v2036_v58  ;;  %v2065_v46 = vor.u32 1.1754944e-38, %v2064_v63  ;;  %vm2063_vm15 = vcmp.eq.f32.partialorder %v2062_v20, 8.507059e+37  ;;  %v7184_v36 = vld [vmem:[#allocation121_spill] sm:$0xff]  ;;  %v7185_v58 = vld [vmem:[#allocation88_spill] sm:$0xff] }
 0x384   :  { %v7192_v63 = vld [vmem:[#allocation125_spill] sm:$0xff] }
 0x385   :  { %v5822_v45 = vadd.f32 %v2070_v26, %v2069_v24  ;;  %v7187_v26 = vld [vmem:[#allocation122_spill] sm:$0xff]  ;;  %v7188_v24 = vld [vmem:[#allocation123_spill] sm:$0xff]  ;;  %v7194_v20 = vld [vmem:[#allocation97_spill] sm:$0xff] }
 0x386   :  { %2229 = vmatpush.bf16.msrb.mxu0 %v6987_v56  ;;  %2255 = vmatpush.bf16.msrb.mxu2 %v6988_v25 }
 0x387   :  { %v4635_v37 = vpop.eup %4634  ;;  %4636 = vtanh.f32 %v5822_v45 }
 0x388   :  { %v2054_v2 = vmul.f32 %v4635_v37, %v2022_v23  ;;  %vm2059_vm12 = vweird.f32 %v4635_v37  ;;  %v7178_v23 = vld [vmem:[#allocation86_spill] sm:$0xff] }
 0x389   :  { %vm2060_vm14 = vmor %vm2058_vm13, %vm2059_vm12 }
 0x38a   :  { %v2055_v3 = vsub.f32 1.0, %v2054_v2  ;;  %2230 = vmatpush.bf16.msrb.mxu0 %v7079_v11  ;;  %2256 = vmatpush.bf16.msrb.mxu2 %v6990_v19  ;;  %v7190_v2 = vld [vmem:[#allocation93_spill] sm:$0xff] }
 0x38c   :  { %v2056_v61 = vmul.f32 %v4635_v37, %v2055_v3  ;;  %v7191_v3 = vld [vmem:[#allocation124_spill] sm:$0xff] }
 0x38d   :  { %2183 = vmatmul.bf16.vlgmr.msra.gmra.mxu0 %v5805_v38  ;;  %2209 = vmatmul.bf16.vlgmr.msra.gmra.mxu2 %v5805_v38  ;;  %v4637_v62 = vpop.eup %4636 }
 0x38e   :  { %v2057_v42 = vadd.f32 %v4635_v37, %v2056_v61  ;;  %2231 = vmatpush.bf16.msrb.mxu0 %v6991_v1  ;;  %2257 = vmatpush.bf16.msrb.mxu2 %v6992_v43  ;;  %v7193_v61 = vld [vmem:[#allocation92_spill] sm:$0xff] }
 0x390   :  { %v2061_v30 = vsel %vm2060_vm14, %v4635_v37, %v2057_v42  ;;  %v7189_v37 = vld [vmem:[#allocation90_spill] sm:$0xff] }
 0x391   :  { %v2066_v14 = vsel %vm2063_vm15, %v2065_v46, %v2061_v30  ;;  %v7195_v42 = vld [vmem:[#allocation126_spill] sm:$0xff]  ;;  %v7196_v46 = vld [vmem:[#allocation127_spill] sm:$0xff]  ;;  %v7197_v30 = vld [vmem:[#allocation96_spill] sm:$0xff] }
 0x392   :  { %v2073_v6 = vmul.f32 %v4637_v62, %v2066_v14  ;;  %2232 = vmatpush.bf16.msrb.mxu0 %v5225_v5  ;;  %2258 = vmatpush.bf16.msrb.mxu2 %v5227_v21  ;;  %v7198_v62 = vld [vmem:[#allocation101_spill] sm:$0xff] }
 0x393   :  { %v7199_v14 = vld [vmem:[#allocation13_spill] sm:$0xff] }
 0x394   :  { %v5833_v48 = vpack.c.bf16 %v2073_v6, %v2073_v6  ;;  %v7200_v6 = vld [vmem:[#allocation15_spill] sm:$0xff] }
 0x396   :  { %2144 = vmatmul.bf16.vlgmr.msrb.gmra.mxu1 %v5833_v48  ;;  %2170 = vmatmul.bf16.vlgmr.msrb.gmra.mxu3 %v5833_v48 }
 0x397   :  { %2240 = vmatpush.bf16.msrb.mxu1 %v6993_v59  ;;  %2266 = vmatpush.bf16.msrb.mxu3 %v6994_v60 }
 0x398   :  { %2233 = vmatpush.bf16.msrb.mxu0 %v5237_v28  ;;  %2259 = vmatpush.bf16.msrb.mxu2 %v5239_v12 }
 0x39b   :  { %2241 = vmatpush.bf16.msrb.mxu1 %v6995_v50  ;;  %2267 = vmatpush.bf16.msrb.mxu3 %v6996_v31 }
 0x39c   :  { %2234 = vmatpush.bf16.msrb.mxu0 %v5248_v51  ;;  %2260 = vmatpush.bf16.msrb.mxu2 %v5250_v7 }
 0x39f   :  { %2242 = vmatpush.bf16.msrb.mxu1 %v6997_v0  ;;  %2268 = vmatpush.bf16.msrb.mxu3 %v6998_v41 }
 0x3a0   :  { %2279 = vmatpush.bf16.msra.mxu0 %v5252_v8  ;;  %2305 = vmatpush.bf16.msra.mxu2 %v5254_v15 }
 0x3a1   :  { %2235 = vmatmul.bf16.vlgmr.msrb.gmra.mxu0 %v5805_v38  ;;  %2261 = vmatmul.bf16.vlgmr.msrb.gmra.mxu2 %v5805_v38 }
 0x3a3   :  { %2243 = vmatpush.bf16.msrb.mxu1 %v7081_v47  ;;  %2269 = vmatpush.bf16.msrb.mxu3 %v7082_v53 }
 0x3a4   :  { %2280 = vmatpush.bf16.msra.mxu0 %v7080_v55  ;;  %2306 = vmatpush.bf16.msra.mxu2 %v5266_v33 }
 0x3a6   :  { %2196 = vmatmul.bf16.vlgmr.msra.gmra.mxu1 %v5833_v48  ;;  %2222 = vmatmul.bf16.vlgmr.msra.gmra.mxu3 %v5833_v48 }
 0x3a7   :  { %2244 = vmatpush.bf16.msrb.mxu1 %v7083_v13  ;;  %2270 = vmatpush.bf16.msrb.mxu3 %v7084_v18 }
 0x3a8   :  { %2281 = vmatpush.bf16.msra.mxu0 %v5275_v35  ;;  %2307 = vmatpush.bf16.msra.mxu2 %v5277_v57 }
 0x3ab   :  { %2245 = vmatpush.bf16.msrb.mxu1 %v7085_v44  ;;  %2271 = vmatpush.bf16.msrb.mxu3 %v7178_v23 }
 0x3ac   :  { %2282 = vmatpush.bf16.msra.mxu0 %v7179_v54  ;;  %2308 = vmatpush.bf16.msra.mxu2 %v7180_v22 }
 0x3af   :  { %2246 = vmatpush.bf16.msrb.mxu1 %v7181_v4  ;;  %2272 = vmatpush.bf16.msrb.mxu3 %v7182_v29 }
 0x3b0   :  { %2283 = vmatpush.bf16.msra.mxu0 %v7183_v34  ;;  %2309 = vmatpush.bf16.msra.mxu2 %v7184_v36 }
 0x3b3   :  { %2247 = vmatpush.bf16.msrb.mxu1 %v7185_v58  ;;  %2273 = vmatpush.bf16.msrb.mxu3 %v7186_v40 }
 0x3b4   :  { %2284 = vmatpush.bf16.msra.mxu0 %v7187_v26  ;;  %2310 = vmatpush.bf16.msra.mxu2 %v7188_v24 }
 0x3b6   :  { %2248 = vmatmul.bf16.vlgmr.msrb.gmra.mxu1 %v5833_v48  ;;  %2274 = vmatmul.bf16.vlgmr.msrb.gmra.mxu3 %v5833_v48 }
 0x3b7   :  { %2292 = vmatpush.bf16.msra.mxu1 %v7189_v37  ;;  %2318 = vmatpush.bf16.msra.mxu3 %v7190_v2  ;;  %v7271_v37 = vld [vmem:[#allocation67_spill] sm:$0xff] }
 0x3b8   :  { %2285 = vmatpush.bf16.msra.mxu0 %v7191_v3  ;;  %2311 = vmatpush.bf16.msra.mxu2 %v7192_v63  ;;  %v7201_v63 = vld [vmem:[#allocation100_spill] sm:$0xff]  ;;  %v7210_v3 = vld [vmem:[#allocation113_spill] sm:$0xff] }
 0x3bb   :  { %2293 = vmatpush.bf16.msra.mxu1 %v7193_v61  ;;  %2319 = vmatpush.bf16.msra.mxu3 %v7194_v20  ;;  %v7202_v61 = vld [vmem:[#allocation105_spill] sm:$0xff] }
 0x3bc   :  { %2286 = vmatpush.bf16.msra.mxu0 %v7195_v42  ;;  %2312 = vmatpush.bf16.msra.mxu2 %v7196_v46  ;;  %v7203_v20 = vld [vmem:[#allocation17_spill] sm:$0xff]  ;;  %v7204_v42 = vld [vmem:[#allocation19_spill] sm:$0xff]  ;;  %v7205_v46 = vld [vmem:[#allocation104_spill] sm:$0xff] }
 0x3bf   :  { %2294 = vmatpush.bf16.msra.mxu1 %v7197_v30  ;;  %2320 = vmatpush.bf16.msra.mxu3 %v7198_v62  ;;  %v7206_v30 = vld [vmem:[#allocation109_spill] sm:$0xff] }
 0x3c0   :  { %2447 = vmatpush.bf16.msrb.mxu0 %v7199_v14  ;;  %2473 = vmatpush.bf16.msrb.mxu2 %v7200_v6  ;;  %v7207_v62 = vld [vmem:[#allocation21_spill] sm:$0xff]  ;;  %v7208_v14 = vld [vmem:[#allocation23_spill] sm:$0xff]  ;;  %v7209_v6 = vld [vmem:[#allocation108_spill] sm:$0xff] }
 0x3c1   :  { %2287 = vmatmul.bf16.vlgmr.msra.gmra.mxu0 %v5805_v38  ;;  %2313 = vmatmul.bf16.vlgmr.msra.gmra.mxu2 %v5805_v38  ;;  %v7211_v38 = vld [vmem:[#allocation25_spill] sm:$0xff] }
 0x3c3   :  { %2295 = vmatpush.bf16.msra.mxu1 %v7201_v63  ;;  %2321 = vmatpush.bf16.msra.mxu3 %v7202_v61  ;;  %v7212_v63 = vld [vmem:[#allocation27_spill] sm:$0xff]  ;;  %v7213_v61 = vld [vmem:[#allocation112_spill] sm:$0xff] }
 0x3c4   :  { %2448 = vmatpush.bf16.msrb.mxu0 %v7203_v20  ;;  %2474 = vmatpush.bf16.msrb.mxu2 %v7204_v42  ;;  %v7214_v20 = vld [vmem:[#allocation115_spill] sm:$0xff]  ;;  %v7215_v42 = vld [vmem:[#allocation29_spill] sm:$0xff] }
 0x3c7   :  { %2296 = vmatpush.bf16.msra.mxu1 %v7205_v46  ;;  %2322 = vmatpush.bf16.msra.mxu3 %v7206_v30  ;;  %v7216_v46 = vld [vmem:[#allocation31_spill] sm:$0xff]  ;;  %v7217_v30 = vld [vmem:[#allocation114_spill] sm:$0xff] }
 0x3c8   :  { %2449 = vmatpush.bf16.msrb.mxu0 %v7207_v62  ;;  %2475 = vmatpush.bf16.msrb.mxu2 %v7208_v14  ;;  %v7218_v62 = vld [vmem:[#allocation116_spill] sm:$0xff]  ;;  %v7219_v14 = vld [vmem:[#allocation33_spill] sm:$0xff] }
 0x3cb   :  { %2297 = vmatpush.bf16.msra.mxu1 %v7209_v6  ;;  %2323 = vmatpush.bf16.msra.mxu3 %v7210_v3  ;;  %v7220_v6 = vld [vmem:[#allocation35_spill] sm:$0xff]  ;;  %v7221_v3 = vld [vmem:[#allocation10_spill] sm:$0xff] }
 0x3cc   :  { %2450 = vmatpush.bf16.msrb.mxu0 %v7211_v38  ;;  %2476 = vmatpush.bf16.msrb.mxu2 %v7212_v63  ;;  %v7222_v38 = vld [vmem:[#allocation12_spill] sm:$0xff] }
 0x3cf   :  { %2298 = vmatpush.bf16.msra.mxu1 %v7213_v61  ;;  %2324 = vmatpush.bf16.msra.mxu3 %v7214_v20  ;;  %v7223_v20 = vld [vmem:[#allocation38_spill] sm:$0xff]  ;;  %v7224_v61 = vld [vmem:[#allocation39_spill] sm:$0xff] }
 0x3d0   :  { %2451 = vmatpush.bf16.msrb.mxu0 %v7215_v42  ;;  %2477 = vmatpush.bf16.msrb.mxu2 %v7216_v46  ;;  %v7225_v46 = vld [vmem:[#allocation11_spill] sm:$0xff] }
 0x3d1   :  { %v7232_v42 = vld [vmem:[#allocation47_spill] sm:$0xff] }
 0x3d3   :  { %2299 = vmatpush.bf16.msra.mxu1 %v7217_v30  ;;  %2325 = vmatpush.bf16.msra.mxu3 %v7218_v62  ;;  %v7226_v30 = vld [vmem:[#allocation16_spill] sm:$0xff]  ;;  %v7227_v62 = vld [vmem:[#allocation43_spill] sm:$0xff] }
 0x3d4   :  { %2452 = vmatpush.bf16.msrb.mxu0 %v7219_v14  ;;  %2478 = vmatpush.bf16.msrb.mxu2 %v7220_v6  ;;  %v7228_v14 = vld [vmem:[#allocation44_spill] sm:$0xff]  ;;  %v7229_v6 = vld [vmem:[#allocation14_spill] sm:$0xff] }
 0x3d6   :  { %2300 = vmatmul.bf16.vlgmr.msra.gmra.mxu1 %v5833_v48  ;;  %2326 = vmatmul.bf16.vlgmr.msra.gmra.mxu3 %v5833_v48  ;;  %v7233_v48 = vld [vmem:[#allocation18_spill] sm:$0xff] }
 0x3d7   :  { %2460 = vmatpush.bf16.msrb.mxu1 %v7221_v3  ;;  %2486 = vmatpush.bf16.msrb.mxu3 %v7222_v38  ;;  %v7230_v3 = vld [vmem:[#allocation20_spill] sm:$0xff]  ;;  %v7231_v38 = vld [vmem:[#allocation45_spill] sm:$0xff] }
 0x3d8   :  { %2453 = vmatpush.bf16.msrb.mxu0 %v7223_v20  ;;  %2479 = vmatpush.bf16.msrb.mxu2 %v7224_v61  ;;  %v7234_v20 = vld [vmem:[#allocation24_spill] sm:$0xff]  ;;  %v7235_v61 = vld [vmem:[#allocation49_spill] sm:$0xff] }
 0x3db   :  { %2461 = vmatpush.bf16.msrb.mxu1 %v7225_v46  ;;  %2487 = vmatpush.bf16.msrb.mxu3 %v7226_v30  ;;  %v7236_v46 = vld [vmem:[#allocation51_spill] sm:$0xff]  ;;  %v7237_v30 = vld [vmem:[#allocation22_spill] sm:$0xff] }
 0x3dc   :  { %2454 = vmatpush.bf16.msrb.mxu0 %v7227_v62  ;;  %2480 = vmatpush.bf16.msrb.mxu2 %v7228_v14  ;;  %v7238_v62 = vld [vmem:[#allocation28_spill] sm:$0xff]  ;;  %v7239_v14 = vld [vmem:[#allocation53_spill] sm:$0xff] }
 0x3df   :  { %2462 = vmatpush.bf16.msrb.mxu1 %v7229_v6  ;;  %2488 = vmatpush.bf16.msrb.mxu3 %v7230_v3  ;;  %v7240_v6 = vld [vmem:[#allocation54_spill] sm:$0xff] }
 0x3e0   :  { %2499 = vmatpush.bf16.msra.mxu0 %v7231_v38  ;;  %2525 = vmatpush.bf16.msra.mxu2 %v7232_v42  ;;  %v7241_v3 = vld [vmem:[#allocation26_spill] sm:$0xff]  ;;  %v7242_v38 = vld [vmem:[#allocation32_spill] sm:$0xff]  ;;  %v7243_v42 = vld [vmem:[#allocation57_spill] sm:$0xff] }
 0x3e3   :  { %2463 = vmatpush.bf16.msrb.mxu1 %v7233_v48  ;;  %2489 = vmatpush.bf16.msrb.mxu3 %v7234_v20  ;;  %v7244_v48 = vld [vmem:[#allocation58_spill] sm:$0xff] }
 0x3e4   :  { %2500 = vmatpush.bf16.msra.mxu0 %v7235_v61  ;;  %2526 = vmatpush.bf16.msra.mxu2 %v7236_v46  ;;  %v7245_v20 = vld [vmem:[#allocation30_spill] sm:$0xff]  ;;  %v7246_v61 = vld [vmem:[#allocation36_spill] sm:$0xff]  ;;  %v7247_v46 = vld [vmem:[#allocation61_spill] sm:$0xff] }
 0x3e7   :  { %2464 = vmatpush.bf16.msrb.mxu1 %v7237_v30  ;;  %2490 = vmatpush.bf16.msrb.mxu3 %v7238_v62  ;;  %v7248_v30 = vld [vmem:[#allocation62_spill] sm:$0xff] }
 0x3e8   :  { %2501 = vmatpush.bf16.msra.mxu0 %v7239_v14  ;;  %2527 = vmatpush.bf16.msra.mxu2 %v7240_v6  ;;  %v7249_v62 = vld [vmem:[#allocation34_spill] sm:$0xff]  ;;  %v7250_v14 = vld [vmem:[#allocation40_spill] sm:$0xff]  ;;  %v7251_v6 = vld [vmem:[#allocation65_spill] sm:$0xff] }
 0x3eb   :  { %2465 = vmatpush.bf16.msrb.mxu1 %v7241_v3  ;;  %2491 = vmatpush.bf16.msrb.mxu3 %v7242_v38  ;;  %v7252_v3 = vld [vmem:[#allocation66_spill] sm:$0xff]  ;;  %v7253_v38 = vld [vmem:[#allocation37_spill] sm:$0xff] }
 0x3ec   :  { %2502 = vmatpush.bf16.msra.mxu0 %v7243_v42  ;;  %2528 = vmatpush.bf16.msra.mxu2 %v7244_v48  ;;  %v7254_v42 = vld [vmem:[#allocation42_spill] sm:$0xff] }
 0x3ed   :  { %v7255_v48 = vld [vmem:[#allocation70_spill] sm:$0xff] }
 0x3ef   :  { %2466 = vmatpush.bf16.msrb.mxu1 %v7245_v20  ;;  %2492 = vmatpush.bf16.msrb.mxu3 %v7246_v61  ;;  %v7256_v20 = vld [vmem:[#allocation71_spill] sm:$0xff]  ;;  %v7257_v61 = vld [vmem:[#allocation41_spill] sm:$0xff] }
 0x3f0   :  { %2503 = vmatpush.bf16.msra.mxu0 %v7247_v46  ;;  %2529 = vmatpush.bf16.msra.mxu2 %v7248_v30  ;;  %v7258_v46 = vld [vmem:[#allocation48_spill] sm:$0xff]  ;;  %v7259_v30 = vld [vmem:[#allocation75_spill] sm:$0xff] }
 0x3f3   :  { %2467 = vmatpush.bf16.msrb.mxu1 %v7249_v62  ;;  %2493 = vmatpush.bf16.msrb.mxu3 %v7250_v14  ;;  %v7260_v62 = vld [vmem:[#allocation76_spill] sm:$0xff]  ;;  %v7261_v14 = vld [vmem:[#allocation46_spill] sm:$0xff] }
 0x3f4   :  { %2504 = vmatpush.bf16.msra.mxu0 %v7251_v6  ;;  %2530 = vmatpush.bf16.msra.mxu2 %v7252_v3  ;;  %v7262_v6 = vld [vmem:[#allocation52_spill] sm:$0xff] }
 0x3f7   :  { %2512 = vmatpush.bf16.msra.mxu1 %v7253_v38  ;;  %2538 = vmatpush.bf16.msra.mxu3 %v7254_v42  ;;  %v7263_v38 = vld [vmem:[#allocation50_spill] sm:$0xff]  ;;  %v7264_v42 = vld [vmem:[#allocation56_spill] sm:$0xff] }
 0x3f8   :  { %2505 = vmatpush.bf16.msra.mxu0 %v7255_v48  ;;  %2531 = vmatpush.bf16.msra.mxu2 %v7256_v20  ;;  %v7265_v48 = vld [vmem:[#allocation55_spill] sm:$0xff]  ;;  %v7266_v20 = vld [vmem:[#allocation60_spill] sm:$0xff] }
 0x3fa   :  { %v2132_v3 = vpop.f32.mrf.mxu0 }
 0x3fb   :  { %2513 = vmatpush.bf16.msra.mxu1 %v7257_v61  ;;  %2539 = vmatpush.bf16.msra.mxu3 %v7258_v46  ;;  %v7267_v46 = vld [vmem:[#allocation59_spill] sm:$0xff] }
 0x3fc   :  { %2506 = vmatpush.bf16.msra.mxu0 %v7259_v30  ;;  %2532 = vmatpush.bf16.msra.mxu2 %v7260_v62  ;;  %v7268_v30 = vld [vmem:[#allocation64_spill] sm:$0xff]  ;;  %v7269_v62 = vld [vmem:[#allocation63_spill] sm:$0xff] }
 0x3ff   :  { %2514 = vmatpush.bf16.msra.mxu1 %v7261_v14  ;;  %2540 = vmatpush.bf16.msra.mxu3 %v7262_v6  ;;  %v7270_v14 = vld [vmem:[#allocation68_spill] sm:$0xff] }
 0x400   :  { %v2158_v61 = vpop.f32.mrf.mxu2 }
 0x402   :  { %v2134_v63 = vpop.f32.mrf.mxu0 }
 0x403   :  { %2515 = vmatpush.bf16.msra.mxu1 %v7263_v38  ;;  %2541 = vmatpush.bf16.msra.mxu3 %v7264_v42  ;;  %v7272_v38 = vld [vmem:[#allocation72_spill] sm:$0xff] }
 0x407   :  { %2516 = vmatpush.bf16.msra.mxu1 %v7265_v48  ;;  %2542 = vmatpush.bf16.msra.mxu3 %v7266_v20 }
 0x408   :  { %v2160_v6 = vpop.f32.mrf.mxu2 }
 0x40a   :  { %v2184_v2 = vpop.f32.mrf.mxu0 }
 0x40b   :  { %2517 = vmatpush.bf16.msra.mxu1 %v7267_v46  ;;  %2543 = vmatpush.bf16.msra.mxu3 %v7268_v30 }
 0x40f   :  { %2518 = vmatpush.bf16.msra.mxu1 %v7269_v62  ;;  %2544 = vmatpush.bf16.msra.mxu3 %v7270_v14 }
 0x410   :  { %v2210_v48 = vpop.f32.mrf.mxu2 }
 0x412   :  { %v2186_v40 = vpop.f32.mrf.mxu0 }
 0x413   :  { %2519 = vmatpush.bf16.msra.mxu1 %v7271_v37  ;;  %2545 = vmatpush.bf16.msra.mxu3 %v7272_v38  ;;  %v2145_v42 = vpop.f32.mrf.mxu1 }
 0x414   :  { %v2146_v23 = vadd.f32 %v2145_v42, %v2132_v3 }
 0x418   :  { %v2212_v63 = vpop.f32.mrf.mxu2 }
 0x419   :  { %v2171_v20 = vpop.f32.mrf.mxu3  ;;  %v2399_v63 = vld [vmem:[#allocation2 + $0x4] ss:$8 sm:$0xf] }
 0x41a   :  { %v2172_v62 = vadd.f32 %v2171_v20, %v2158_v61 }
 0x41b   :  { %v2147_v58 = vpop.f32.mrf.mxu1 }
 0x41c   :  { %v2404_v6 = vrot.slane %v2172_v62, 7 }
 0x41e   :  { %v2236_v24 = vpop.f32.mrf.mxu0  ;;  %v2407_v40 = vsel %vm1432_vm4, %v2146_v23, %v2404_v6 }
 0x421   :  { %v2173_v46 = vpop.f32.mrf.mxu3 }
 0x423   :  { %v2197_v26 = vpop.f32.mrf.mxu1 }
 0x424   :  { %v2262_v30 = vpop.f32.mrf.mxu2  ;;  %v2198_v4 = vadd.f32 %v2197_v26, %v2184_v2 }
 0x426   :  { %v2238_v29 = vpop.f32.mrf.mxu0  ;;  %v2405_v38 = vrot.slane %v2198_v4, 6 }
 0x429   :  { %v2223_v14 = vpop.f32.mrf.mxu3 }
 0x42a   :  { %v2224_v36 = vadd.f32 %v2223_v14, %v2210_v48 }
 0x42b   :  { %v2199_v34 = vpop.f32.mrf.mxu1 }
 0x42c   :  { %v2264_v37 = vpop.f32.mrf.mxu2  ;;  %v2406_v44 = vrot.slane %v2224_v36, 5 }
 0x42e   :  { %v2408_v58 = vsel %vm1434_vm5, %v2405_v38, %v2406_v44 }
 0x42f   :  { %v2409_v46 = vsel %vm1436_vm6, %v2407_v40, %v2408_v58 }
 0x430   :  { %v2411_v22 = vadd.f32 %v2409_v46, %v2399_v63 }
 0x431   :  { %v2225_v54 = vpop.f32.mrf.mxu3 }
 0x432   :  { %v4332_v29 = vmul.f32 -1.442695, %v2411_v22  ;;  %v2432_v6 = vrot.slane %v2411_v22, 3 }
 0x433   :  { %v2249_v61 = vpop.f32.mrf.mxu1 }
 0x434   :  { %4638 = vpow2.f32 %v4332_v29  ;;  %v2250_v26 = vadd.f32 %v2249_v61, %v2236_v24 }
 0x436   :  { %v2331_v2 = vadd.f32 %v2250_v26, %v7073_v9 }
 0x438   :  { %v4329_v34 = vmul.f32 -1.442695, %v2331_v2 }
 0x439   :  { %v2275_v37 = vpop.f32.mrf.mxu3 }
 0x43a   :  { %v4639_v3 = vpop.eup %4638  ;;  %4640 = vpow2.f32 %v4329_v34  ;;  %v2276_v4 = vadd.f32 %v2275_v37, %v2262_v30 }
 0x43b   :  { %v2415_v36 = vadd.f32 1.0, %v4639_v3  ;;  %v2251_v23 = vpop.f32.mrf.mxu1 }
 0x43c   :  { %v2332_v44 = vadd.f32 %v2276_v4, %v7173_v49 }
 0x43d   :  { %4642 = vrcp.f32 %v2415_v36  ;;  %v2427_v30 = vand.u32 2147483648, %v2415_v36  ;;  %v2425_v61 = vand.u32 2147483647, %v2415_v36  ;;  %vm2421_vm1 = vweird.f32 %v2415_v36 }
 0x43e   :  { %v2288_v20 = vpop.f32.mrf.mxu0  ;;  %v4330_v42 = vmul.f32 -1.442695, %v2332_v44 }
 0x43f   :  { %v2428_v34 = vor.u32 1.1754944e-38, %v2427_v30  ;;  %vm2426_vm3 = vcmp.eq.f32.partialorder %v2425_v61, 8.507059e+37 }
 0x440   :  { %v4641_v62 = vpop.eup %4640  ;;  %4644 = vpow2.f32 %v4330_v42 }
 0x441   :  { %v2277_v54 = vpop.f32.mrf.mxu3  ;;  %v5970_v14 = vadd.f32 1.0, %v4641_v62 }
 0x443   :  { %v4643_v38 = vpop.eup %4642  ;;  %4646 = vrcp.f32 %v5970_v14  ;;  %vm2352_vm9 = vweird.f32 %v5970_v14 }
 0x444   :  { %v2314_v24 = vpop.f32.mrf.mxu2  ;;  %v2417_v48 = vmul.f32 %v4643_v38, %v2415_v36  ;;  %vm2422_vm0 = vweird.f32 %v4643_v38  ;;  %4648 = vtanh.f32 %v2432_v6 }
 0x445   :  { %vm2423_vm2 = vmor %vm2421_vm1, %vm2422_vm0 }
 0x446   :  { %v2290_v40 = vpop.f32.mrf.mxu0  ;;  %v4645_v58 = vpop.eup %4644  ;;  %v2418_v63 = vsub.f32 1.0, %v2417_v48 }
 0x447   :  { %v5973_v46 = vadd.f32 1.0, %v4645_v58 }
 0x448   :  { %v2419_v29 = vmul.f32 %v4643_v38, %v2418_v63 }
 0x449   :  { %4650 = vrcp.f32 %v5973_v46  ;;  %v4647_v22 = vpop.eup %4646  ;;  %vm2367_vm10 = vweird.f32 %v5973_v46 }
 0x44a   :  { %v2420_v26 = vadd.f32 %v4643_v38, %v2419_v29  ;;  %v4649_v4 = vpop.eup %4648  ;;  %v2348_v42 = vmul.f32 %v4647_v22, %v5970_v14  ;;  %vm2353_vm7 = vweird.f32 %v4647_v22 }
 0x44b   :  { %vm5990_vm11 = vmor %vm2352_vm9, %vm2353_vm7 }
 0x44c   :  { %v2316_v2 = vpop.f32.mrf.mxu2  ;;  %v2424_v37 = vsel %vm2423_vm2, %v4643_v38, %v2420_v26  ;;  %v2349_v58 = vsub.f32 1.0, %v2348_v42 }
 0x44d   :  { %v2429_v3 = vsel %vm2426_vm3, %v2428_v34, %v2424_v37 }
 0x44e   :  { %v2436_v23 = vrot.slane %v2429_v3, 1  ;;  %v2439_v54 = vmul.f32 %v4649_v4, %v2429_v3  ;;  %v2350_v26 = vmul.f32 %v4647_v22, %v2349_v58  ;;  %v7277_v58 = vld [vmem:[#allocation118_spill] sm:$0xff] }
 0x44f   :  { %v4651_v44 = vpop.eup %4650 }
 0x450   :  { %v2438_v62 = vmul.f32 %v2436_v23, %v5790_v10  ;;  %v2363_v48 = vmul.f32 %v4651_v44, %v5973_v46  ;;  %v2442_v10 = vrot.slane %v2429_v3, 2  ;;  %vm2368_vm8 = vweird.f32 %v4651_v44 }
 0x451   :  { %v2356_v3 = vand.u32 2147483647, %v5970_v14  ;;  %vm5996_vm12 = vmor %vm2367_vm10, %vm2368_vm8 }
 0x452   :  { %v5979_v40 = vadd.f32 %v2439_v54, %v2438_v62  ;;  %v2364_v63 = vsub.f32 1.0, %v2363_v48  ;;  %v2373_v62 = vand.u32 2147483648, %v5973_v46  ;;  %v2358_v54 = vand.u32 2147483648, %v5970_v14 }
 0x453   :  { %v2301_v6 = vpop.f32.mrf.mxu1  ;;  %vm2357_vm13 = vcmp.eq.f32.partialorder %v2356_v3, 8.507059e+37 }
 0x454   :  { %v2302_v36 = vadd.f32 %v2301_v6, %v2288_v20  ;;  %4652 = vtanh.f32 %v5979_v40  ;;  %v2365_v29 = vmul.f32 %v4651_v44, %v2364_v63  ;;  %v2351_v20 = vadd.f32 %v4647_v22, %v2350_v26 }
 0x455   :  { %v2371_v6 = vand.u32 2147483647, %v5973_v46  ;;  %v2374_v14 = vor.u32 1.1754944e-38, %v2373_v62 }
 0x456   :  { %v2333_v38 = vadd.f32 %v2302_v36, %v5402_v16  ;;  %v2366_v42 = vadd.f32 %v4651_v44, %v2365_v29 }
 0x457   :  { %vm2372_vm14 = vcmp.eq.f32.partialorder %v2371_v6, 8.507059e+37 }
 0x458   :  { %v4331_v30 = vmul.f32 -1.442695, %v2333_v38  ;;  %v2355_v38 = vsel %vm5990_vm11, %v4647_v22, %v2351_v20 }
 0x459   :  { %v2327_v61 = vpop.f32.mrf.mxu3 }
 0x45a   :  { %4654 = vpow2.f32 %v4331_v30  ;;  %v2328_v2 = vadd.f32 %v2327_v61, %v2314_v24  ;;  %v4653_v37 = vpop.eup %4652  ;;  %v2370_v30 = vsel %vm5996_vm12, %v4651_v44, %v2366_v42  ;;  %v2359_v61 = vor.u32 1.1754944e-38, %v2358_v54 }
 0x45b   :  { %v2303_v34 = vpop.f32.mrf.mxu1  ;;  %v2444_v23 = vmul.f32 %v4653_v37, %v2442_v10  ;;  %v2375_v22 = vsel %vm2372_vm14, %v2374_v14, %v2370_v30  ;;  %v7280_v30 = vld [vmem:[#allocation86_spill] sm:$0xff]  ;;  %v7282_v14 = vld [vmem:[#allocation121_spill] sm:$0xff] }
 0x45c   :  { %v2334_v4 = vadd.f32 %v2328_v2, %v5411_v17  ;;  %v2360_v26 = vsel %vm2357_vm13, %v2359_v61, %v2355_v38  ;;  %v2393_v44 = vmul.f32 %v2375_v22, %v5822_v45  ;;  %v7279_v38 = vld [vmem:[#allocation83_spill] sm:$0xff]  ;;  %v7283_v61 = vld [vmem:[#allocation85_spill] sm:$0xff] }
 0x45d   :  { %v5987_v48 = vpack.c.bf16 %v2444_v23, %v2444_v23  ;;  %v7286_v22 = vld [vmem:[#allocation123_spill] sm:$0xff] }
 0x45e   :  { %4656 = vtanh.f32 %v2334_v4 }
 0x45f   :  { %2455 = vmatmul.bf16.vlgmr.msrb.gmra.mxu0 %v5987_v48  ;;  %2481 = vmatmul.bf16.vlgmr.msrb.gmra.mxu2 %v5987_v48 }
 0x460   :  { %v4655_v36 = vpop.eup %4654  ;;  %2551 = vmatpush.bf16.msrb.mxu0 %v6983_v32  ;;  %2577 = vmatpush.bf16.msrb.mxu2 %v6984_v39 }
 0x461   :  { %v2346_v63 = vadd.f32 1.0, %v4655_v36  ;;  %v2329_v29 = vpop.f32.mrf.mxu3 }
 0x462   :  { %v7281_v29 = vld [vmem:[#allocation120_spill] sm:$0xff] }
 0x463   :  { %4658 = vrcp.f32 %v2346_v63  ;;  %v2388_v23 = vand.u32 2147483648, %v2346_v63  ;;  %v2386_v42 = vand.u32 2147483647, %v2346_v63  ;;  %vm2382_vm0 = vweird.f32 %v2346_v63 }
 0x464   :  { %v4657_v46 = vpop.eup %4656  ;;  %2552 = vmatpush.bf16.msrb.mxu0 %v6985_v27  ;;  %2578 = vmatpush.bf16.msrb.mxu2 %v6986_v52 }
 0x465   :  { %v2394_v2 = vmul.f32 %v4657_v46, %v2360_v26  ;;  %v2389_v62 = vor.u32 1.1754944e-38, %v2388_v23  ;;  %vm2387_vm2 = vcmp.eq.f32.partialorder %v2386_v42, 8.507059e+37  ;;  %v7284_v46 = vld [vmem:[#allocation89_spill] sm:$0xff]  ;;  %v7285_v26 = vld [vmem:[#allocation122_spill] sm:$0xff] }
 0x466   :  { %v7292_v23 = vld [vmem:[#allocation125_spill] sm:$0xff] }
 0x467   :  { %v6011_v34 = vadd.f32 %v2394_v2, %v2393_v44  ;;  %v7287_v2 = vld [vmem:[#allocation88_spill] sm:$0xff]  ;;  %v7288_v44 = vld [vmem:[#allocation91_spill] sm:$0xff]  ;;  %v7294_v42 = vld [vmem:[#allocation97_spill] sm:$0xff] }
 0x468   :  { %2553 = vmatpush.bf16.msrb.mxu0 %v6987_v56  ;;  %2579 = vmatpush.bf16.msrb.mxu2 %v6988_v25 }
 0x469   :  { %v4659_v10 = vpop.eup %4658  ;;  %4660 = vtanh.f32 %v6011_v34 }
 0x46a   :  { %v2378_v37 = vmul.f32 %v4659_v10, %v2346_v63  ;;  %vm2383_vm15 = vweird.f32 %v4659_v10  ;;  %v7278_v63 = vld [vmem:[#allocation119_spill] sm:$0xff] }
 0x46b   :  { %vm2384_vm1 = vmor %vm2382_vm0, %vm2383_vm15 }
 0x46c   :  { %v2379_v4 = vsub.f32 1.0, %v2378_v37  ;;  %2554 = vmatpush.bf16.msrb.mxu0 %v7079_v11  ;;  %2580 = vmatpush.bf16.msrb.mxu2 %v6990_v19  ;;  %v7290_v37 = vld [vmem:[#allocation93_spill] sm:$0xff] }
 0x46e   :  { %v2380_v20 = vmul.f32 %v4659_v10, %v2379_v4  ;;  %v7291_v4 = vld [vmem:[#allocation124_spill] sm:$0xff] }
 0x46f   :  { %2507 = vmatmul.bf16.vlgmr.msra.gmra.mxu0 %v5987_v48  ;;  %2533 = vmatmul.bf16.vlgmr.msra.gmra.mxu2 %v5987_v48  ;;  %v4661_v24 = vpop.eup %4660 }
 0x470   :  { %v2381_v45 = vadd.f32 %v4659_v10, %v2380_v20  ;;  %2555 = vmatpush.bf16.msrb.mxu0 %v6991_v1  ;;  %2581 = vmatpush.bf16.msrb.mxu2 %v6992_v43  ;;  %v7293_v20 = vld [vmem:[#allocation92_spill] sm:$0xff] }
 0x472   :  { %v2385_v54 = vsel %vm2384_vm1, %v4659_v10, %v2381_v45  ;;  %v7289_v10 = vld [vmem:[#allocation90_spill] sm:$0xff] }
 0x473   :  { %v2390_v3 = vsel %vm2387_vm2, %v2389_v62, %v2385_v54  ;;  %v7295_v45 = vld [vmem:[#allocation126_spill] sm:$0xff]  ;;  %v7296_v62 = vld [vmem:[#allocation127_spill] sm:$0xff]  ;;  %v7297_v54 = vld [vmem:[#allocation13_spill] sm:$0xff] }
 0x474   :  { %v2397_v6 = vmul.f32 %v4661_v24, %v2390_v3  ;;  %2556 = vmatpush.bf16.msrb.mxu0 %v5225_v5  ;;  %2582 = vmatpush.bf16.msrb.mxu2 %v5227_v21  ;;  %v7298_v24 = vld [vmem:[#allocation15_spill] sm:$0xff]  ;;  %v7299_v3 = vld [vmem:[#allocation96_spill] sm:$0xff] }
 0x476   :  { %v6022_v36 = vpack.c.bf16 %v2397_v6, %v2397_v6  ;;  %v7300_v6 = vld [vmem:[#allocation101_spill] sm:$0xff] }
 0x478   :  { %2468 = vmatmul.bf16.vlgmr.msrb.gmra.mxu1 %v6022_v36  ;;  %2494 = vmatmul.bf16.vlgmr.msrb.gmra.mxu3 %v6022_v36 }
 0x479   :  { %2564 = vmatpush.bf16.msrb.mxu1 %v6993_v59  ;;  %2590 = vmatpush.bf16.msrb.mxu3 %v6994_v60 }
 0x47a   :  { %2557 = vmatpush.bf16.msrb.mxu0 %v5237_v28  ;;  %2583 = vmatpush.bf16.msrb.mxu2 %v5239_v12 }
 0x47d   :  { %2565 = vmatpush.bf16.msrb.mxu1 %v6995_v50  ;;  %2591 = vmatpush.bf16.msrb.mxu3 %v6996_v31 }
 0x47e   :  { %2558 = vmatpush.bf16.msrb.mxu0 %v5248_v51  ;;  %2584 = vmatpush.bf16.msrb.mxu2 %v5250_v7 }
 0x481   :  { %2566 = vmatpush.bf16.msrb.mxu1 %v6997_v0  ;;  %2592 = vmatpush.bf16.msrb.mxu3 %v6998_v41 }
 0x482   :  { %2603 = vmatpush.bf16.msra.mxu0 %v5252_v8  ;;  %2629 = vmatpush.bf16.msra.mxu2 %v5254_v15 }
 0x483   :  { %2559 = vmatmul.bf16.vlgmr.msrb.gmra.mxu0 %v5987_v48  ;;  %2585 = vmatmul.bf16.vlgmr.msrb.gmra.mxu2 %v5987_v48 }
 0x485   :  { %2567 = vmatpush.bf16.msrb.mxu1 %v7081_v47  ;;  %2593 = vmatpush.bf16.msrb.mxu3 %v7082_v53 }
 0x486   :  { %2604 = vmatpush.bf16.msra.mxu0 %v7080_v55  ;;  %2630 = vmatpush.bf16.msra.mxu2 %v5266_v33 }
 0x488   :  { %2520 = vmatmul.bf16.vlgmr.msra.gmra.mxu1 %v6022_v36  ;;  %2546 = vmatmul.bf16.vlgmr.msra.gmra.mxu3 %v6022_v36 }
 0x489   :  { %2568 = vmatpush.bf16.msrb.mxu1 %v7083_v13  ;;  %2594 = vmatpush.bf16.msrb.mxu3 %v7084_v18 }
 0x48a   :  { %2605 = vmatpush.bf16.msra.mxu0 %v5275_v35  ;;  %2631 = vmatpush.bf16.msra.mxu2 %v5277_v57 }
 0x48d   :  { %2569 = vmatpush.bf16.msrb.mxu1 %v7279_v38  ;;  %2595 = vmatpush.bf16.msrb.mxu3 %v7280_v30 }
 0x48e   :  { %2606 = vmatpush.bf16.msra.mxu0 %v7277_v58  ;;  %2632 = vmatpush.bf16.msra.mxu2 %v7278_v63 }
 0x491   :  { %2570 = vmatpush.bf16.msrb.mxu1 %v7283_v61  ;;  %2596 = vmatpush.bf16.msrb.mxu3 %v7284_v46 }
 0x492   :  { %2607 = vmatpush.bf16.msra.mxu0 %v7281_v29  ;;  %2633 = vmatpush.bf16.msra.mxu2 %v7282_v14 }
 0x495   :  { %2571 = vmatpush.bf16.msrb.mxu1 %v7287_v2  ;;  %2597 = vmatpush.bf16.msrb.mxu3 %v7288_v44 }
 0x496   :  { %2608 = vmatpush.bf16.msra.mxu0 %v7285_v26  ;;  %2634 = vmatpush.bf16.msra.mxu2 %v7286_v22 }
 0x498   :  { %2572 = vmatmul.bf16.vlgmr.msrb.gmra.mxu1 %v6022_v36  ;;  %2598 = vmatmul.bf16.vlgmr.msrb.gmra.mxu3 %v6022_v36 }
 0x499   :  { %2616 = vmatpush.bf16.msra.mxu1 %v7289_v10  ;;  %2642 = vmatpush.bf16.msra.mxu3 %v7290_v37  ;;  %v7371_v37 = vld [vmem:[#allocation67_spill] sm:$0xff] }
 0x49a   :  { %2609 = vmatpush.bf16.msra.mxu0 %v7291_v4  ;;  %2635 = vmatpush.bf16.msra.mxu2 %v7292_v23  ;;  %v7301_v23 = vld [vmem:[#allocation17_spill] sm:$0xff]  ;;  %v7310_v4 = vld [vmem:[#allocation27_spill] sm:$0xff] }
 0x49d   :  { %2617 = vmatpush.bf16.msra.mxu1 %v7293_v20  ;;  %2643 = vmatpush.bf16.msra.mxu3 %v7294_v42  ;;  %v7302_v20 = vld [vmem:[#allocation19_spill] sm:$0xff]  ;;  %v7303_v42 = vld [vmem:[#allocation100_spill] sm:$0xff] }
 0x49e   :  { %2610 = vmatpush.bf16.msra.mxu0 %v7295_v45  ;;  %2636 = vmatpush.bf16.msra.mxu2 %v7296_v62  ;;  %v7304_v45 = vld [vmem:[#allocation105_spill] sm:$0xff] }
 0x49f   :  { %v7305_v62 = vld [vmem:[#allocation21_spill] sm:$0xff] }
 0x4a1   :  { %2618 = vmatpush.bf16.msra.mxu1 %v7299_v3  ;;  %2644 = vmatpush.bf16.msra.mxu3 %v7300_v6  ;;  %v7308_v3 = vld [vmem:[#allocation109_spill] sm:$0xff] }
 0x4a2   :  { %2771 = vmatpush.bf16.msrb.mxu0 %v7297_v54  ;;  %2797 = vmatpush.bf16.msrb.mxu2 %v7298_v24  ;;  %v7306_v54 = vld [vmem:[#allocation23_spill] sm:$0xff]  ;;  %v7307_v24 = vld [vmem:[#allocation104_spill] sm:$0xff]  ;;  %v7309_v6 = vld [vmem:[#allocation25_spill] sm:$0xff] }
 0x4a3   :  { %2611 = vmatmul.bf16.vlgmr.msra.gmra.mxu0 %v5987_v48  ;;  %2637 = vmatmul.bf16.vlgmr.msra.gmra.mxu2 %v5987_v48  ;;  %v7311_v48 = vld [vmem:[#allocation108_spill] sm:$0xff] }
 0x4a5   :  { %2619 = vmatpush.bf16.msra.mxu1 %v7303_v42  ;;  %2645 = vmatpush.bf16.msra.mxu3 %v7304_v45  ;;  %v7314_v42 = vld [vmem:[#allocation31_spill] sm:$0xff]  ;;  %v7315_v45 = vld [vmem:[#allocation112_spill] sm:$0xff] }
 0x4a6   :  { %2772 = vmatpush.bf16.msrb.mxu0 %v7301_v23  ;;  %2798 = vmatpush.bf16.msrb.mxu2 %v7302_v20  ;;  %v7312_v23 = vld [vmem:[#allocation113_spill] sm:$0xff] }
 0x4a7   :  { %v7313_v20 = vld [vmem:[#allocation29_spill] sm:$0xff] }
 0x4a9   :  { %2620 = vmatpush.bf16.msra.mxu1 %v7307_v24  ;;  %2646 = vmatpush.bf16.msra.mxu3 %v7308_v3  ;;  %v7318_v24 = vld [vmem:[#allocation35_spill] sm:$0xff]  ;;  %v7319_v3 = vld [vmem:[#allocation114_spill] sm:$0xff] }
 0x4aa   :  { %2773 = vmatpush.bf16.msrb.mxu0 %v7305_v62  ;;  %2799 = vmatpush.bf16.msrb.mxu2 %v7306_v54  ;;  %v7316_v62 = vld [vmem:[#allocation115_spill] sm:$0xff]  ;;  %v7317_v54 = vld [vmem:[#allocation33_spill] sm:$0xff] }
 0x4ad   :  { %2621 = vmatpush.bf16.msra.mxu1 %v7311_v48  ;;  %2647 = vmatpush.bf16.msra.mxu3 %v7312_v23  ;;  %v7322_v48 = vld [vmem:[#allocation12_spill] sm:$0xff]  ;;  %v7323_v23 = vld [vmem:[#allocation38_spill] sm:$0xff] }
 0x4ae   :  { %2774 = vmatpush.bf16.msrb.mxu0 %v7309_v6  ;;  %2800 = vmatpush.bf16.msrb.mxu2 %v7310_v4  ;;  %v7320_v6 = vld [vmem:[#allocation116_spill] sm:$0xff]  ;;  %v7321_v4 = vld [vmem:[#allocation10_spill] sm:$0xff] }
 0x4b1   :  { %2622 = vmatpush.bf16.msra.mxu1 %v7315_v45  ;;  %2648 = vmatpush.bf16.msra.mxu3 %v7316_v62  ;;  %v7334_v62 = vld [vmem:[#allocation51_spill] sm:$0xff] }
 0x4b2   :  { %2775 = vmatpush.bf16.msrb.mxu0 %v7313_v20  ;;  %2801 = vmatpush.bf16.msrb.mxu2 %v7314_v42  ;;  %v7324_v20 = vld [vmem:[#allocation39_spill] sm:$0xff] }
 0x4b3   :  { %v7325_v42 = vld [vmem:[#allocation11_spill] sm:$0xff] }
 0x4b4   :  { %v7367_v45 = vld [vmem:[#allocation59_spill] sm:$0xff] }
 0x4b5   :  { %2623 = vmatpush.bf16.msra.mxu1 %v7319_v3  ;;  %2649 = vmatpush.bf16.msra.mxu3 %v7320_v6  ;;  %v7328_v3 = vld [vmem:[#allocation44_spill] sm:$0xff]  ;;  %v7329_v6 = vld [vmem:[#allocation45_spill] sm:$0xff] }
 0x4b6   :  { %2776 = vmatpush.bf16.msrb.mxu0 %v7317_v54  ;;  %2802 = vmatpush.bf16.msrb.mxu2 %v7318_v24  ;;  %v7326_v54 = vld [vmem:[#allocation16_spill] sm:$0xff]  ;;  %v7327_v24 = vld [vmem:[#allocation43_spill] sm:$0xff] }
 0x4b8   :  { %2624 = vmatmul.bf16.vlgmr.msra.gmra.mxu1 %v6022_v36  ;;  %2650 = vmatmul.bf16.vlgmr.msra.gmra.mxu3 %v6022_v36  ;;  %v7335_v36 = vld [vmem:[#allocation18_spill] sm:$0xff] }
 0x4b9   :  { %2784 = vmatpush.bf16.msrb.mxu1 %v7321_v4  ;;  %2810 = vmatpush.bf16.msrb.mxu3 %v7322_v48  ;;  %v7330_v4 = vld [vmem:[#allocation47_spill] sm:$0xff]  ;;  %v7331_v48 = vld [vmem:[#allocation14_spill] sm:$0xff] }
 0x4ba   :  { %2777 = vmatpush.bf16.msrb.mxu0 %v7323_v23  ;;  %2803 = vmatpush.bf16.msrb.mxu2 %v7324_v20  ;;  %v7332_v23 = vld [vmem:[#allocation20_spill] sm:$0xff]  ;;  %v7333_v20 = vld [vmem:[#allocation49_spill] sm:$0xff] }
 0x4bd   :  { %2785 = vmatpush.bf16.msrb.mxu1 %v7325_v42  ;;  %2811 = vmatpush.bf16.msrb.mxu3 %v7326_v54  ;;  %v7336_v42 = vld [vmem:[#allocation24_spill] sm:$0xff]  ;;  %v7337_v54 = vld [vmem:[#allocation53_spill] sm:$0xff] }
 0x4be   :  { %2778 = vmatpush.bf16.msrb.mxu0 %v7327_v24  ;;  %2804 = vmatpush.bf16.msrb.mxu2 %v7328_v3  ;;  %v7338_v24 = vld [vmem:[#allocation54_spill] sm:$0xff] }
 0x4bf   :  { %v7339_v3 = vld [vmem:[#allocation22_spill] sm:$0xff] }
 0x4c1   :  { %2786 = vmatpush.bf16.msrb.mxu1 %v7331_v48  ;;  %2812 = vmatpush.bf16.msrb.mxu3 %v7332_v23  ;;  %v7342_v48 = vld [vmem:[#allocation58_spill] sm:$0xff] }
 0x4c2   :  { %2823 = vmatpush.bf16.msra.mxu0 %v7329_v6  ;;  %2849 = vmatpush.bf16.msra.mxu2 %v7330_v4  ;;  %v7340_v6 = vld [vmem:[#allocation28_spill] sm:$0xff]  ;;  %v7341_v4 = vld [vmem:[#allocation57_spill] sm:$0xff]  ;;  %v7343_v23 = vld [vmem:[#allocation26_spill] sm:$0xff] }
 0x4c5   :  { %2787 = vmatpush.bf16.msrb.mxu1 %v7335_v36  ;;  %2813 = vmatpush.bf16.msrb.mxu3 %v7336_v42  ;;  %v7346_v36 = vld [vmem:[#allocation62_spill] sm:$0xff] }
 0x4c6   :  { %2824 = vmatpush.bf16.msra.mxu0 %v7333_v20  ;;  %2850 = vmatpush.bf16.msra.mxu2 %v7334_v62  ;;  %v7344_v20 = vld [vmem:[#allocation32_spill] sm:$0xff]  ;;  %v7345_v62 = vld [vmem:[#allocation61_spill] sm:$0xff]  ;;  %v7347_v42 = vld [vmem:[#allocation30_spill] sm:$0xff] }
 0x4c9   :  { %2788 = vmatpush.bf16.msrb.mxu1 %v7339_v3  ;;  %2814 = vmatpush.bf16.msrb.mxu3 %v7340_v6  ;;  %v7350_v3 = vld [vmem:[#allocation66_spill] sm:$0xff] }
 0x4ca   :  { %2825 = vmatpush.bf16.msra.mxu0 %v7337_v54  ;;  %2851 = vmatpush.bf16.msra.mxu2 %v7338_v24  ;;  %v7348_v54 = vld [vmem:[#allocation36_spill] sm:$0xff]  ;;  %v7349_v24 = vld [vmem:[#allocation65_spill] sm:$0xff]  ;;  %v7351_v6 = vld [vmem:[#allocation34_spill] sm:$0xff] }
 0x4cd   :  { %2789 = vmatpush.bf16.msrb.mxu1 %v7343_v23  ;;  %2815 = vmatpush.bf16.msrb.mxu3 %v7344_v20  ;;  %v7354_v23 = vld [vmem:[#allocation42_spill] sm:$0xff] }
 0x4ce   :  { %2826 = vmatpush.bf16.msra.mxu0 %v7341_v4  ;;  %2852 = vmatpush.bf16.msra.mxu2 %v7342_v48  ;;  %v7352_v4 = vld [vmem:[#allocation40_spill] sm:$0xff]  ;;  %v7353_v48 = vld [vmem:[#allocation37_spill] sm:$0xff]  ;;  %v7355_v20 = vld [vmem:[#allocation70_spill] sm:$0xff] }
 0x4d1   :  { %2790 = vmatpush.bf16.msrb.mxu1 %v7347_v42  ;;  %2816 = vmatpush.bf16.msrb.mxu3 %v7348_v54  ;;  %v7358_v42 = vld [vmem:[#allocation48_spill] sm:$0xff]  ;;  %v7359_v54 = vld [vmem:[#allocation75_spill] sm:$0xff] }
 0x4d2   :  { %2827 = vmatpush.bf16.msra.mxu0 %v7345_v62  ;;  %2853 = vmatpush.bf16.msra.mxu2 %v7346_v36  ;;  %v7356_v62 = vld [vmem:[#allocation71_spill] sm:$0xff]  ;;  %v7357_v36 = vld [vmem:[#allocation41_spill] sm:$0xff] }
 0x4d5   :  { %2791 = vmatpush.bf16.msrb.mxu1 %v7351_v6  ;;  %2817 = vmatpush.bf16.msrb.mxu3 %v7352_v4  ;;  %v7362_v6 = vld [vmem:[#allocation52_spill] sm:$0xff]  ;;  %v7363_v4 = vld [vmem:[#allocation50_spill] sm:$0xff] }
 0x4d6   :  { %2828 = vmatpush.bf16.msra.mxu0 %v7349_v24  ;;  %2854 = vmatpush.bf16.msra.mxu2 %v7350_v3  ;;  %v7360_v24 = vld [vmem:[#allocation76_spill] sm:$0xff]  ;;  %v7361_v3 = vld [vmem:[#allocation46_spill] sm:$0xff] }
 0x4d9   :  { %2836 = vmatpush.bf16.msra.mxu1 %v7353_v48  ;;  %2862 = vmatpush.bf16.msra.mxu3 %v7354_v23  ;;  %v7364_v48 = vld [vmem:[#allocation56_spill] sm:$0xff] }
 0x4da   :  { %2829 = vmatpush.bf16.msra.mxu0 %v7355_v20  ;;  %2855 = vmatpush.bf16.msra.mxu2 %v7356_v62  ;;  %v7365_v20 = vld [vmem:[#allocation55_spill] sm:$0xff]  ;;  %v7366_v62 = vld [vmem:[#allocation60_spill] sm:$0xff] }
 0x4dc   :  { %v2456_v23 = vpop.f32.mrf.mxu0 }
 0x4dd   :  { %2837 = vmatpush.bf16.msra.mxu1 %v7357_v36  ;;  %2863 = vmatpush.bf16.msra.mxu3 %v7358_v42  ;;  %v7368_v42 = vld [vmem:[#allocation64_spill] sm:$0xff] }
 0x4de   :  { %2830 = vmatpush.bf16.msra.mxu0 %v7359_v54  ;;  %2856 = vmatpush.bf16.msra.mxu2 %v7360_v24  ;;  %v7369_v24 = vld [vmem:[#allocation63_spill] sm:$0xff] }
 0x4e1   :  { %2838 = vmatpush.bf16.msra.mxu1 %v7361_v3  ;;  %2864 = vmatpush.bf16.msra.mxu3 %v7362_v6  ;;  %v7370_v3 = vld [vmem:[#allocation68_spill] sm:$0xff] }
 0x4e2   :  { %v2482_v36 = vpop.f32.mrf.mxu2 }
 0x4e4   :  { %v2458_v54 = vpop.f32.mrf.mxu0 }
 0x4e5   :  { %2839 = vmatpush.bf16.msra.mxu1 %v7363_v4  ;;  %2865 = vmatpush.bf16.msra.mxu3 %v7364_v48  ;;  %v7372_v4 = vld [vmem:[#allocation72_spill] sm:$0xff] }
 0x4e9   :  { %2840 = vmatpush.bf16.msra.mxu1 %v7365_v20  ;;  %2866 = vmatpush.bf16.msra.mxu3 %v7366_v62 }
 0x4ea   :  { %v2484_v6 = vpop.f32.mrf.mxu2 }
 0x4ec   :  { %v2508_v48 = vpop.f32.mrf.mxu0 }
 0x4ed   :  { %2841 = vmatpush.bf16.msra.mxu1 %v7367_v45  ;;  %2867 = vmatpush.bf16.msra.mxu3 %v7368_v42 }
 0x4f1   :  { %2842 = vmatpush.bf16.msra.mxu1 %v7369_v24  ;;  %2868 = vmatpush.bf16.msra.mxu3 %v7370_v3 }
 0x4f2   :  { %v2534_v10 = vpop.f32.mrf.mxu2 }
 0x4f4   :  { %v2510_v22 = vpop.f32.mrf.mxu0 }
 0x4f5   :  { %2843 = vmatpush.bf16.msra.mxu1 %v7371_v37  ;;  %2869 = vmatpush.bf16.msra.mxu3 %v7372_v4  ;;  %v2469_v20 = vpop.f32.mrf.mxu1 }
 0x4f6   :  { %v2470_v4 = vadd.f32 %v2469_v20, %v2456_v23 }
 0x4fa   :  { %v2536_v26 = vpop.f32.mrf.mxu2 }
 0x4fb   :  { %v2495_v62 = vpop.f32.mrf.mxu3 }
 0x4fc   :  { %v2496_v24 = vadd.f32 %v2495_v62, %v2482_v36 }
 0x4fd   :  { %v2471_v44 = vpop.f32.mrf.mxu1 }
 0x4fe   :  { %v2728_v6 = vrot.slane %v2496_v24, 7  ;;  %v2723_v44 = vld [vmem:[#allocation2 + $0x5] ss:$8 sm:$0xf] }
 0x500   :  { %v2560_v45 = vpop.f32.mrf.mxu0  ;;  %v2731_v22 = vsel %vm1432_vm4, %v2470_v4, %v2728_v6 }
 0x503   :  { %v2497_v2 = vpop.f32.mrf.mxu3 }
 0x505   :  { %v2521_v42 = vpop.f32.mrf.mxu1 }
 0x506   :  { %v2586_v54 = vpop.f32.mrf.mxu2  ;;  %v2522_v29 = vadd.f32 %v2521_v42, %v2508_v48 }
 0x508   :  { %v2562_v14 = vpop.f32.mrf.mxu0  ;;  %v2729_v63 = vrot.slane %v2522_v29, 6 }
 0x50b   :  { %v2547_v3 = vpop.f32.mrf.mxu3 }
 0x50c   :  { %v2548_v46 = vadd.f32 %v2547_v3, %v2534_v10 }
 0x50d   :  { %v2523_v37 = vpop.f32.mrf.mxu1 }
 0x50e   :  { %v2588_v61 = vpop.f32.mrf.mxu2  ;;  %v2730_v58 = vrot.slane %v2548_v46, 5 }
 0x510   :  { %v2732_v26 = vsel %vm1434_vm5, %v2729_v63, %v2730_v58 }
 0x511   :  { %v2733_v2 = vsel %vm1436_vm6, %v2731_v22, %v2732_v26 }
 0x512   :  { %v2735_v30 = vadd.f32 %v2733_v2, %v2723_v44 }
 0x513   :  { %v2549_v38 = vpop.f32.mrf.mxu3 }
 0x514   :  { %v4336_v14 = vmul.f32 -1.442695, %v2735_v30  ;;  %v2756_v22 = vrot.slane %v2735_v30, 3 }
 0x515   :  { %v2573_v62 = vpop.f32.mrf.mxu1 }
 0x516   :  { %4662 = vpow2.f32 %v4336_v14  ;;  %v2574_v42 = vadd.f32 %v2573_v62, %v2560_v45 }
 0x518   :  { %v2655_v10 = vadd.f32 %v2574_v42, %v7073_v9 }
 0x51a   :  { %v4333_v37 = vmul.f32 -1.442695, %v2655_v10 }
 0x51b   :  { %v2599_v61 = vpop.f32.mrf.mxu3 }
 0x51c   :  { %v4663_v23 = vpop.eup %4662  ;;  %4664 = vpow2.f32 %v4333_v37  ;;  %v2600_v29 = vadd.f32 %v2599_v61, %v2586_v54 }
 0x51d   :  { %v2739_v4 = vadd.f32 1.0, %v4663_v23  ;;  %v2575_v20 = vpop.f32.mrf.mxu1 }
 0x51e   :  { %v2656_v58 = vadd.f32 %v2600_v29, %v7173_v49 }
 0x51f   :  { %4666 = vrcp.f32 %v2739_v4  ;;  %v2751_v44 = vand.u32 2147483648, %v2739_v4  ;;  %v2749_v62 = vand.u32 2147483647, %v2739_v4  ;;  %vm2745_vm7 = vweird.f32 %v2739_v4 }
 0x520   :  { %v2612_v46 = vpop.f32.mrf.mxu0  ;;  %v4334_v63 = vmul.f32 -1.442695, %v2656_v58 }
 0x521   :  { %v2752_v61 = vor.u32 1.1754944e-38, %v2751_v44  ;;  %vm2750_vm9 = vcmp.eq.f32.partialorder %v2749_v62, 8.507059e+37 }
 0x522   :  { %v4665_v24 = vpop.eup %4664  ;;  %4668 = vpow2.f32 %v4334_v63 }
 0x523   :  { %v6159_v3 = vadd.f32 1.0, %v4665_v24  ;;  %v2601_v45 = vpop.f32.mrf.mxu3 }
 0x525   :  { %v4667_v36 = vpop.eup %4666  ;;  %4670 = vrcp.f32 %v6159_v3  ;;  %vm2676_vm12 = vweird.f32 %v6159_v3 }
 0x526   :  { %v2638_v38 = vpop.f32.mrf.mxu2  ;;  %v2741_v6 = vmul.f32 %v4667_v36, %v2739_v4  ;;  %vm2746_vm3 = vweird.f32 %v4667_v36  ;;  %4672 = vtanh.f32 %v2756_v22 }
 0x527   :  { %vm2747_vm8 = vmor %vm2745_vm7, %vm2746_vm3 }
 0x528   :  { %v2614_v48 = vpop.f32.mrf.mxu0  ;;  %v4669_v54 = vpop.eup %4668  ;;  %v2742_v26 = vsub.f32 1.0, %v2741_v6 }
 0x529   :  { %v6162_v2 = vadd.f32 1.0, %v4669_v54 }
 0x52a   :  { %v2743_v14 = vmul.f32 %v4667_v36, %v2742_v26 }
 0x52b   :  { %4674 = vrcp.f32 %v6162_v2  ;;  %v4671_v37 = vpop.eup %4670  ;;  %vm2691_vm13 = vweird.f32 %v6162_v2 }
 0x52c   :  { %v2744_v10 = vadd.f32 %v4667_v36, %v2743_v14  ;;  %v4673_v29 = vpop.eup %4672  ;;  %v2672_v58 = vmul.f32 %v4671_v37, %v6159_v3  ;;  %vm2677_vm10 = vweird.f32 %v4671_v37 }
 0x52d   :  { %vm6177_vm14 = vmor %vm2676_vm12, %vm2677_vm10 }
 0x52e   :  { %v2640_v42 = vpop.f32.mrf.mxu2  ;;  %v2748_v30 = vsel %vm2747_vm8, %v4667_v36, %v2744_v10  ;;  %v2673_v4 = vsub.f32 1.0, %v2672_v58 }
 0x52f   :  { %v2753_v23 = vsel %vm2750_vm9, %v2752_v61, %v2748_v30 }
 0x530   :  { %v2760_v20 = vrot.slane %v2753_v23, 1  ;;  %v2763_v45 = vmul.f32 %v4673_v29, %v2753_v23  ;;  %v2674_v42 = vmul.f32 %v4671_v37, %v2673_v4  ;;  %v2766_v61 = vrot.slane %v2753_v23, 2  ;;  %v7377_v4 = vld [vmem:[#allocation83_spill] sm:$0xff] }
 0x531   :  { %v4675_v63 = vpop.eup %4674  ;;  %v2680_v23 = vand.u32 2147483647, %v6159_v3 }
 0x532   :  { %v2762_v24 = vmul.f32 %v2760_v20, %v5979_v40  ;;  %v2687_v48 = vmul.f32 %v4675_v63, %v6162_v2  ;;  %vm2692_vm11 = vweird.f32 %v4675_v63  ;;  %v2675_v29 = vadd.f32 %v4671_v37, %v2674_v42 }
 0x533   :  { %vm6185_vm15 = vmor %vm2691_vm13, %vm2692_vm11  ;;  %vm2681_vm0 = vcmp.eq.f32.partialorder %v2680_v23, 8.507059e+37 }
 0x534   :  { %v6168_v54 = vadd.f32 %v2763_v45, %v2762_v24  ;;  %v2688_v26 = vsub.f32 1.0, %v2687_v48  ;;  %v2697_v24 = vand.u32 2147483648, %v6162_v2  ;;  %v2682_v45 = vand.u32 2147483648, %v6159_v3 }
 0x535   :  { %v2625_v6 = vpop.f32.mrf.mxu1  ;;  %v2695_v48 = vand.u32 2147483647, %v6162_v2 }
 0x536   :  { %v2626_v22 = vadd.f32 %v2625_v6, %v2612_v46  ;;  %4676 = vtanh.f32 %v6168_v54  ;;  %v2689_v14 = vmul.f32 %v4675_v63, %v2688_v26  ;;  %v2683_v42 = vor.u32 1.1754944e-38, %v2682_v45 }
 0x537   :  { %vm2696_vm1 = vcmp.eq.f32.partialorder %v2695_v48, 8.507059e+37 }
 0x538   :  { %v2657_v36 = vadd.f32 %v2626_v22, %v5402_v16  ;;  %v2690_v20 = vadd.f32 %v4675_v63, %v2689_v14 }
 0x53a   :  { %v4335_v44 = vmul.f32 -1.442695, %v2657_v36  ;;  %v2679_v36 = vsel %vm6177_vm14, %v4671_v37, %v2675_v29 }
 0x53b   :  { %v2651_v62 = vpop.f32.mrf.mxu3  ;;  %v2684_v2 = vsel %vm2681_vm0, %v2683_v42, %v2679_v36  ;;  %v7379_v36 = vld [vmem:[#allocation118_spill] sm:$0xff]  ;;  %v7383_v42 = vld [vmem:[#allocation120_spill] sm:$0xff] }
 0x53c   :  { %4678 = vpow2.f32 %v4335_v44  ;;  %v2652_v10 = vadd.f32 %v2651_v62, %v2638_v38  ;;  %v4677_v46 = vpop.eup %4676  ;;  %v2694_v44 = vsel %vm6185_vm15, %v4675_v63, %v2690_v20  ;;  %v2698_v62 = vor.u32 1.1754944e-38, %v2697_v24 }
 0x53d   :  { %v2627_v40 = vpop.f32.mrf.mxu1  ;;  %v2768_v58 = vmul.f32 %v4677_v46, %v2766_v61 }
 0x53e   :  { %v2658_v30 = vadd.f32 %v2652_v10, %v5411_v17  ;;  %v2699_v37 = vsel %vm2696_vm1, %v2698_v62, %v2694_v44  ;;  %v7380_v44 = vld [vmem:[#allocation119_spill] sm:$0xff]  ;;  %v7382_v62 = vld [vmem:[#allocation89_spill] sm:$0xff] }
 0x53f   :  { %v6183_v22 = vpack.c.bf16 %v2768_v58, %v2768_v58  ;;  %v2717_v63 = vmul.f32 %v2699_v37, %v6011_v34  ;;  %v7386_v37 = vld [vmem:[#allocation91_spill] sm:$0xff] }
 0x540   :  { %4680 = vtanh.f32 %v2658_v30 }
 0x541   :  { %2779 = vmatmul.bf16.vlgmr.msrb.gmra.mxu0 %v6183_v22  ;;  %2805 = vmatmul.bf16.vlgmr.msrb.gmra.mxu2 %v6183_v22 }
 0x542   :  { %v4679_v6 = vpop.eup %4678  ;;  %2875 = vmatpush.bf16.msrb.mxu0 %v6983_v32  ;;  %2901 = vmatpush.bf16.msrb.mxu2 %v6984_v39 }
 0x543   :  { %v2670_v26 = vadd.f32 1.0, %v4679_v6  ;;  %v2653_v14 = vpop.f32.mrf.mxu3 }
 0x544   :  { %v7381_v14 = vld [vmem:[#allocation85_spill] sm:$0xff] }
 0x545   :  { %4682 = vrcp.f32 %v2670_v26  ;;  %v2712_v29 = vand.u32 2147483648, %v2670_v26  ;;  %v2710_v58 = vand.u32 2147483647, %v2670_v26  ;;  %vm2706_vm3 = vweird.f32 %v2670_v26 }
 0x546   :  { %v4681_v3 = vpop.eup %4680  ;;  %2876 = vmatpush.bf16.msrb.mxu0 %v6985_v27  ;;  %2902 = vmatpush.bf16.msrb.mxu2 %v6986_v52 }
 0x547   :  { %v2718_v10 = vmul.f32 %v4681_v3, %v2684_v2  ;;  %v2713_v24 = vor.u32 1.1754944e-38, %v2712_v29  ;;  %vm2711_vm8 = vcmp.eq.f32.partialorder %v2710_v58, 8.507059e+37  ;;  %v7384_v3 = vld [vmem:[#allocation121_spill] sm:$0xff]  ;;  %v7385_v2 = vld [vmem:[#allocation88_spill] sm:$0xff] }
 0x548   :  { %v7392_v29 = vld [vmem:[#allocation125_spill] sm:$0xff] }
 0x549   :  { %v6200_v61 = vadd.f32 %v2718_v10, %v2717_v63  ;;  %v7387_v10 = vld [vmem:[#allocation122_spill] sm:$0xff]  ;;  %v7388_v63 = vld [vmem:[#allocation123_spill] sm:$0xff]  ;;  %v7394_v58 = vld [vmem:[#allocation97_spill] sm:$0xff] }
 0x54a   :  { %2877 = vmatpush.bf16.msrb.mxu0 %v6987_v56  ;;  %2903 = vmatpush.bf16.msrb.mxu2 %v6988_v25 }
 0x54b   :  { %v4683_v40 = vpop.eup %4682  ;;  %4684 = vtanh.f32 %v6200_v61 }
 0x54c   :  { %v2702_v30 = vmul.f32 %v4683_v40, %v2670_v26  ;;  %vm2707_vm2 = vweird.f32 %v4683_v40  ;;  %v7378_v26 = vld [vmem:[#allocation86_spill] sm:$0xff] }
 0x54d   :  { %vm2708_vm7 = vmor %vm2706_vm3, %vm2707_vm2 }
 0x54e   :  { %v2703_v46 = vsub.f32 1.0, %v2702_v30  ;;  %2878 = vmatpush.bf16.msrb.mxu0 %v7079_v11  ;;  %2904 = vmatpush.bf16.msrb.mxu2 %v6990_v19  ;;  %v7390_v30 = vld [vmem:[#allocation93_spill] sm:$0xff] }
 0x550   :  { %v2704_v20 = vmul.f32 %v4683_v40, %v2703_v46  ;;  %v7391_v46 = vld [vmem:[#allocation124_spill] sm:$0xff] }
 0x551   :  { %2831 = vmatmul.bf16.vlgmr.msra.gmra.mxu0 %v6183_v22  ;;  %2857 = vmatmul.bf16.vlgmr.msra.gmra.mxu2 %v6183_v22  ;;  %v4685_v38 = vpop.eup %4684 }
 0x552   :  { %v2705_v34 = vadd.f32 %v4683_v40, %v2704_v20  ;;  %2879 = vmatpush.bf16.msrb.mxu0 %v6991_v1  ;;  %2905 = vmatpush.bf16.msrb.mxu2 %v6992_v43  ;;  %v7393_v20 = vld [vmem:[#allocation92_spill] sm:$0xff] }
 0x554   :  { %v2709_v45 = vsel %vm2708_vm7, %v4683_v40, %v2705_v34  ;;  %v7389_v40 = vld [vmem:[#allocation90_spill] sm:$0xff] }
 0x555   :  { %v2714_v23 = vsel %vm2711_vm8, %v2713_v24, %v2709_v45  ;;  %v7395_v34 = vld [vmem:[#allocation126_spill] sm:$0xff]  ;;  %v7396_v24 = vld [vmem:[#allocation127_spill] sm:$0xff]  ;;  %v7397_v45 = vld [vmem:[#allocation96_spill] sm:$0xff] }
 0x556   :  { %v2721_v48 = vmul.f32 %v4685_v38, %v2714_v23  ;;  %2880 = vmatpush.bf16.msrb.mxu0 %v5225_v5  ;;  %2906 = vmatpush.bf16.msrb.mxu2 %v5227_v21  ;;  %v7398_v38 = vld [vmem:[#allocation101_spill] sm:$0xff] }
 0x557   :  { %v7399_v23 = vld [vmem:[#allocation13_spill] sm:$0xff] }
 0x558   :  { %v6211_v6 = vpack.c.bf16 %v2721_v48, %v2721_v48  ;;  %v7400_v48 = vld [vmem:[#allocation15_spill] sm:$0xff] }
 0x55a   :  { %2792 = vmatmul.bf16.vlgmr.msrb.gmra.mxu1 %v6211_v6  ;;  %2818 = vmatmul.bf16.vlgmr.msrb.gmra.mxu3 %v6211_v6 }
 0x55b   :  { %2888 = vmatpush.bf16.msrb.mxu1 %v6993_v59  ;;  %2914 = vmatpush.bf16.msrb.mxu3 %v6994_v60 }
 0x55c   :  { %2881 = vmatpush.bf16.msrb.mxu0 %v5237_v28  ;;  %2907 = vmatpush.bf16.msrb.mxu2 %v5239_v12 }
 0x55f   :  { %2889 = vmatpush.bf16.msrb.mxu1 %v6995_v50  ;;  %2915 = vmatpush.bf16.msrb.mxu3 %v6996_v31 }
 0x560   :  { %2882 = vmatpush.bf16.msrb.mxu0 %v5248_v51  ;;  %2908 = vmatpush.bf16.msrb.mxu2 %v5250_v7 }
 0x563   :  { %2890 = vmatpush.bf16.msrb.mxu1 %v6997_v0  ;;  %2916 = vmatpush.bf16.msrb.mxu3 %v6998_v41 }
 0x564   :  { %2927 = vmatpush.bf16.msra.mxu0 %v5252_v8  ;;  %2953 = vmatpush.bf16.msra.mxu2 %v5254_v15 }
 0x565   :  { %2883 = vmatmul.bf16.vlgmr.msrb.gmra.mxu0 %v6183_v22  ;;  %2909 = vmatmul.bf16.vlgmr.msrb.gmra.mxu2 %v6183_v22 }
 0x567   :  { %2891 = vmatpush.bf16.msrb.mxu1 %v7081_v47  ;;  %2917 = vmatpush.bf16.msrb.mxu3 %v7082_v53 }
 0x568   :  { %2928 = vmatpush.bf16.msra.mxu0 %v7080_v55  ;;  %2954 = vmatpush.bf16.msra.mxu2 %v5266_v33 }
 0x56a   :  { %2844 = vmatmul.bf16.vlgmr.msra.gmra.mxu1 %v6211_v6  ;;  %2870 = vmatmul.bf16.vlgmr.msra.gmra.mxu3 %v6211_v6 }
 0x56b   :  { %2892 = vmatpush.bf16.msrb.mxu1 %v7083_v13  ;;  %2918 = vmatpush.bf16.msrb.mxu3 %v7084_v18 }
 0x56c   :  { %2929 = vmatpush.bf16.msra.mxu0 %v5275_v35  ;;  %2955 = vmatpush.bf16.msra.mxu2 %v5277_v57 }
 0x56f   :  { %2893 = vmatpush.bf16.msrb.mxu1 %v7377_v4  ;;  %2919 = vmatpush.bf16.msrb.mxu3 %v7378_v26 }
 0x570   :  { %2930 = vmatpush.bf16.msra.mxu0 %v7379_v36  ;;  %2956 = vmatpush.bf16.msra.mxu2 %v7380_v44 }
 0x573   :  { %2894 = vmatpush.bf16.msrb.mxu1 %v7381_v14  ;;  %2920 = vmatpush.bf16.msrb.mxu3 %v7382_v62 }
 0x574   :  { %2931 = vmatpush.bf16.msra.mxu0 %v7383_v42  ;;  %2957 = vmatpush.bf16.msra.mxu2 %v7384_v3 }
 0x577   :  { %2895 = vmatpush.bf16.msrb.mxu1 %v7385_v2  ;;  %2921 = vmatpush.bf16.msrb.mxu3 %v7386_v37 }
 0x578   :  { %2932 = vmatpush.bf16.msra.mxu0 %v7387_v10  ;;  %2958 = vmatpush.bf16.msra.mxu2 %v7388_v63 }
 0x57a   :  { %2896 = vmatmul.bf16.vlgmr.msrb.gmra.mxu1 %v6211_v6  ;;  %2922 = vmatmul.bf16.vlgmr.msrb.gmra.mxu3 %v6211_v6 }
 0x57b   :  { %2940 = vmatpush.bf16.msra.mxu1 %v7389_v40  ;;  %2966 = vmatpush.bf16.msra.mxu3 %v7390_v30  ;;  %v7471_v40 = vld [vmem:[#allocation67_spill] sm:$0xff] }
 0x57c   :  { %2933 = vmatpush.bf16.msra.mxu0 %v7391_v46  ;;  %2959 = vmatpush.bf16.msra.mxu2 %v7392_v29  ;;  %v7401_v29 = vld [vmem:[#allocation100_spill] sm:$0xff]  ;;  %v7410_v46 = vld [vmem:[#allocation113_spill] sm:$0xff] }
 0x57f   :  { %2941 = vmatpush.bf16.msra.mxu1 %v7393_v20  ;;  %2967 = vmatpush.bf16.msra.mxu3 %v7394_v58  ;;  %v7402_v20 = vld [vmem:[#allocation105_spill] sm:$0xff] }
 0x580   :  { %2934 = vmatpush.bf16.msra.mxu0 %v7395_v34  ;;  %2960 = vmatpush.bf16.msra.mxu2 %v7396_v24  ;;  %v7403_v58 = vld [vmem:[#allocation17_spill] sm:$0xff]  ;;  %v7404_v34 = vld [vmem:[#allocation19_spill] sm:$0xff]  ;;  %v7405_v24 = vld [vmem:[#allocation104_spill] sm:$0xff] }
 0x583   :  { %2942 = vmatpush.bf16.msra.mxu1 %v7397_v45  ;;  %2968 = vmatpush.bf16.msra.mxu3 %v7398_v38  ;;  %v7406_v45 = vld [vmem:[#allocation109_spill] sm:$0xff] }
 0x584   :  { %3095 = vmatpush.bf16.msrb.mxu0 %v7399_v23  ;;  %3121 = vmatpush.bf16.msrb.mxu2 %v7400_v48  ;;  %v7407_v38 = vld [vmem:[#allocation21_spill] sm:$0xff]  ;;  %v7408_v23 = vld [vmem:[#allocation23_spill] sm:$0xff]  ;;  %v7409_v48 = vld [vmem:[#allocation108_spill] sm:$0xff] }
 0x585   :  { %2935 = vmatmul.bf16.vlgmr.msra.gmra.mxu0 %v6183_v22  ;;  %2961 = vmatmul.bf16.vlgmr.msra.gmra.mxu2 %v6183_v22  ;;  %v7411_v22 = vld [vmem:[#allocation25_spill] sm:$0xff] }
 0x587   :  { %2943 = vmatpush.bf16.msra.mxu1 %v7401_v29  ;;  %2969 = vmatpush.bf16.msra.mxu3 %v7402_v20  ;;  %v7412_v29 = vld [vmem:[#allocation27_spill] sm:$0xff]  ;;  %v7413_v20 = vld [vmem:[#allocation112_spill] sm:$0xff] }
 0x588   :  { %3096 = vmatpush.bf16.msrb.mxu0 %v7403_v58  ;;  %3122 = vmatpush.bf16.msrb.mxu2 %v7404_v34  ;;  %v7414_v58 = vld [vmem:[#allocation115_spill] sm:$0xff]  ;;  %v7415_v34 = vld [vmem:[#allocation29_spill] sm:$0xff] }
 0x58b   :  { %2944 = vmatpush.bf16.msra.mxu1 %v7405_v24  ;;  %2970 = vmatpush.bf16.msra.mxu3 %v7406_v45  ;;  %v7416_v24 = vld [vmem:[#allocation31_spill] sm:$0xff]  ;;  %v7417_v45 = vld [vmem:[#allocation114_spill] sm:$0xff] }
 0x58c   :  { %3097 = vmatpush.bf16.msrb.mxu0 %v7407_v38  ;;  %3123 = vmatpush.bf16.msrb.mxu2 %v7408_v23  ;;  %v7418_v38 = vld [vmem:[#allocation116_spill] sm:$0xff]  ;;  %v7419_v23 = vld [vmem:[#allocation33_spill] sm:$0xff] }
 0x58f   :  { %2945 = vmatpush.bf16.msra.mxu1 %v7409_v48  ;;  %2971 = vmatpush.bf16.msra.mxu3 %v7410_v46  ;;  %v7420_v48 = vld [vmem:[#allocation35_spill] sm:$0xff]  ;;  %v7421_v46 = vld [vmem:[#allocation10_spill] sm:$0xff] }
 0x590   :  { %3098 = vmatpush.bf16.msrb.mxu0 %v7411_v22  ;;  %3124 = vmatpush.bf16.msrb.mxu2 %v7412_v29  ;;  %v7422_v22 = vld [vmem:[#allocation12_spill] sm:$0xff]  ;;  %v7423_v29 = vld [vmem:[#allocation38_spill] sm:$0xff] }
 0x593   :  { %2946 = vmatpush.bf16.msra.mxu1 %v7413_v20  ;;  %2972 = vmatpush.bf16.msra.mxu3 %v7414_v58  ;;  %v7432_v58 = vld [vmem:[#allocation47_spill] sm:$0xff] }
 0x594   :  { %3099 = vmatpush.bf16.msrb.mxu0 %v7415_v34  ;;  %3125 = vmatpush.bf16.msrb.mxu2 %v7416_v24  ;;  %v7424_v34 = vld [vmem:[#allocation39_spill] sm:$0xff] }
 0x595   :  { %v7425_v24 = vld [vmem:[#allocation11_spill] sm:$0xff] }
 0x597   :  { %2947 = vmatpush.bf16.msra.mxu1 %v7417_v45  ;;  %2973 = vmatpush.bf16.msra.mxu3 %v7418_v38  ;;  %v7426_v45 = vld [vmem:[#allocation16_spill] sm:$0xff]  ;;  %v7427_v38 = vld [vmem:[#allocation43_spill] sm:$0xff] }
 0x598   :  { %3100 = vmatpush.bf16.msrb.mxu0 %v7419_v23  ;;  %3126 = vmatpush.bf16.msrb.mxu2 %v7420_v48  ;;  %v7428_v23 = vld [vmem:[#allocation44_spill] sm:$0xff]  ;;  %v7429_v48 = vld [vmem:[#allocation14_spill] sm:$0xff] }
 0x59a   :  { %2948 = vmatmul.bf16.vlgmr.msra.gmra.mxu1 %v6211_v6  ;;  %2974 = vmatmul.bf16.vlgmr.msra.gmra.mxu3 %v6211_v6  ;;  %v7433_v6 = vld [vmem:[#allocation18_spill] sm:$0xff] }
 0x59b   :  { %3108 = vmatpush.bf16.msrb.mxu1 %v7421_v46  ;;  %3134 = vmatpush.bf16.msrb.mxu3 %v7422_v22  ;;  %v7430_v46 = vld [vmem:[#allocation20_spill] sm:$0xff]  ;;  %v7431_v22 = vld [vmem:[#allocation45_spill] sm:$0xff] }
 0x59c   :  { %3101 = vmatpush.bf16.msrb.mxu0 %v7423_v29  ;;  %3127 = vmatpush.bf16.msrb.mxu2 %v7424_v34  ;;  %v7434_v29 = vld [vmem:[#allocation24_spill] sm:$0xff]  ;;  %v7435_v34 = vld [vmem:[#allocation49_spill] sm:$0xff] }
 0x59f   :  { %3109 = vmatpush.bf16.msrb.mxu1 %v7425_v24  ;;  %3135 = vmatpush.bf16.msrb.mxu3 %v7426_v45  ;;  %v7436_v24 = vld [vmem:[#allocation51_spill] sm:$0xff]  ;;  %v7437_v45 = vld [vmem:[#allocation22_spill] sm:$0xff] }
 0x5a0   :  { %3102 = vmatpush.bf16.msrb.mxu0 %v7427_v38  ;;  %3128 = vmatpush.bf16.msrb.mxu2 %v7428_v23  ;;  %v7438_v38 = vld [vmem:[#allocation28_spill] sm:$0xff]  ;;  %v7439_v23 = vld [vmem:[#allocation53_spill] sm:$0xff] }
 0x5a3   :  { %3110 = vmatpush.bf16.msrb.mxu1 %v7429_v48  ;;  %3136 = vmatpush.bf16.msrb.mxu3 %v7430_v46  ;;  %v7440_v48 = vld [vmem:[#allocation54_spill] sm:$0xff] }
 0x5a4   :  { %3147 = vmatpush.bf16.msra.mxu0 %v7431_v22  ;;  %3173 = vmatpush.bf16.msra.mxu2 %v7432_v58  ;;  %v7441_v46 = vld [vmem:[#allocation26_spill] sm:$0xff]  ;;  %v7442_v22 = vld [vmem:[#allocation32_spill] sm:$0xff]  ;;  %v7443_v58 = vld [vmem:[#allocation57_spill] sm:$0xff] }
 0x5a7   :  { %3111 = vmatpush.bf16.msrb.mxu1 %v7433_v6  ;;  %3137 = vmatpush.bf16.msrb.mxu3 %v7434_v29  ;;  %v7444_v6 = vld [vmem:[#allocation58_spill] sm:$0xff] }
 0x5a8   :  { %3148 = vmatpush.bf16.msra.mxu0 %v7435_v34  ;;  %3174 = vmatpush.bf16.msra.mxu2 %v7436_v24  ;;  %v7445_v29 = vld [vmem:[#allocation30_spill] sm:$0xff]  ;;  %v7446_v34 = vld [vmem:[#allocation36_spill] sm:$0xff]  ;;  %v7447_v24 = vld [vmem:[#allocation61_spill] sm:$0xff] }
 0x5ab   :  { %3112 = vmatpush.bf16.msrb.mxu1 %v7437_v45  ;;  %3138 = vmatpush.bf16.msrb.mxu3 %v7438_v38  ;;  %v7448_v45 = vld [vmem:[#allocation62_spill] sm:$0xff] }
 0x5ac   :  { %3149 = vmatpush.bf16.msra.mxu0 %v7439_v23  ;;  %3175 = vmatpush.bf16.msra.mxu2 %v7440_v48  ;;  %v7449_v38 = vld [vmem:[#allocation34_spill] sm:$0xff]  ;;  %v7450_v23 = vld [vmem:[#allocation40_spill] sm:$0xff]  ;;  %v7451_v48 = vld [vmem:[#allocation65_spill] sm:$0xff] }
 0x5af   :  { %3113 = vmatpush.bf16.msrb.mxu1 %v7441_v46  ;;  %3139 = vmatpush.bf16.msrb.mxu3 %v7442_v22  ;;  %v7452_v46 = vld [vmem:[#allocation66_spill] sm:$0xff]  ;;  %v7453_v22 = vld [vmem:[#allocation37_spill] sm:$0xff] }
 0x5b0   :  { %3150 = vmatpush.bf16.msra.mxu0 %v7443_v58  ;;  %3176 = vmatpush.bf16.msra.mxu2 %v7444_v6  ;;  %v7454_v58 = vld [vmem:[#allocation42_spill] sm:$0xff] }
 0x5b1   :  { %v7455_v6 = vld [vmem:[#allocation70_spill] sm:$0xff] }
 0x5b3   :  { %3114 = vmatpush.bf16.msrb.mxu1 %v7445_v29  ;;  %3140 = vmatpush.bf16.msrb.mxu3 %v7446_v34  ;;  %v7456_v29 = vld [vmem:[#allocation71_spill] sm:$0xff]  ;;  %v7457_v34 = vld [vmem:[#allocation41_spill] sm:$0xff] }
 0x5b4   :  { %3151 = vmatpush.bf16.msra.mxu0 %v7447_v24  ;;  %3177 = vmatpush.bf16.msra.mxu2 %v7448_v45  ;;  %v7458_v24 = vld [vmem:[#allocation48_spill] sm:$0xff]  ;;  %v7459_v45 = vld [vmem:[#allocation75_spill] sm:$0xff] }
 0x5b7   :  { %3115 = vmatpush.bf16.msrb.mxu1 %v7449_v38  ;;  %3141 = vmatpush.bf16.msrb.mxu3 %v7450_v23  ;;  %v7460_v38 = vld [vmem:[#allocation76_spill] sm:$0xff]  ;;  %v7461_v23 = vld [vmem:[#allocation46_spill] sm:$0xff] }
 0x5b8   :  { %3152 = vmatpush.bf16.msra.mxu0 %v7451_v48  ;;  %3178 = vmatpush.bf16.msra.mxu2 %v7452_v46  ;;  %v7462_v48 = vld [vmem:[#allocation52_spill] sm:$0xff] }
 0x5bb   :  { %3160 = vmatpush.bf16.msra.mxu1 %v7453_v22  ;;  %3186 = vmatpush.bf16.msra.mxu3 %v7454_v58  ;;  %v7463_v22 = vld [vmem:[#allocation50_spill] sm:$0xff]  ;;  %v7464_v58 = vld [vmem:[#allocation56_spill] sm:$0xff] }
 0x5bc   :  { %3153 = vmatpush.bf16.msra.mxu0 %v7455_v6  ;;  %3179 = vmatpush.bf16.msra.mxu2 %v7456_v29  ;;  %v7465_v6 = vld [vmem:[#allocation55_spill] sm:$0xff]  ;;  %v7466_v29 = vld [vmem:[#allocation60_spill] sm:$0xff] }
 0x5be   :  { %v2780_v46 = vpop.f32.mrf.mxu0 }
 0x5bf   :  { %3161 = vmatpush.bf16.msra.mxu1 %v7457_v34  ;;  %3187 = vmatpush.bf16.msra.mxu3 %v7458_v24  ;;  %v7467_v24 = vld [vmem:[#allocation59_spill] sm:$0xff] }
 0x5c0   :  { %3154 = vmatpush.bf16.msra.mxu0 %v7459_v45  ;;  %3180 = vmatpush.bf16.msra.mxu2 %v7460_v38  ;;  %v7468_v45 = vld [vmem:[#allocation64_spill] sm:$0xff]  ;;  %v7469_v38 = vld [vmem:[#allocation63_spill] sm:$0xff] }
 0x5c3   :  { %3162 = vmatpush.bf16.msra.mxu1 %v7461_v23  ;;  %3188 = vmatpush.bf16.msra.mxu3 %v7462_v48  ;;  %v7470_v23 = vld [vmem:[#allocation68_spill] sm:$0xff] }
 0x5c4   :  { %v2806_v34 = vpop.f32.mrf.mxu2 }
 0x5c6   :  { %v2782_v20 = vpop.f32.mrf.mxu0 }
 0x5c7   :  { %3163 = vmatpush.bf16.msra.mxu1 %v7463_v22  ;;  %3189 = vmatpush.bf16.msra.mxu3 %v7464_v58  ;;  %v7472_v22 = vld [vmem:[#allocation72_spill] sm:$0xff] }
 0x5cb   :  { %3164 = vmatpush.bf16.msra.mxu1 %v7465_v6  ;;  %3190 = vmatpush.bf16.msra.mxu3 %v7466_v29 }
 0x5cc   :  { %v2808_v48 = vpop.f32.mrf.mxu2 }
 0x5ce   :  { %v2832_v30 = vpop.f32.mrf.mxu0 }
 0x5cf   :  { %3165 = vmatpush.bf16.msra.mxu1 %v7467_v24  ;;  %3191 = vmatpush.bf16.msra.mxu3 %v7468_v45 }
 0x5d3   :  { %3166 = vmatpush.bf16.msra.mxu1 %v7469_v38  ;;  %3192 = vmatpush.bf16.msra.mxu3 %v7470_v23 }
 0x5d4   :  { %v2858_v6 = vpop.f32.mrf.mxu2 }
 0x5d6   :  { %v2834_v37 = vpop.f32.mrf.mxu0 }
 0x5d7   :  { %3167 = vmatpush.bf16.msra.mxu1 %v7471_v40  ;;  %3193 = vmatpush.bf16.msra.mxu3 %v7472_v22  ;;  %v2793_v58 = vpop.f32.mrf.mxu1 }
 0x5d8   :  { %v2794_v26 = vadd.f32 %v2793_v58, %v2780_v46 }
 0x5dc   :  { %v2860_v20 = vpop.f32.mrf.mxu2 }
 0x5dd   :  { %v2819_v29 = vpop.f32.mrf.mxu3  ;;  %v3047_v20 = vld [vmem:[#allocation2 + $0x6] ss:$8 sm:$0xf] }
 0x5de   :  { %v2820_v38 = vadd.f32 %v2819_v29, %v2806_v34 }
 0x5df   :  { %v2795_v2 = vpop.f32.mrf.mxu1 }
 0x5e0   :  { %v3052_v48 = vrot.slane %v2820_v38, 7 }
 0x5e2   :  { %v2884_v63 = vpop.f32.mrf.mxu0  ;;  %v3055_v37 = vsel %vm1432_vm4, %v2794_v26, %v3052_v48 }
 0x5e5   :  { %v2821_v24 = vpop.f32.mrf.mxu3 }
 0x5e7   :  { %v2845_v10 = vpop.f32.mrf.mxu1 }
 0x5e8   :  { %v2910_v45 = vpop.f32.mrf.mxu2  ;;  %v2846_v14 = vadd.f32 %v2845_v10, %v2832_v30 }
 0x5ea   :  { %v2886_v62 = vpop.f32.mrf.mxu0  ;;  %v3053_v22 = vrot.slane %v2846_v14, 6 }
 0x5ed   :  { %v2871_v23 = vpop.f32.mrf.mxu3 }
 0x5ee   :  { %v2872_v3 = vadd.f32 %v2871_v23, %v2858_v6 }
 0x5ef   :  { %v2847_v42 = vpop.f32.mrf.mxu1 }
 0x5f0   :  { %v2912_v40 = vpop.f32.mrf.mxu2  ;;  %v3054_v4 = vrot.slane %v2872_v3, 5 }
 0x5f2   :  { %v3056_v2 = vsel %vm1434_vm5, %v3053_v22, %v3054_v4 }
 0x5f3   :  { %v3057_v24 = vsel %vm1436_vm6, %v3055_v37, %v3056_v2 }
 0x5f4   :  { %v3059_v44 = vadd.f32 %v3057_v24, %v3047_v20 }
 0x5f5   :  { %v2873_v36 = vpop.f32.mrf.mxu3 }
 0x5f6   :  { %v4340_v62 = vmul.f32 -1.442695, %v3059_v44  ;;  %v3080_v22 = vrot.slane %v3059_v44, 3 }
 0x5f7   :  { %v2897_v34 = vpop.f32.mrf.mxu1 }
 0x5f8   :  { %4686 = vpow2.f32 %v4340_v62  ;;  %v2898_v10 = vadd.f32 %v2897_v34, %v2884_v63 }
 0x5fa   :  { %v2979_v30 = vadd.f32 %v2898_v10, %v7073_v9 }
 0x5fc   :  { %v4337_v42 = vmul.f32 -1.442695, %v2979_v30 }
 0x5fd   :  { %v2923_v6 = vpop.f32.mrf.mxu3 }
 0x5fe   :  { %v4687_v46 = vpop.eup %4686  ;;  %4688 = vpow2.f32 %v4337_v42  ;;  %v2924_v14 = vadd.f32 %v2923_v6, %v2910_v45 }
 0x5ff   :  { %v3063_v3 = vadd.f32 1.0, %v4687_v46  ;;  %v2899_v26 = vpop.f32.mrf.mxu1 }
 0x600   :  { %v2980_v4 = vadd.f32 %v2924_v14, %v7173_v49 }
 0x601   :  { %4690 = vrcp.f32 %v3063_v3  ;;  %v3075_v45 = vand.u32 2147483648, %v3063_v3  ;;  %v3073_v34 = vand.u32 2147483647, %v3063_v3  ;;  %vm3069_vm10 = vweird.f32 %v3063_v3 }
 0x602   :  { %v2936_v58 = vpop.f32.mrf.mxu0  ;;  %v4338_v29 = vmul.f32 -1.442695, %v2980_v4 }
 0x603   :  { %v3076_v42 = vor.u32 1.1754944e-38, %v3075_v45  ;;  %vm3074_vm12 = vcmp.eq.f32.partialorder %v3073_v34, 8.507059e+37 }
 0x604   :  { %v4689_v38 = vpop.eup %4688  ;;  %4692 = vpow2.f32 %v4338_v29 }
 0x605   :  { %v2925_v36 = vpop.f32.mrf.mxu3  ;;  %v6348_v23 = vadd.f32 1.0, %v4689_v38 }
 0x607   :  { %v4691_v48 = vpop.eup %4690  ;;  %4694 = vrcp.f32 %v6348_v23  ;;  %vm3000_vm15 = vweird.f32 %v6348_v23 }
 0x608   :  { %v2962_v63 = vpop.f32.mrf.mxu2  ;;  %v3065_v40 = vmul.f32 %v4691_v48, %v3063_v3  ;;  %vm3070_vm9 = vweird.f32 %v4691_v48  ;;  %4696 = vtanh.f32 %v3080_v22 }
 0x609   :  { %vm3071_vm11 = vmor %vm3069_vm10, %vm3070_vm9 }
 0x60a   :  { %v2938_v37 = vpop.f32.mrf.mxu0  ;;  %v4693_v2 = vpop.eup %4692  ;;  %v3066_v20 = vsub.f32 1.0, %v3065_v40 }
 0x60b   :  { %v6351_v24 = vadd.f32 1.0, %v4693_v2 }
 0x60c   :  { %v3067_v62 = vmul.f32 %v4691_v48, %v3066_v20 }
 0x60d   :  { %4698 = vrcp.f32 %v6351_v24  ;;  %v4695_v44 = vpop.eup %4694  ;;  %vm3015_vm0 = vweird.f32 %v6351_v24 }
 0x60e   :  { %v3068_v10 = vadd.f32 %v4691_v48, %v3067_v62  ;;  %v4697_v14 = vpop.eup %4696  ;;  %v2996_v29 = vmul.f32 %v4695_v44, %v6348_v23  ;;  %vm3001_vm13 = vweird.f32 %v4695_v44 }
 0x60f   :  { %vm6368_vm1 = vmor %vm3000_vm15, %vm3001_vm13 }
 0x610   :  { %v2964_v30 = vpop.f32.mrf.mxu2  ;;  %v3072_v6 = vsel %vm3071_vm11, %v4691_v48, %v3068_v10  ;;  %v2997_v2 = vsub.f32 1.0, %v2996_v29 }
 0x611   :  { %v3077_v46 = vsel %vm3074_vm12, %v3076_v42, %v3072_v6 }
 0x612   :  { %v3084_v26 = vrot.slane %v3077_v46, 1  ;;  %v3087_v36 = vmul.f32 %v4697_v14, %v3077_v46  ;;  %v2998_v10 = vmul.f32 %v4695_v44, %v2997_v2  ;;  %v7477_v2 = vld [vmem:[#allocation118_spill] sm:$0xff] }
 0x613   :  { %v4699_v4 = vpop.eup %4698 }
 0x614   :  { %v3086_v38 = vmul.f32 %v3084_v26, %v6168_v54  ;;  %v3011_v40 = vmul.f32 %v4699_v4, %v6351_v24  ;;  %v3090_v54 = vrot.slane %v3077_v46, 2  ;;  %vm3016_vm14 = vweird.f32 %v4699_v4 }
 0x615   :  { %v3004_v46 = vand.u32 2147483647, %v6348_v23  ;;  %vm6374_vm2 = vmor %vm3015_vm0, %vm3016_vm14 }
 0x616   :  { %v6357_v37 = vadd.f32 %v3087_v36, %v3086_v38  ;;  %v3012_v20 = vsub.f32 1.0, %v3011_v40  ;;  %v3021_v38 = vand.u32 2147483648, %v6351_v24  ;;  %v3006_v36 = vand.u32 2147483648, %v6348_v23 }
 0x617   :  { %v2949_v22 = vpop.f32.mrf.mxu1  ;;  %vm3005_vm3 = vcmp.eq.f32.partialorder %v3004_v46, 8.507059e+37 }
 0x618   :  { %v2950_v3 = vadd.f32 %v2949_v22, %v2936_v58  ;;  %4700 = vtanh.f32 %v6357_v37  ;;  %v3013_v62 = vmul.f32 %v4699_v4, %v3012_v20  ;;  %v2999_v58 = vadd.f32 %v4695_v44, %v2998_v10 }
 0x619   :  { %v3019_v22 = vand.u32 2147483647, %v6351_v24  ;;  %v3022_v23 = vor.u32 1.1754944e-38, %v3021_v38 }
 0x61a   :  { %v2981_v48 = vadd.f32 %v2950_v3, %v5402_v16  ;;  %v3014_v29 = vadd.f32 %v4699_v4, %v3013_v62 }
 0x61b   :  { %vm3020_vm7 = vcmp.eq.f32.partialorder %v3019_v22, 8.507059e+37 }
 0x61c   :  { %v4339_v45 = vmul.f32 -1.442695, %v2981_v48  ;;  %v3003_v48 = vsel %vm6368_vm1, %v4695_v44, %v2999_v58 }
 0x61d   :  { %v2975_v34 = vpop.f32.mrf.mxu3 }
 0x61e   :  { %4702 = vpow2.f32 %v4339_v45  ;;  %v2976_v30 = vadd.f32 %v2975_v34, %v2962_v63  ;;  %v4701_v6 = vpop.eup %4700  ;;  %v3018_v45 = vsel %vm6374_vm2, %v4699_v4, %v3014_v29  ;;  %v3007_v34 = vor.u32 1.1754944e-38, %v3006_v36 }
 0x61f   :  { %v2951_v42 = vpop.f32.mrf.mxu1  ;;  %v3092_v26 = vmul.f32 %v4701_v6, %v3090_v54  ;;  %v3023_v44 = vsel %vm3020_vm7, %v3022_v23, %v3018_v45  ;;  %v7480_v45 = vld [vmem:[#allocation86_spill] sm:$0xff]  ;;  %v7482_v23 = vld [vmem:[#allocation121_spill] sm:$0xff] }
 0x620   :  { %v2982_v14 = vadd.f32 %v2976_v30, %v5411_v17  ;;  %v3008_v10 = vsel %vm3005_vm3, %v3007_v34, %v3003_v48  ;;  %v3041_v4 = vmul.f32 %v3023_v44, %v6200_v61  ;;  %v7479_v48 = vld [vmem:[#allocation83_spill] sm:$0xff]  ;;  %v7483_v34 = vld [vmem:[#allocation85_spill] sm:$0xff] }
 0x621   :  { %v6365_v40 = vpack.c.bf16 %v3092_v26, %v3092_v26  ;;  %v7486_v44 = vld [vmem:[#allocation123_spill] sm:$0xff] }
 0x622   :  { %4704 = vtanh.f32 %v2982_v14 }
 0x623   :  { %3103 = vmatmul.bf16.vlgmr.msrb.gmra.mxu0 %v6365_v40  ;;  %3129 = vmatmul.bf16.vlgmr.msrb.gmra.mxu2 %v6365_v40 }
 0x624   :  { %v4703_v3 = vpop.eup %4702  ;;  %3199 = vmatpush.bf16.msrb.mxu0 %v6983_v32  ;;  %3225 = vmatpush.bf16.msrb.mxu2 %v6984_v39 }
 0x625   :  { %v2994_v20 = vadd.f32 1.0, %v4703_v3  ;;  %v2977_v62 = vpop.f32.mrf.mxu3 }
 0x626   :  { %v7481_v62 = vld [vmem:[#allocation120_spill] sm:$0xff] }
 0x627   :  { %4706 = vrcp.f32 %v2994_v20  ;;  %v3036_v26 = vand.u32 2147483648, %v2994_v20  ;;  %v3034_v29 = vand.u32 2147483647, %v2994_v20  ;;  %vm3030_vm9 = vweird.f32 %v2994_v20 }
 0x628   :  { %v4705_v24 = vpop.eup %4704  ;;  %3200 = vmatpush.bf16.msrb.mxu0 %v6985_v27  ;;  %3226 = vmatpush.bf16.msrb.mxu2 %v6986_v52 }
 0x629   :  { %v3042_v30 = vmul.f32 %v4705_v24, %v3008_v10  ;;  %v3037_v38 = vor.u32 1.1754944e-38, %v3036_v26  ;;  %vm3035_vm11 = vcmp.eq.f32.partialorder %v3034_v29, 8.507059e+37  ;;  %v7484_v24 = vld [vmem:[#allocation89_spill] sm:$0xff]  ;;  %v7485_v10 = vld [vmem:[#allocation122_spill] sm:$0xff] }
 0x62a   :  { %v7492_v26 = vld [vmem:[#allocation125_spill] sm:$0xff] }
 0x62b   :  { %v6389_v42 = vadd.f32 %v3042_v30, %v3041_v4  ;;  %v7487_v30 = vld [vmem:[#allocation88_spill] sm:$0xff]  ;;  %v7488_v4 = vld [vmem:[#allocation91_spill] sm:$0xff]  ;;  %v7494_v29 = vld [vmem:[#allocation97_spill] sm:$0xff] }
 0x62c   :  { %3201 = vmatpush.bf16.msrb.mxu0 %v6987_v56  ;;  %3227 = vmatpush.bf16.msrb.mxu2 %v6988_v25 }
 0x62d   :  { %v4707_v54 = vpop.eup %4706  ;;  %4708 = vtanh.f32 %v6389_v42 }
 0x62e   :  { %v3026_v6 = vmul.f32 %v4707_v54, %v2994_v20  ;;  %vm3031_vm8 = vweird.f32 %v4707_v54  ;;  %v7478_v20 = vld [vmem:[#allocation119_spill] sm:$0xff] }
 0x62f   :  { %vm3032_vm10 = vmor %vm3030_vm9, %vm3031_vm8 }
 0x630   :  { %v3027_v14 = vsub.f32 1.0, %v3026_v6  ;;  %3202 = vmatpush.bf16.msrb.mxu0 %v7079_v11  ;;  %3228 = vmatpush.bf16.msrb.mxu2 %v6990_v19  ;;  %v7490_v6 = vld [vmem:[#allocation93_spill] sm:$0xff] }
 0x632   :  { %v3028_v58 = vmul.f32 %v4707_v54, %v3027_v14  ;;  %v7491_v14 = vld [vmem:[#allocation124_spill] sm:$0xff] }
 0x633   :  { %3155 = vmatmul.bf16.vlgmr.msra.gmra.mxu0 %v6365_v40  ;;  %3181 = vmatmul.bf16.vlgmr.msra.gmra.mxu2 %v6365_v40  ;;  %v4709_v63 = vpop.eup %4708 }
 0x634   :  { %v3029_v61 = vadd.f32 %v4707_v54, %v3028_v58  ;;  %3203 = vmatpush.bf16.msrb.mxu0 %v6991_v1  ;;  %3229 = vmatpush.bf16.msrb.mxu2 %v6992_v43  ;;  %v7493_v58 = vld [vmem:[#allocation92_spill] sm:$0xff] }
 0x636   :  { %v3033_v36 = vsel %vm3032_vm10, %v4707_v54, %v3029_v61  ;;  %v7489_v54 = vld [vmem:[#allocation90_spill] sm:$0xff] }
 0x637   :  { %v3038_v46 = vsel %vm3035_vm11, %v3037_v38, %v3033_v36  ;;  %v7495_v61 = vld [vmem:[#allocation126_spill] sm:$0xff]  ;;  %v7496_v38 = vld [vmem:[#allocation127_spill] sm:$0xff]  ;;  %v7497_v36 = vld [vmem:[#allocation96_spill] sm:$0xff] }
 0x638   :  { %v3045_v22 = vmul.f32 %v4709_v63, %v3038_v46  ;;  %3204 = vmatpush.bf16.msrb.mxu0 %v5225_v5  ;;  %3230 = vmatpush.bf16.msrb.mxu2 %v5227_v21  ;;  %v7498_v63 = vld [vmem:[#allocation101_spill] sm:$0xff]  ;;  %v7499_v46 = vld [vmem:[#allocation100_spill] sm:$0xff] }
 0x63a   :  { %v6400_v3 = vpack.c.bf16 %v3045_v22, %v3045_v22  ;;  %v7500_v22 = vld [vmem:[#allocation105_spill] sm:$0xff] }
 0x63c   :  { %3116 = vmatmul.bf16.vlgmr.msrb.gmra.mxu1 %v6400_v3  ;;  %3142 = vmatmul.bf16.vlgmr.msrb.gmra.mxu3 %v6400_v3 }
 0x63d   :  { %3212 = vmatpush.bf16.msrb.mxu1 %v6993_v59  ;;  %3238 = vmatpush.bf16.msrb.mxu3 %v6994_v60 }
 0x63e   :  { %3205 = vmatpush.bf16.msrb.mxu0 %v5237_v28  ;;  %3231 = vmatpush.bf16.msrb.mxu2 %v5239_v12 }
 0x641   :  { %3213 = vmatpush.bf16.msrb.mxu1 %v6995_v50  ;;  %3239 = vmatpush.bf16.msrb.mxu3 %v6996_v31 }
 0x642   :  { %3206 = vmatpush.bf16.msrb.mxu0 %v5248_v51  ;;  %3232 = vmatpush.bf16.msrb.mxu2 %v5250_v7 }
 0x645   :  { %3214 = vmatpush.bf16.msrb.mxu1 %v6997_v0  ;;  %3240 = vmatpush.bf16.msrb.mxu3 %v6998_v41 }
 0x646   :  { %3251 = vmatpush.bf16.msra.mxu0 %v5252_v8  ;;  %3277 = vmatpush.bf16.msra.mxu2 %v5254_v15 }
 0x647   :  { %3207 = vmatmul.bf16.vlgmr.msrb.gmra.mxu0 %v6365_v40  ;;  %3233 = vmatmul.bf16.vlgmr.msrb.gmra.mxu2 %v6365_v40 }
 0x649   :  { %3215 = vmatpush.bf16.msrb.mxu1 %v7081_v47  ;;  %3241 = vmatpush.bf16.msrb.mxu3 %v7082_v53 }
 0x64a   :  { %3252 = vmatpush.bf16.msra.mxu0 %v7080_v55  ;;  %3278 = vmatpush.bf16.msra.mxu2 %v5266_v33 }
 0x64c   :  { %3168 = vmatmul.bf16.vlgmr.msra.gmra.mxu1 %v6400_v3  ;;  %3194 = vmatmul.bf16.vlgmr.msra.gmra.mxu3 %v6400_v3 }
 0x64d   :  { %3216 = vmatpush.bf16.msrb.mxu1 %v7083_v13  ;;  %3242 = vmatpush.bf16.msrb.mxu3 %v7084_v18 }
 0x64e   :  { %3253 = vmatpush.bf16.msra.mxu0 %v5275_v35  ;;  %3279 = vmatpush.bf16.msra.mxu2 %v5277_v57 }
 0x651   :  { %3217 = vmatpush.bf16.msrb.mxu1 %v7479_v48  ;;  %3243 = vmatpush.bf16.msrb.mxu3 %v7480_v45 }
 0x652   :  { %3254 = vmatpush.bf16.msra.mxu0 %v7477_v2  ;;  %3280 = vmatpush.bf16.msra.mxu2 %v7478_v20 }
 0x655   :  { %3218 = vmatpush.bf16.msrb.mxu1 %v7483_v34  ;;  %3244 = vmatpush.bf16.msrb.mxu3 %v7484_v24 }
 0x656   :  { %3255 = vmatpush.bf16.msra.mxu0 %v7481_v62  ;;  %3281 = vmatpush.bf16.msra.mxu2 %v7482_v23 }
 0x659   :  { %3219 = vmatpush.bf16.msrb.mxu1 %v7487_v30  ;;  %3245 = vmatpush.bf16.msrb.mxu3 %v7488_v4 }
 0x65a   :  { %3256 = vmatpush.bf16.msra.mxu0 %v7485_v10  ;;  %3282 = vmatpush.bf16.msra.mxu2 %v7486_v44 }
 0x65c   :  { %3220 = vmatmul.bf16.vlgmr.msrb.gmra.mxu1 %v6400_v3  ;;  %3246 = vmatmul.bf16.vlgmr.msrb.gmra.mxu3 %v6400_v3 }
 0x65d   :  { %3264 = vmatpush.bf16.msra.mxu1 %v7489_v54  ;;  %3290 = vmatpush.bf16.msra.mxu3 %v7490_v6 }
 0x65e   :  { %3257 = vmatpush.bf16.msra.mxu0 %v7491_v14  ;;  %3283 = vmatpush.bf16.msra.mxu2 %v7492_v26 }
 0x661   :  { %3265 = vmatpush.bf16.msra.mxu1 %v7493_v58  ;;  %3291 = vmatpush.bf16.msra.mxu3 %v7494_v29 }
 0x662   :  { %3258 = vmatpush.bf16.msra.mxu0 %v7495_v61  ;;  %3284 = vmatpush.bf16.msra.mxu2 %v7496_v38 }
 0x665   :  { %3266 = vmatpush.bf16.msra.mxu1 %v7497_v36  ;;  %3292 = vmatpush.bf16.msra.mxu3 %v7498_v63 }
 0x666   :  { %3419 = vmatpush.bf16.msrb.mxu0 %v6983_v32  ;;  %3445 = vmatpush.bf16.msrb.mxu2 %v6984_v39  ;;  %v7501_v32 = vld [vmem:[#allocation104_spill] sm:$0xff]  ;;  %v7502_v39 = vld [vmem:[#allocation109_spill] sm:$0xff] }
 0x667   :  { %3259 = vmatmul.bf16.vlgmr.msra.gmra.mxu0 %v6365_v40  ;;  %3285 = vmatmul.bf16.vlgmr.msra.gmra.mxu2 %v6365_v40  ;;  %v7503_v40 = vld [vmem:[#allocation108_spill] sm:$0xff] }
 0x669   :  { %3267 = vmatpush.bf16.msra.mxu1 %v7499_v46  ;;  %3293 = vmatpush.bf16.msra.mxu3 %v7500_v22 }
 0x66a   :  { %3420 = vmatpush.bf16.msrb.mxu0 %v6985_v27  ;;  %3446 = vmatpush.bf16.msrb.mxu2 %v6986_v52  ;;  %v7504_v27 = vld [vmem:[#allocation113_spill] sm:$0xff]  ;;  %v7505_v52 = vld [vmem:[#allocation112_spill] sm:$0xff] }
 0x66d   :  { %3268 = vmatpush.bf16.msra.mxu1 %v7501_v32  ;;  %3294 = vmatpush.bf16.msra.mxu3 %v7502_v39 }
 0x66e   :  { %3421 = vmatpush.bf16.msrb.mxu0 %v6987_v56  ;;  %3447 = vmatpush.bf16.msrb.mxu2 %v6988_v25  ;;  %v7506_v56 = vld [vmem:[#allocation115_spill] sm:$0xff]  ;;  %v7507_v25 = vld [vmem:[#allocation114_spill] sm:$0xff] }
 0x671   :  { %3269 = vmatpush.bf16.msra.mxu1 %v7503_v40  ;;  %3295 = vmatpush.bf16.msra.mxu3 %v7504_v27 }
 0x672   :  { %3422 = vmatpush.bf16.msrb.mxu0 %v7079_v11  ;;  %3448 = vmatpush.bf16.msrb.mxu2 %v6990_v19  ;;  %v7508_v11 = vld [vmem:[#allocation116_spill] sm:$0xff] }
 0x675   :  { %3270 = vmatpush.bf16.msra.mxu1 %v7505_v52  ;;  %3296 = vmatpush.bf16.msra.mxu3 %v7506_v56 }
 0x676   :  { %3423 = vmatpush.bf16.msrb.mxu0 %v6991_v1  ;;  %3449 = vmatpush.bf16.msrb.mxu2 %v6992_v43 }
 0x679   :  { %3271 = vmatpush.bf16.msra.mxu1 %v7507_v25  ;;  %3297 = vmatpush.bf16.msra.mxu3 %v7508_v11 }
 0x67a   :  { %3424 = vmatpush.bf16.msrb.mxu0 %v5225_v5  ;;  %3450 = vmatpush.bf16.msrb.mxu2 %v5227_v21 }
 0x67c   :  { %3272 = vmatmul.bf16.vlgmr.msra.gmra.mxu1 %v6400_v3  ;;  %3298 = vmatmul.bf16.vlgmr.msra.gmra.mxu3 %v6400_v3 }
 0x67d   :  { %3432 = vmatpush.bf16.msrb.mxu1 %v6993_v59  ;;  %3458 = vmatpush.bf16.msrb.mxu3 %v6994_v60 }
 0x67e   :  { %3425 = vmatpush.bf16.msrb.mxu0 %v5237_v28  ;;  %3451 = vmatpush.bf16.msrb.mxu2 %v5239_v12 }
 0x681   :  { %3433 = vmatpush.bf16.msrb.mxu1 %v6995_v50  ;;  %3459 = vmatpush.bf16.msrb.mxu3 %v6996_v31 }
 0x682   :  { %3426 = vmatpush.bf16.msrb.mxu0 %v5248_v51  ;;  %3452 = vmatpush.bf16.msrb.mxu2 %v5250_v7 }
 0x685   :  { %3434 = vmatpush.bf16.msrb.mxu1 %v6997_v0  ;;  %3460 = vmatpush.bf16.msrb.mxu3 %v6998_v41 }
 0x686   :  { %3471 = vmatpush.bf16.msra.mxu0 %v5252_v8  ;;  %3497 = vmatpush.bf16.msra.mxu2 %v5254_v15 }
 0x689   :  { %3435 = vmatpush.bf16.msrb.mxu1 %v7081_v47  ;;  %3461 = vmatpush.bf16.msrb.mxu3 %v7082_v53 }
 0x68a   :  { %3472 = vmatpush.bf16.msra.mxu0 %v7080_v55  ;;  %3498 = vmatpush.bf16.msra.mxu2 %v5266_v33 }
 0x68d   :  { %3436 = vmatpush.bf16.msrb.mxu1 %v7083_v13  ;;  %3462 = vmatpush.bf16.msrb.mxu3 %v7084_v18 }
 0x68e   :  { %3473 = vmatpush.bf16.msra.mxu0 %v5275_v35  ;;  %3499 = vmatpush.bf16.msra.mxu2 %v5277_v57 }
 0x691   :  { %3437 = vmatpush.bf16.msrb.mxu1 %v7479_v48  ;;  %3463 = vmatpush.bf16.msrb.mxu3 %v7480_v45  ;;  %v3371_v48 = vld [vmem:[#allocation2 + $0x7] ss:$8 sm:$0xf] }
 0x692   :  { %3474 = vmatpush.bf16.msra.mxu0 %v7477_v2  ;;  %3500 = vmatpush.bf16.msra.mxu2 %v7478_v20 }
 0x695   :  { %3438 = vmatpush.bf16.msrb.mxu1 %v7483_v34  ;;  %3464 = vmatpush.bf16.msrb.mxu3 %v7484_v24 }
 0x696   :  { %3475 = vmatpush.bf16.msra.mxu0 %v7481_v62  ;;  %3501 = vmatpush.bf16.msra.mxu2 %v7482_v23 }
 0x699   :  { %3439 = vmatpush.bf16.msrb.mxu1 %v7487_v30  ;;  %3465 = vmatpush.bf16.msrb.mxu3 %v7488_v4 }
 0x69a   :  { %3476 = vmatpush.bf16.msra.mxu0 %v7485_v10  ;;  %3502 = vmatpush.bf16.msra.mxu2 %v7486_v44 }
 0x69d   :  { %3484 = vmatpush.bf16.msra.mxu1 %v7489_v54  ;;  %3510 = vmatpush.bf16.msra.mxu3 %v7490_v6 }
 0x69e   :  { %3477 = vmatpush.bf16.msra.mxu0 %v7491_v14  ;;  %3503 = vmatpush.bf16.msra.mxu2 %v7492_v26 }
 0x6a0   :  { %v3104_v5 = vpop.f32.mrf.mxu0 }
 0x6a1   :  { %3485 = vmatpush.bf16.msra.mxu1 %v7493_v58  ;;  %3511 = vmatpush.bf16.msra.mxu3 %v7494_v29 }
 0x6a2   :  { %3478 = vmatpush.bf16.msra.mxu0 %v7495_v61  ;;  %3504 = vmatpush.bf16.msra.mxu2 %v7496_v38 }
 0x6a5   :  { %3486 = vmatpush.bf16.msra.mxu1 %v7497_v36  ;;  %3512 = vmatpush.bf16.msra.mxu3 %v7498_v63 }
 0x6a6   :  { %v3130_v21 = vpop.f32.mrf.mxu2 }
 0x6a8   :  { %v3106_v28 = vpop.f32.mrf.mxu0 }
 0x6a9   :  { %3487 = vmatpush.bf16.msra.mxu1 %v7499_v46  ;;  %3513 = vmatpush.bf16.msra.mxu3 %v7500_v22 }
 0x6ad   :  { %3488 = vmatpush.bf16.msra.mxu1 %v7501_v32  ;;  %3514 = vmatpush.bf16.msra.mxu3 %v7502_v39 }
 0x6ae   :  { %v3132_v12 = vpop.f32.mrf.mxu2 }
 0x6b0   :  { %v3156_v51 = vpop.f32.mrf.mxu0 }
 0x6b1   :  { %3489 = vmatpush.bf16.msra.mxu1 %v7503_v40  ;;  %3515 = vmatpush.bf16.msra.mxu3 %v7504_v27 }
 0x6b5   :  { %3490 = vmatpush.bf16.msra.mxu1 %v7505_v52  ;;  %3516 = vmatpush.bf16.msra.mxu3 %v7506_v56 }
 0x6b6   :  { %v3182_v7 = vpop.f32.mrf.mxu2 }
 0x6b8   :  { %v3158_v15 = vpop.f32.mrf.mxu0 }
 0x6b9   :  { %3491 = vmatpush.bf16.msra.mxu1 %v7507_v25  ;;  %3517 = vmatpush.bf16.msra.mxu3 %v7508_v11  ;;  %v3117_v8 = vpop.f32.mrf.mxu1 }
 0x6ba   :  { %v3118_v13 = vadd.f32 %v3117_v8, %v3104_v5 }
 0x6be   :  { %v3184_v35 = vpop.f32.mrf.mxu2 }
 0x6bf   :  { %v3143_v33 = vpop.f32.mrf.mxu3 }
 0x6c0   :  { %v3144_v50 = vadd.f32 %v3143_v33, %v3130_v21 }
 0x6c1   :  { %v3119_v57 = vpop.f32.mrf.mxu1 }
 0x6c2   :  { %v3376_v41 = vrot.slane %v3144_v50, 7 }
 0x6c4   :  { %v3208_v19 = vpop.f32.mrf.mxu0  ;;  %v3379_v2 = vsel %vm1432_vm4, %v3118_v13, %v3376_v41 }
 0x6c7   :  { %v3145_v1 = vpop.f32.mrf.mxu3 }
 0x6c9   :  { %v3169_v43 = vpop.f32.mrf.mxu1 }
 0x6ca   :  { %v3234_v59 = vpop.f32.mrf.mxu2  ;;  %v3170_v31 = vadd.f32 %v3169_v43, %v3156_v51 }
 0x6cc   :  { %v3210_v60 = vpop.f32.mrf.mxu0  ;;  %v3377_v18 = vrot.slane %v3170_v31, 6 }
 0x6cf   :  { %v3195_v0 = vpop.f32.mrf.mxu3 }
 0x6d0   :  { %v3196_v55 = vadd.f32 %v3195_v0, %v3182_v7 }
 0x6d1   :  { %v3171_v47 = vpop.f32.mrf.mxu1 }
 0x6d2   :  { %v3236_v53 = vpop.f32.mrf.mxu2  ;;  %v3378_v3 = vrot.slane %v3196_v55, 5 }
 0x6d4   :  { %v3380_v20 = vsel %vm1434_vm5, %v3377_v18, %v3378_v3 }
 0x6d5   :  { %v3381_v45 = vsel %vm1436_vm6, %v3379_v2, %v3380_v20 }
 0x6d6   :  { %v3383_v62 = vadd.f32 %v3381_v45, %v3371_v48 }
 0x6d7   :  { %v3197_v23 = vpop.f32.mrf.mxu3 }
 0x6d8   :  { %v4344_v34 = vmul.f32 -1.442695, %v3383_v62  ;;  %v3404_v40 = vrot.slane %v3383_v62, 3 }
 0x6d9   :  { %v3221_v24 = vpop.f32.mrf.mxu1 }
 0x6da   :  { %4710 = vpow2.f32 %v4344_v34  ;;  %v3222_v10 = vadd.f32 %v3221_v24, %v3208_v19 }
 0x6dc   :  { %v3303_v44 = vadd.f32 %v3222_v10, %v7073_v9 }
 0x6de   :  { %v4341_v30 = vmul.f32 -1.442695, %v3303_v44 }
 0x6df   :  { %v3247_v4 = vpop.f32.mrf.mxu3 }
 0x6e0   :  { %v4711_v54 = vpop.eup %4710  ;;  %4712 = vpow2.f32 %v4341_v30  ;;  %v3248_v6 = vadd.f32 %v3247_v4, %v3234_v59 }
 0x6e1   :  { %v3387_v26 = vadd.f32 1.0, %v4711_v54  ;;  %v3223_v58 = vpop.f32.mrf.mxu1 }
 0x6e2   :  { %v3304_v29 = vadd.f32 %v3248_v6, %v7173_v49 }
 0x6e3   :  { %4714 = vrcp.f32 %v3387_v26  ;;  %v3399_v25 = vand.u32 2147483648, %v3387_v26  ;;  %v3397_v21 = vand.u32 2147483647, %v3387_v26  ;;  %vm3393_vm5 = vweird.f32 %v3387_v26 }
 0x6e4   :  { %v3260_v14 = vpop.f32.mrf.mxu0  ;;  %v4342_v61 = vmul.f32 -1.442695, %v3304_v29 }
 0x6e5   :  { %v3400_v51 = vor.u32 1.1754944e-38, %v3399_v25  ;;  %vm3398_vm12 = vcmp.eq.f32.partialorder %v3397_v21, 8.507059e+37 }
 0x6e6   :  { %v4713_v38 = vpop.eup %4712  ;;  %4716 = vpow2.f32 %v4342_v61 }
 0x6e7   :  { %v6537_v63 = vadd.f32 1.0, %v4713_v38  ;;  %v3249_v46 = vpop.f32.mrf.mxu3 }
 0x6e9   :  { %v4715_v32 = vpop.eup %4714  ;;  %4718 = vrcp.f32 %v6537_v63  ;;  %vm3324_vm15 = vweird.f32 %v6537_v63  ;;  %v3330_v23 = vand.u32 2147483648, %v6537_v63  ;;  %v3328_v10 = vand.u32 2147483647, %v6537_v63 }
 0x6ea   :  { %v3286_v36 = vpop.f32.mrf.mxu2  ;;  %v3389_v39 = vmul.f32 %v4715_v32, %v3387_v26  ;;  %4720 = vtanh.f32 %v3404_v40  ;;  %vm3394_vm4 = vweird.f32 %v4715_v32 }
 0x6eb   :  { %vm3395_vm6 = vmor %vm3393_vm5, %vm3394_vm4  ;;  %v3331_v61 = vor.u32 1.1754944e-38, %v3330_v23  ;;  %vm3329_vm3 = vcmp.eq.f32.partialorder %v3328_v10, 8.507059e+37 }
 0x6ec   :  { %v3262_v22 = vpop.f32.mrf.mxu0  ;;  %v4717_v27 = vpop.eup %4716  ;;  %v3390_v52 = vsub.f32 1.0, %v3389_v39 }
 0x6ed   :  { %v6540_v56 = vadd.f32 1.0, %v4717_v27 }
 0x6ee   :  { %v3391_v5 = vmul.f32 %v4715_v32, %v3390_v52 }
 0x6ef   :  { %4722 = vrcp.f32 %v6540_v56  ;;  %v4719_v12 = vpop.eup %4718  ;;  %v3345_v62 = vand.u32 2147483648, %v6540_v56  ;;  %vm3339_vm0 = vweird.f32 %v6540_v56  ;;  %v3343_v44 = vand.u32 2147483647, %v6540_v56 }
 0x6f0   :  { %v3392_v28 = vadd.f32 %v4715_v32, %v3391_v5  ;;  %v4721_v15 = vpop.eup %4720  ;;  %v3320_v33 = vmul.f32 %v4719_v12, %v6537_v63  ;;  %vm3325_vm13 = vweird.f32 %v4719_v12 }
 0x6f1   :  { %vm6552_vm1 = vmor %vm3324_vm15, %vm3325_vm13  ;;  %v3346_v29 = vor.u32 1.1754944e-38, %v3345_v62  ;;  %vm3344_vm7 = vcmp.eq.f32.partialorder %v3343_v44, 8.507059e+37 }
 0x6f2   :  { %v3288_v11 = vpop.f32.mrf.mxu2  ;;  %v3396_v7 = vsel %vm3395_vm6, %v4715_v32, %v3392_v28  ;;  %v3321_v50 = vsub.f32 1.0, %v3320_v33  ;;  %v4547_v33 = vld [vmem:[#allocation7 + $0x38] sm:$0xff] }
 0x6f3   :  { %v3401_v8 = vsel %vm3398_vm12, %v3400_v51, %v3396_v7 }
 0x6f4   :  { %v3408_v35 = vrot.slane %v3401_v8, 1  ;;  %v3411_v59 = vmul.f32 %v4721_v15, %v3401_v8  ;;  %v3322_v13 = vmul.f32 %v4719_v12, %v3321_v50  ;;  %v3414_v20 = vrot.slane %v3401_v8, 2  ;;  %v4544_v50 = vld [vmem:[#allocation7 + $0x20] sm:$0xff] }
 0x6f5   :  { %v4723_v57 = vpop.eup %4722 }
 0x6f6   :  { %v3335_v19 = vmul.f32 %v4723_v57, %v6540_v56  ;;  %v3410_v43 = vmul.f32 %v3408_v35, %v6357_v37  ;;  %vm3340_vm14 = vweird.f32 %v4723_v57  ;;  %v3323_v48 = vadd.f32 %v4719_v12, %v3322_v13 }
 0x6f7   :  { %vm6558_vm2 = vmor %vm3339_vm0, %vm3340_vm14 }
 0x6f8   :  { %v3336_v31 = vsub.f32 1.0, %v3335_v19  ;;  %v3412_v0 = vadd.f32 %v3411_v59, %v3410_v43 }
 0x6f9   :  { %v3273_v1 = vpop.f32.mrf.mxu1 }
 0x6fa   :  { %v3274_v60 = vadd.f32 %v3273_v1, %v3260_v14  ;;  %4724 = vtanh.f32 %v3412_v0  ;;  %v3337_v47 = vmul.f32 %v4723_v57, %v3336_v31  ;;  %v3327_v14 = vsel %vm6552_vm1, %v4719_v12, %v3323_v48  ;;  %v4545_v1 = vld [vmem:[#allocation7 + $0x28] sm:$0xff] }
 0x6fc   :  { %v3305_v41 = vadd.f32 %v3274_v60, %v5402_v16  ;;  %v3338_v45 = vadd.f32 %v4723_v57, %v3337_v47 }
 0x6fe   :  { %v4343_v55 = vmul.f32 -1.442695, %v3305_v41  ;;  %v3342_v26 = vsel %vm6558_vm2, %v4723_v57, %v3338_v45  ;;  %v4546_v57 = vld [vmem:[#allocation7 + $0x30] sm:$0xff] }
 0x6ff   :  { %v3299_v53 = vpop.f32.mrf.mxu3  ;;  %v3347_v63 = vsel %vm3344_vm7, %v3346_v29, %v3342_v26 }
 0x700   :  { %4726 = vpow2.f32 %v4343_v55  ;;  %v3300_v18 = vadd.f32 %v3299_v53, %v3286_v36  ;;  %v4725_v37 = vpop.eup %4724  ;;  %v3332_v36 = vsel %vm3329_vm3, %v3331_v61, %v3327_v14  ;;  %v3365_v22 = vmul.f32 %v3347_v63, %v6389_v42  ;;  %v4543_v55 = vld [vmem:[#allocation7 + $0x18] sm:$0xff] }
 0x701   :  { %v3275_v3 = vpop.f32.mrf.mxu1  ;;  %v3416_v34 = vmul.f32 %v4725_v37, %v3414_v20  ;;  %v4541_v37 = vld [vmem:[#allocation7 + $0x8] sm:$0xff] }
 0x702   :  { %v3306_v2 = vadd.f32 %v3300_v18, %v5411_v17 }
 0x703   :  { %v3417_v54 = vpack.c.bf16 %v3416_v34, %v3416_v34 }
 0x704   :  { %4728 = vtanh.f32 %v3306_v2  ;;  %v4542_v2 = vld [vmem:[#allocation7 + $0x10] sm:$0xff] }
 0x705   :  { %3427 = vmatmul.bf16.vlgmr.msrb.gmra.mxu0 %v3417_v54  ;;  %3453 = vmatmul.bf16.vlgmr.msrb.gmra.mxu2 %v3417_v54 }
 0x706   :  { %v4727_v30 = vpop.eup %4726  ;;  %3656 = vmatpush.bf16.msrb.mxu0 %v4547_v33 }
 0x707   :  { %v3318_v6 = vadd.f32 1.0, %v4727_v30  ;;  %v3301_v58 = vpop.f32.mrf.mxu3 }
 0x709   :  { %4730 = vrcp.f32 %v3318_v6  ;;  %v3360_v52 = vand.u32 2147483648, %v3318_v6  ;;  %v3358_v25 = vand.u32 2147483647, %v3318_v6  ;;  %vm3354_vm9 = vweird.f32 %v3318_v6 }
 0x70a   :  { %v4729_v38 = vpop.eup %4728  ;;  %3657 = vmatpush.bf16.msrb.mxu0 %v4546_v57 }
 0x70b   :  { %v3366_v46 = vmul.f32 %v4729_v38, %v3332_v36  ;;  %v3361_v5 = vor.u32 1.1754944e-38, %v3360_v52  ;;  %vm3359_vm11 = vcmp.eq.f32.partialorder %v3358_v25, 8.507059e+37 }
 0x70d   :  { %v6567_v39 = vadd.f32 %v3366_v46, %v3365_v22 }
 0x70e   :  { %3658 = vmatpush.bf16.msrb.mxu0 %v4545_v1 }
 0x70f   :  { %v4731_v32 = vpop.eup %4730  ;;  %4732 = vtanh.f32 %v6567_v39 }
 0x710   :  { %v3350_v40 = vmul.f32 %v4731_v32, %v3318_v6  ;;  %vm3355_vm8 = vweird.f32 %v4731_v32 }
 0x711   :  { %vm3356_vm10 = vmor %vm3354_vm9, %vm3355_vm8 }
 0x712   :  { %v3351_v27 = vsub.f32 1.0, %v3350_v40  ;;  %3659 = vmatpush.bf16.msrb.mxu0 %v4544_v50 }
 0x714   :  { %v3352_v56 = vmul.f32 %v4731_v32, %v3351_v27 }
 0x715   :  { %3479 = vmatmul.bf16.vlgmr.msra.gmra.mxu0 %v3417_v54  ;;  %3505 = vmatmul.bf16.vlgmr.msra.gmra.mxu2 %v3417_v54  ;;  %v4733_v42 = vpop.eup %4732 }
 0x716   :  { %v3353_v11 = vadd.f32 %v4731_v32, %v3352_v56  ;;  %3660 = vmatpush.bf16.msrb.mxu0 %v4543_v55 }
 0x718   :  { %v3357_v21 = vsel %vm3356_vm10, %v4731_v32, %v3353_v11 }
 0x719   :  { %v3362_v28 = vsel %vm3359_vm11, %v3361_v5, %v3357_v21 }
 0x71a   :  { %v3369_v12 = vmul.f32 %v4733_v42, %v3362_v28  ;;  %3661 = vmatpush.bf16.msrb.mxu0 %v4542_v2 }
 0x71c   :  { %v3418_v51 = vpack.c.bf16 %v3369_v12, %v3369_v12 }
 0x71e   :  { %3440 = vmatmul.bf16.vlgmr.msrb.gmra.mxu1 %v3418_v51  ;;  %3466 = vmatmul.bf16.vlgmr.msrb.gmra.mxu3 %v3418_v51 }
 0x71f   :  { %3662 = vmatpush.bf16.msrb.mxu0 %v4541_v37 }
 0x72e   :  { %3492 = vmatmul.bf16.vlgmr.msra.gmra.mxu1 %v3418_v51  ;;  %3518 = vmatmul.bf16.vlgmr.msra.gmra.mxu3 %v3418_v51 }
 0x782   :  { %v3428_v7 = vpop.f32.mrf.mxu0 }
 0x788   :  { %v3454_v8 = vpop.f32.mrf.mxu2 }
 0x78a   :  { %v3430_v15 = vpop.f32.mrf.mxu0 }
 0x790   :  { %v3456_v35 = vpop.f32.mrf.mxu2 }
 0x792   :  { %v3480_v19 = vpop.f32.mrf.mxu0 }
 0x798   :  { %v3506_v59 = vpop.f32.mrf.mxu2 }
 0x79a   :  { %v3482_v31 = vpop.f32.mrf.mxu0 }
 0x79b   :  { %v3441_v43 = vpop.f32.mrf.mxu1 }
 0x79c   :  { %v3442_v60 = vadd.f32 %v3441_v43, %v3428_v7 }
 0x79e   :  { %v3523_v0 = vadd.f32 %v3442_v60, %v7073_v9  ;;  %v4540_v9 = vld [vmem:[#allocation7] sm:$0xff] }
 0x79f   :  { %3663 = vmatpush.bf16.msrb.mxu0 %v4540_v9 }
 0x7a0   :  { %v4345_v41 = vmul.f32 -1.442695, %v3523_v0  ;;  %v3508_v18 = vpop.f32.mrf.mxu2 }
 0x7a1   :  { %v3467_v47 = vpop.f32.mrf.mxu3 }
 0x7a2   :  { %4734 = vpow2.f32 %v4345_v41  ;;  %v3468_v53 = vadd.f32 %v3467_v47, %v3454_v8 }
 0x7a3   :  { %v3443_v13 = vpop.f32.mrf.mxu1 }
 0x7a4   :  { %v3524_v3 = vadd.f32 %v3468_v53, %v7173_v49 }
 0x7a6   :  { %v4346_v20 = vmul.f32 -1.442695, %v3524_v3 }
 0x7a8   :  { %v4735_v48 = vpop.eup %4734  ;;  %4736 = vpow2.f32 %v4346_v20 }
 0x7a9   :  { %v3536_v45 = vadd.f32 1.0, %v4735_v48  ;;  %v3469_v62 = vpop.f32.mrf.mxu3 }
 0x7ab   :  { %4738 = vrcp.f32 %v3536_v45  ;;  %v3493_v23 = vpop.f32.mrf.mxu1  ;;  %v3550_v46 = vand.u32 2147483648, %v3536_v45  ;;  %vm3544_vm5 = vweird.f32 %v3536_v45  ;;  %v3548_v40 = vand.u32 2147483647, %v3536_v45 }
 0x7ac   :  { %v3494_v34 = vadd.f32 %v3493_v23, %v3480_v19 }
 0x7ad   :  { %v3551_v25 = vor.u32 1.1754944e-38, %v3550_v46  ;;  %vm3549_vm14 = vcmp.eq.f32.partialorder %v3548_v40, 8.507059e+37 }
 0x7ae   :  { %v4737_v24 = vpop.eup %4736  ;;  %v3525_v10 = vadd.f32 %v3494_v34, %v5402_v16 }
 0x7af   :  { %v3537_v44 = vadd.f32 1.0, %v4737_v24 }
 0x7b0   :  { %v4347_v30 = vmul.f32 -1.442695, %v3525_v10 }
 0x7b1   :  { %v4739_v49 = vpop.eup %4738  ;;  %4740 = vrcp.f32 %v3537_v44  ;;  %v3519_v4 = vpop.f32.mrf.mxu3  ;;  %v3565_v27 = vand.u32 2147483648, %v3537_v44  ;;  %vm3559_vm13 = vweird.f32 %v3537_v44 }
 0x7b2   :  { %v3540_v54 = vmul.f32 %v4739_v49, %v3536_v45  ;;  %4742 = vpow2.f32 %v4347_v30  ;;  %v3520_v6 = vadd.f32 %v3519_v4, %v3506_v59  ;;  %vm3545_vm4 = vweird.f32 %v4739_v49 }
 0x7b3   :  { %v3495_v14 = vpop.f32.mrf.mxu1  ;;  %vm3546_vm6 = vmor %vm3544_vm5, %vm3545_vm4  ;;  %v3566_v21 = vor.u32 1.1754944e-38, %v3565_v27 }
 0x7b4   :  { %v3541_v26 = vsub.f32 1.0, %v3540_v54  ;;  %v3526_v58 = vadd.f32 %v3520_v6, %v5411_v17  ;;  %v3563_v17 = vand.u32 2147483647, %v3537_v44 }
 0x7b6   :  { %v3542_v29 = vmul.f32 %v4739_v49, %v3541_v26  ;;  %4744 = vtanh.f32 %v3526_v58  ;;  %vm3564_vm0 = vcmp.eq.f32.partialorder %v3563_v17, 8.507059e+37 }
 0x7b7   :  { %v4741_v61 = vpop.eup %4740 }
 0x7b8   :  { %v4743_v38 = vpop.eup %4742  ;;  %v3555_v36 = vmul.f32 %v4741_v61, %v3537_v44  ;;  %v3543_v63 = vadd.f32 %v4739_v49, %v3542_v29  ;;  %vm3560_vm12 = vweird.f32 %v4741_v61 }
 0x7b9   :  { %v3538_v16 = vadd.f32 1.0, %v4743_v38  ;;  %v3521_v22 = vpop.f32.mrf.mxu3  ;;  %vm3561_vm15 = vmor %vm3559_vm13, %vm3560_vm12 }
 0x7ba   :  { %v3556_v32 = vsub.f32 1.0, %v3555_v36  ;;  %v3547_v56 = vsel %vm3546_vm6, %v4739_v49, %v3543_v63 }
 0x7bb   :  { %4746 = vrcp.f32 %v3538_v16  ;;  %v3552_v42 = vsel %vm3549_vm14, %v3551_v25, %v3547_v56  ;;  %v3580_v57 = vand.u32 2147483648, %v3538_v16  ;;  %v3578_v1 = vand.u32 2147483647, %v3538_v16 }
 0x7bc   :  { %v3557_v52 = vmul.f32 %v4741_v61, %v3556_v32  ;;  %v4745_v5 = vpop.eup %4744  ;;  %vm3574_vm2 = vweird.f32 %v3538_v16 }
 0x7bd   :  { %v3586_v15 = vmul.f32 %v4745_v5, %v3552_v42  ;;  %v3581_v59 = vor.u32 1.1754944e-38, %v3580_v57  ;;  %vm3579_vm7 = vcmp.eq.f32.partialorder %v3578_v1, 8.507059e+37 }
 0x7be   :  { %v3558_v11 = vadd.f32 %v4741_v61, %v3557_v52 }
 0x7c0   :  { %v3562_v28 = vsel %vm3561_vm15, %v4741_v61, %v3558_v11 }
 0x7c1   :  { %v4747_v12 = vpop.eup %4746  ;;  %v3567_v51 = vsel %vm3564_vm0, %v3566_v21, %v3562_v28 }
 0x7c2   :  { %v3570_v7 = vmul.f32 %v4747_v12, %v3538_v16  ;;  %v3585_v8 = vmul.f32 %v3567_v51, %v6567_v39  ;;  %vm3575_vm1 = vweird.f32 %v4747_v12  ;;  %v3607_v39 = vld [vmem:[%s6587_s6] sm:$0x1] }
 0x7c3   :  { %vm3576_vm3 = vmor %vm3574_vm2, %vm3575_vm1 }
 0x7c4   :  { %v3571_v33 = vsub.f32 1.0, %v3570_v7  ;;  %v3587_v35 = vadd.f32 %v3586_v15, %v3585_v8 }
 0x7c6   :  { %v3572_v19 = vmul.f32 %v4747_v12, %v3571_v33  ;;  %4748 = vtanh.f32 %v3587_v35 }
 0x7c8   :  { %v3573_v43 = vadd.f32 %v4747_v12, %v3572_v19 }
 0x7ca   :  { %v3577_v60 = vsel %vm3576_vm3, %v4747_v12, %v3573_v43 }
 0x7cb   :  { %v3582_v50 = vsel %vm3579_vm7, %v3581_v59, %v3577_v60 }
 0x7cc   :  { %v4749_v31 = vpop.eup %4748 }
 0x7cd   :  { %v3589_v0 = vmul.f32 %v4749_v31, %v3582_v50 }
 0x7cf   :  { %v3590_v41 = vpack.c.bf16 %v3589_v0, %v3589_v0 }
 0x7d1   :  { %3664 = vmatmul.bf16.vlgmr.msrb.gmra.mxu0 %v3590_v41 }
 0x84e   :  { %v3665_v55 = vpop.f32.mrf.mxu0 }
 0x84f   :  { %v3666_v47 = vadd.f32 %v3665_v55, %v3607_v39 }
 0x851   :  { %3669 = vst [vmem:[%s6588_s7] sm:$0x1] %v3666_v47 }
 0x856   :  { %v3667_v53 = vpop.f32.mrf.mxu0 }
 0x857   :  { %3674 = vsyncpa [#allocation4], 1 }
 0x858   :  { %3675 = vsyncpa [#allocation6], 1 }

</bundles_post_ra>
